<compile_context>
chip_gen: v6e
topology: v6e:2x2x1
jax: 0.10.0
libtpu: 0.0.40
codegen_flags: <defaults>
</compile_context>

<pallas_src>
import numpy as np

import jax
import jax.numpy as jnp
from jax.experimental import pallas as pl
from jax.experimental.pallas import tpu as pltpu

B = 2
C_IN = 16
H = W = 14
POOL_K, POOL_S = 5, 3
HP = WP = (H - POOL_K) // POOL_S + 1     # 4
NP = HP * WP                             # 16 pooled positions
C_MID = 128
FLAT = C_MID * NP                        # 2048
HID = 1024
NUM_CLASSES = 10
OUT_PAD = 128                            # lane-dense padded classifier width
BN_EPS = 1e-5

TK = 1024                                # fc1 reduction tile (w1 streamed in (TK, HID) slabs)
KT = FLAT // TK                          # 2 grid steps (was 4; see header)


def inception_aux_kernel(x_ref, pm_ref, wc_ref, bc_ref, w1_ref, b1_ref,
                         w2_ref, b2_ref, out_ref, hflat_ref, z1_ref):
    # x_ref:   (B, H*W, Cin)  f32   NHWC flattened over spatial
    # pm_ref:  (16, H*W)      f32   AvgPool(5,3) averaging matrix
    # wc_ref:  (Cin, 128)     f32   BN-folded 1x1 conv weight
    # bc_ref:  (1, 128)       f32   BN-folded conv bias
    # w1_ref:  (TK, 1024)     bf16  streamed fc1 weight tile (columns permuted to (h,w,c))
    # b1_ref:  (1, 1024)      f32
    # w2_ref:  (1024, 128)    bf16  fc2 weight, zero-padded to 128 output lanes
    # b2_ref:  (1, 128)       f32   zero-padded fc2 bias
    # out_ref: (B, 128)       f32   padded logits
    # hflat_ref: (B, 2048)    f32   VMEM scratch: flattened post-conv activation
    # z1_ref:    (B, 1024)    f32   VMEM scratch: fc1 accumulator
    k = pl.program_id(0)
    bsz = x_ref.shape[0]

    @pl.when(k == 0)
    def _prologue():
        pm = pm_ref[...]                                   # (16, 196)
        # AvgPool2d(5,3): all 16 windows of one image as a single matmul (tiny, per batch).
        pooled = jnp.concatenate(
            [jnp.dot(pm, x_ref[b], preferred_element_type=jnp.float32)
             for b in range(bsz)], axis=0)                 # (B*16, Cin)
        # One batched 1x1-conv + folded-BatchNorm + ReLU matmul over all B*16 positions.
        h = jnp.dot(pooled, wc_ref[...], preferred_element_type=jnp.float32) + bc_ref[...]
        h = jnp.maximum(h, 0.0)                            # (B*16, 128)
        # Flatten in (h, w, c) order: lane-concatenate the 16 position rows of each batch
        # (128-aligned pieces) and write one 2048-lane row per batch.
        for b in range(bsz):
            row = jnp.concatenate(
                [h[b * NP + p:b * NP + p + 1, :] for p in range(NP)], axis=1)   # (1, 2048)
            hflat_ref[b:b + 1, :] = row
        # Init the fc1 accumulator with its bias (broadcast over batch).
        z1_ref[...] = jnp.zeros_like(z1_ref) + b1_ref[...]

    # Steady state: one (B, TK) x (TK, HID) slab of the fc1 reduction per grid step.
    off = pl.multiple_of(k * TK, TK)
    h_blk = hflat_ref[:, pl.ds(off, TK)].astype(jnp.bfloat16)   # tiny cast, hidden under DMA
    z1_ref[...] += jnp.dot(h_blk, w1_ref[...], preferred_element_type=jnp.float32)

    @pl.when(k == pl.num_programs(0) - 1)
    def _epilogue():
        z = jnp.maximum(z1_ref[...], 0.0)                  # ReLU; Dropout(p=0.7) eval = identity
        out_ref[...] = (jnp.dot(z.astype(jnp.bfloat16), w2_ref[...],
                                preferred_element_type=jnp.float32) + b2_ref[...])


@jax.jit
def inception_aux_pallas(x_nchw, pm, wc_folded, bc_folded, w1_bf16, b1, w2_bf16, b2_pad):
    bsz = x_nchw.shape[0]
    x_flat = jnp.transpose(x_nchw, (0, 2, 3, 1)).reshape(bsz, H * W, C_IN)  # NCHW -> (B, HW, C)

    flops = 2 * bsz * (NP * H * W * C_IN               # pooling matmul
                       + NP * C_IN * C_MID             # 1x1 conv
                       + FLAT * HID                    # fc1
                       + HID * OUT_PAD)                # fc2
    bytes_accessed = (x_flat.size * 4 + pm.size * 4 + wc_folded.size * 4
                      + w1_bf16.size * 2 + w2_bf16.size * 2
                      + HID * 4 + 2 * C_MID * 4 + bsz * OUT_PAD * 4)

    out_padded = pl.pallas_call(
        inception_aux_kernel,
        out_shape=jax.ShapeDtypeStruct((bsz, OUT_PAD), jnp.float32),
        grid=(KT,),
        in_specs=[
            pl.BlockSpec((bsz, H * W, C_IN), lambda k: (0, 0, 0)),   # x (resident)
            pl.BlockSpec((NP, H * W), lambda k: (0, 0)),             # pool matrix
            pl.BlockSpec((C_IN, C_MID), lambda k: (0, 0)),           # conv weight
            pl.BlockSpec((1, C_MID), lambda k: (0, 0)),              # conv bias
            pl.BlockSpec((TK, HID), lambda k: (k, 0)),               # w1 streamed tiles
            pl.BlockSpec((1, HID), lambda k: (0, 0)),                # b1
            pl.BlockSpec((HID, OUT_PAD), lambda k: (0, 0)),          # w2 (padded)
            pl.BlockSpec((1, OUT_PAD), lambda k: (0, 0)),            # b2 (padded)
        ],
        out_specs=pl.BlockSpec((bsz, OUT_PAD), lambda k: (0, 0)),
        scratch_shapes=[
            pltpu.VMEM((bsz, FLAT), jnp.float32),    # flattened activation
            pltpu.VMEM((bsz, HID), jnp.float32),     # fc1 accumulator
        ],
        compiler_params=pltpu.CompilerParams(
            dimension_semantics=("arbitrary",),      # reduction axis (sequential accumulate)
            vmem_limit_bytes=12 * 1024 * 1024,       # footprint ~5 MB; was 32 MiB
        ),
        cost_estimate=pl.CostEstimate(flops=flops, transcendentals=0,
                                      bytes_accessed=bytes_accessed),
    )(x_flat, pm, wc_folded, bc_folded.reshape(1, -1),
      w1_bf16, b1.reshape(1, -1), w2_bf16, b2_pad.reshape(1, -1))
    return out_padded[:, :NUM_CLASSES]


def make_pool_matrix():
    """(NP, H*W) matrix M s.t. pooled[p] = sum_q M[p, q] * x_flat[q] == AvgPool2d(5,3)."""
    pm = np.zeros((NP, H * W), np.float32)
    inv = 1.0 / float(POOL_K * POOL_K)
    for i in range(HP):
        for j in range(WP):
            p = i * WP + j
            for di in range(POOL_K):
                for dj in range(POOL_K):
                    pm[p, (POOL_S * i + di) * W + (POOL_S * j + dj)] = inv
    return jnp.asarray(pm)


def make_params(key):
    ks = jax.random.split(key, 10)
    p = {}
    # Conv2d(Cin, 128, 1x1)
    p["w_conv"] = jax.random.normal(ks[0], (C_MID, C_IN), jnp.float32) * 0.1
    p["b_conv"] = jax.random.normal(ks[1], (C_MID,), jnp.float32) * 0.05
    # BatchNorm2d(128) (eval-mode running stats + affine)
    p["bn_gamma"] = 0.5 + jax.random.uniform(ks[2], (C_MID,), jnp.float32)
    p["bn_beta"] = jax.random.normal(ks[3], (C_MID,), jnp.float32) * 0.05
    p["bn_mean"] = jax.random.normal(ks[4], (C_MID,), jnp.float32) * 0.05
    p["bn_var"] = 0.5 + jax.random.uniform(ks[5], (C_MID,), jnp.float32)
    # Linear(2048, 1024), Linear(1024, num_classes) in PyTorch (out, in) convention
    p["w_fc1"] = jax.random.normal(ks[6], (HID, FLAT), jnp.float32) * 0.02
    p["b_fc1"] = jax.random.normal(ks[7], (HID,), jnp.float32) * 0.02
    p["w_fc2"] = jax.random.normal(ks[8], (NUM_CLASSES, HID), jnp.float32) * 0.02
    p["b_fc2"] = jax.random.normal(ks[9], (NUM_CLASSES,), jnp.float32) * 0.02
    return p


def prepare_kernel_params(p):
    # Fold BatchNorm (eval) into the 1x1 conv.
    scale = p["bn_gamma"] / jnp.sqrt(p["bn_var"] + BN_EPS)                 # (128,)
    wc_folded = (p["w_conv"] * scale[:, None]).T                           # (Cin, 128) f32
    bc_folded = (p["b_conv"] - p["bn_mean"]) * scale + p["bn_beta"]        # (128,)     f32
    # Permute fc1 columns: PyTorch flattens (C,H,W); kernel accumulates in (H,W,C).
    hw = jnp.arange(NP)
    c = jnp.arange(C_MID)
    old_idx = (c[None, :] * NP + hw[:, None]).reshape(-1)                  # new_j -> old_j
    w1_bf16 = p["w_fc1"][:, old_idx].T.astype(jnp.bfloat16)                # (2048, 1024) bf16
    # fc2: transpose + zero-pad to 128 lanes, bf16 weights / f32 bias.
    w2_pad = jnp.zeros((HID, OUT_PAD), jnp.float32).at[:, :NUM_CLASSES].set(
        p["w_fc2"].T).astype(jnp.bfloat16)                                 # (1024, 128) bf16
    b2_pad = jnp.zeros((OUT_PAD,), jnp.float32).at[:NUM_CLASSES].set(p["b_fc2"])
    pm = make_pool_matrix()
    return pm, wc_folded, bc_folded, w1_bf16, p["b_fc1"], w2_pad, b2_pad


def reference_forward(x_nchw, p):
    """Plain-JAX f32 reference following PyTorch NCHW semantics exactly (eval mode)."""
    pooled = jnp.stack(
        [jnp.stack(
            [jnp.mean(x_nchw[:, :, 3 * i:3 * i + 5, 3 * j:3 * j + 5], axis=(2, 3))
             for j in range(WP)], axis=-1)
         for i in range(HP)], axis=-2)                                     # (B, Cin, 4, 4)
    y = jnp.einsum("bchw,oc->bohw", pooled, p["w_conv"]) + p["b_conv"][None, :, None, None]
    y = ((y - p["bn_mean"][None, :, None, None])
         / jnp.sqrt(p["bn_var"][None, :, None, None] + BN_EPS)
         * p["bn_gamma"][None, :, None, None] + p["bn_beta"][None, :, None, None])
    y = jnp.maximum(y, 0.0)
    flat = y.reshape(y.shape[0], -1)                                       # (B, 2048) (C,H,W)
    z1 = jnp.maximum(flat @ p["w_fc1"].T + p["b_fc1"], 0.0)
    return z1 @ p["w_fc2"].T + p["b_fc2"]


if __name__ == "__main__":
    key = jax.random.PRNGKey(0)
    kx, kp = jax.random.split(key)
    x = jax.random.normal(kx, (B, C_IN, H, W), jnp.float32)                # NCHW input

    params = make_params(kp)
    kern_args = prepare_kernel_params(params)

    out = inception_aux_pallas(x, *kern_args)
    out = jax.block_until_ready(out)

    ref = reference_forward(x, params)
    assert out.shape == (B, NUM_CLASSES)
    max_diff = jnp.max(jnp.abs(out - ref))
    # bf16 fc1/fc2 weights + bf16 activations with f32 accumulation -> relaxed tolerance.
    assert jnp.allclose(out, ref, rtol=2e-2, atol=2e-2), f"max abs diff {max_diff}"

    print("KERNEL_OK")
</pallas_src>

<mosaic_0001>
module attributes {stable_mosaic.version = 11 : i64} {
  func.func @inception_aux_kernel(%arg0: i32, %arg1: memref<2x196x16xf32, #tpu.memory_space<vmem>>, %arg2: memref<16x196xf32, #tpu.memory_space<vmem>>, %arg3: memref<16x128xf32, #tpu.memory_space<vmem>>, %arg4: memref<1x128xf32, #tpu.memory_space<vmem>>, %arg5: memref<1024x1024xbf16, #tpu.memory_space<vmem>>, %arg6: memref<1x1024xf32, #tpu.memory_space<vmem>>, %arg7: memref<1024x128xbf16, #tpu.memory_space<vmem>>, %arg8: memref<1x128xf32, #tpu.memory_space<vmem>>, %arg9: memref<2x128xf32, #tpu.memory_space<vmem>>, %arg10: memref<2x2048xf32, #tpu.memory_space<vmem>>, %arg11: memref<2x1024xf32, #tpu.memory_space<vmem>>) attributes {dimension_semantics = [#tpu.dimension_semantics<arbitrary>], iteration_bounds = array<i64: 2>, scalar_prefetch = 0 : i64, scratch_operands = 2 : i64, tpu.core_type = #tpu.core_type<tc>, window_params = [{pipeline_mode = #tpu.pipeline_mode<synchronous>, transform_indices = @transform_0, window_bounds = array<i64: 2, 196, 16>}, {pipeline_mode = #tpu.pipeline_mode<synchronous>, transform_indices = @transform_1, window_bounds = array<i64: 16, 196>}, {pipeline_mode = #tpu.pipeline_mode<synchronous>, transform_indices = @transform_2, window_bounds = array<i64: 16, 128>}, {pipeline_mode = #tpu.pipeline_mode<synchronous>, transform_indices = @transform_3, window_bounds = array<i64: 1, 128>}, {transform_indices = @transform_4, window_bounds = array<i64: 1024, 1024>}, {pipeline_mode = #tpu.pipeline_mode<synchronous>, transform_indices = @transform_5, window_bounds = array<i64: 1, 1024>}, {pipeline_mode = #tpu.pipeline_mode<synchronous>, transform_indices = @transform_6, window_bounds = array<i64: 1024, 128>}, {pipeline_mode = #tpu.pipeline_mode<synchronous>, transform_indices = @transform_7, window_bounds = array<i64: 1, 128>}, {pipeline_mode = #tpu.pipeline_mode<synchronous>, transform_indices = @transform_8, window_bounds = array<i64: 2, 128>}]} {
    %c0_i32 = arith.constant 0 : i32
    %0 = arith.cmpi eq, %arg0, %c0_i32 : i32
    %1 = arith.extui %0 : i1 to i32
    %c0_i32_0 = arith.constant 0 : i32
    %2 = arith.cmpi ne, %1, %c0_i32_0 : i32
    scf.if %2 {
      %c0_8 = arith.constant 0 : index
      %c0_9 = arith.constant 0 : index
      %16 = vector.load %arg2[%c0_8, %c0_9] : memref<16x196xf32, #tpu.memory_space<vmem>>, vector<16x196xf32>
      %c0_10 = arith.constant 0 : index
      %c0_11 = arith.constant 0 : index
      %c0_12 = arith.constant 0 : index
      %17 = vector.load %arg1[%c0_10, %c0_11, %c0_12] : memref<2x196x16xf32, #tpu.memory_space<vmem>>, vector<1x196x16xf32>
      %18 = vector.shape_cast %17 : vector<1x196x16xf32> to vector<196x16xf32>
      %cst_13 = arith.constant dense<0.000000e+00> : vector<16x16xf32>
      %19 = tpu.matmul %16, %18, %cst_13 {dimension_numbers = #tpu.dot_dimension_numbers<[1], [0], [0], [1], [0, 0, 1, 1], [], []>} : vector<16x196xf32>, vector<196x16xf32>, vector<16x16xf32> -> vector<16x16xf32>
      %c1 = arith.constant 1 : index
      %c0_14 = arith.constant 0 : index
      %c0_15 = arith.constant 0 : index
      %20 = vector.load %arg1[%c1, %c0_14, %c0_15] : memref<2x196x16xf32, #tpu.memory_space<vmem>>, vector<1x196x16xf32>
      %21 = vector.shape_cast %20 : vector<1x196x16xf32> to vector<196x16xf32>
      %cst_16 = arith.constant dense<0.000000e+00> : vector<16x16xf32>
      %22 = tpu.matmul %16, %21, %cst_16 {dimension_numbers = #tpu.dot_dimension_numbers<[1], [0], [0], [1], [0, 0, 1, 1], [], []>} : vector<16x196xf32>, vector<196x16xf32>, vector<16x16xf32> -> vector<16x16xf32>
      %23 = tpu.concatenate %19, %22 in 0 : vector<16x16xf32>, vector<16x16xf32> -> vector<32x16xf32>
      %c0_17 = arith.constant 0 : index
      %c0_18 = arith.constant 0 : index
      %24 = vector.load %arg3[%c0_17, %c0_18] : memref<16x128xf32, #tpu.memory_space<vmem>>, vector<16x128xf32>
      %cst_19 = arith.constant dense<0.000000e+00> : vector<32x128xf32>
      %25 = tpu.matmul %23, %24, %cst_19 {dimension_numbers = #tpu.dot_dimension_numbers<[1], [0], [0], [1], [0, 0, 1, 1], [], []>} : vector<32x16xf32>, vector<16x128xf32>, vector<32x128xf32> -> vector<32x128xf32>
      %c0_20 = arith.constant 0 : index
      %c0_21 = arith.constant 0 : index
      %26 = vector.load %arg4[%c0_20, %c0_21] : memref<1x128xf32, #tpu.memory_space<vmem>>, vector<1x128xf32>
      %27 = vector.broadcast %26 : vector<1x128xf32> to vector<32x128xf32>
      %28 = arith.addf %25, %27 : vector<32x128xf32>
      %cst_22 = arith.constant 0.000000e+00 : f32
      %29 = vector.broadcast %cst_22 : f32 to vector<32x128xf32>
      %30 = arith.maximumf %28, %29 : vector<32x128xf32>
      %31 = vector.extract_strided_slice %30 {offsets = [0, 0], sizes = [1, 128], strides = [1, 1]} : vector<32x128xf32> to vector<1x128xf32>
      %32 = vector.extract_strided_slice %30 {offsets = [1, 0], sizes = [1, 128], strides = [1, 1]} : vector<32x128xf32> to vector<1x128xf32>
      %33 = vector.extract_strided_slice %30 {offsets = [2, 0], sizes = [1, 128], strides = [1, 1]} : vector<32x128xf32> to vector<1x128xf32>
      %34 = vector.extract_strided_slice %30 {offsets = [3, 0], sizes = [1, 128], strides = [1, 1]} : vector<32x128xf32> to vector<1x128xf32>
      %35 = vector.extract_strided_slice %30 {offsets = [4, 0], sizes = [1, 128], strides = [1, 1]} : vector<32x128xf32> to vector<1x128xf32>
      %36 = vector.extract_strided_slice %30 {offsets = [5, 0], sizes = [1, 128], strides = [1, 1]} : vector<32x128xf32> to vector<1x128xf32>
      %37 = vector.extract_strided_slice %30 {offsets = [6, 0], sizes = [1, 128], strides = [1, 1]} : vector<32x128xf32> to vector<1x128xf32>
      %38 = vector.extract_strided_slice %30 {offsets = [7, 0], sizes = [1, 128], strides = [1, 1]} : vector<32x128xf32> to vector<1x128xf32>
      %39 = vector.extract_strided_slice %30 {offsets = [8, 0], sizes = [1, 128], strides = [1, 1]} : vector<32x128xf32> to vector<1x128xf32>
      %40 = vector.extract_strided_slice %30 {offsets = [9, 0], sizes = [1, 128], strides = [1, 1]} : vector<32x128xf32> to vector<1x128xf32>
      %41 = vector.extract_strided_slice %30 {offsets = [10, 0], sizes = [1, 128], strides = [1, 1]} : vector<32x128xf32> to vector<1x128xf32>
      %42 = vector.extract_strided_slice %30 {offsets = [11, 0], sizes = [1, 128], strides = [1, 1]} : vector<32x128xf32> to vector<1x128xf32>
      %43 = vector.extract_strided_slice %30 {offsets = [12, 0], sizes = [1, 128], strides = [1, 1]} : vector<32x128xf32> to vector<1x128xf32>
      %44 = vector.extract_strided_slice %30 {offsets = [13, 0], sizes = [1, 128], strides = [1, 1]} : vector<32x128xf32> to vector<1x128xf32>
      %45 = vector.extract_strided_slice %30 {offsets = [14, 0], sizes = [1, 128], strides = [1, 1]} : vector<32x128xf32> to vector<1x128xf32>
      %46 = vector.extract_strided_slice %30 {offsets = [15, 0], sizes = [1, 128], strides = [1, 1]} : vector<32x128xf32> to vector<1x128xf32>
      %47 = tpu.concatenate %31, %32, %33, %34, %35, %36, %37, %38, %39, %40, %41, %42, %43, %44, %45, %46 in 1 : vector<1x128xf32>, vector<1x128xf32>, vector<1x128xf32>, vector<1x128xf32>, vector<1x128xf32>, vector<1x128xf32>, vector<1x128xf32>, vector<1x128xf32>, vector<1x128xf32>, vector<1x128xf32>, vector<1x128xf32>, vector<1x128xf32>, vector<1x128xf32>, vector<1x128xf32>, vector<1x128xf32>, vector<1x128xf32> -> vector<1x2048xf32>
      %c0_23 = arith.constant 0 : index
      %c0_24 = arith.constant 0 : index
      %48 = vector.load %arg10[%c0_23, %c0_24] : memref<2x2048xf32, #tpu.memory_space<vmem>>, vector<1x2048xf32>
      tpu.vector_store %arg10[%c0_23, %c0_24], %47 {strides = array<i32>} : memref<2x2048xf32, #tpu.memory_space<vmem>>, vector<1x2048xf32>,
      %49 = vector.extract_strided_slice %30 {offsets = [16, 0], sizes = [1, 128], strides = [1, 1]} : vector<32x128xf32> to vector<1x128xf32>
      %50 = vector.extract_strided_slice %30 {offsets = [17, 0], sizes = [1, 128], strides = [1, 1]} : vector<32x128xf32> to vector<1x128xf32>
      %51 = vector.extract_strided_slice %30 {offsets = [18, 0], sizes = [1, 128], strides = [1, 1]} : vector<32x128xf32> to vector<1x128xf32>
      %52 = vector.extract_strided_slice %30 {offsets = [19, 0], sizes = [1, 128], strides = [1, 1]} : vector<32x128xf32> to vector<1x128xf32>
      %53 = vector.extract_strided_slice %30 {offsets = [20, 0], sizes = [1, 128], strides = [1, 1]} : vector<32x128xf32> to vector<1x128xf32>
      %54 = vector.extract_strided_slice %30 {offsets = [21, 0], sizes = [1, 128], strides = [1, 1]} : vector<32x128xf32> to vector<1x128xf32>
      %55 = vector.extract_strided_slice %30 {offsets = [22, 0], sizes = [1, 128], strides = [1, 1]} : vector<32x128xf32> to vector<1x128xf32>
      %56 = vector.extract_strided_slice %30 {offsets = [23, 0], sizes = [1, 128], strides = [1, 1]} : vector<32x128xf32> to vector<1x128xf32>
      %57 = vector.extract_strided_slice %30 {offsets = [24, 0], sizes = [1, 128], strides = [1, 1]} : vector<32x128xf32> to vector<1x128xf32>
      %58 = vector.extract_strided_slice %30 {offsets = [25, 0], sizes = [1, 128], strides = [1, 1]} : vector<32x128xf32> to vector<1x128xf32>
      %59 = vector.extract_strided_slice %30 {offsets = [26, 0], sizes = [1, 128], strides = [1, 1]} : vector<32x128xf32> to vector<1x128xf32>
      %60 = vector.extract_strided_slice %30 {offsets = [27, 0], sizes = [1, 128], strides = [1, 1]} : vector<32x128xf32> to vector<1x128xf32>
      %61 = vector.extract_strided_slice %30 {offsets = [28, 0], sizes = [1, 128], strides = [1, 1]} : vector<32x128xf32> to vector<1x128xf32>
      %62 = vector.extract_strided_slice %30 {offsets = [29, 0], sizes = [1, 128], strides = [1, 1]} : vector<32x128xf32> to vector<1x128xf32>
      %63 = vector.extract_strided_slice %30 {offsets = [30, 0], sizes = [1, 128], strides = [1, 1]} : vector<32x128xf32> to vector<1x128xf32>
      %64 = vector.extract_strided_slice %30 {offsets = [31, 0], sizes = [1, 128], strides = [1, 1]} : vector<32x128xf32> to vector<1x128xf32>
      %65 = tpu.concatenate %49, %50, %51, %52, %53, %54, %55, %56, %57, %58, %59, %60, %61, %62, %63, %64 in 1 : vector<1x128xf32>, vector<1x128xf32>, vector<1x128xf32>, vector<1x128xf32>, vector<1x128xf32>, vector<1x128xf32>, vector<1x128xf32>, vector<1x128xf32>, vector<1x128xf32>, vector<1x128xf32>, vector<1x128xf32>, vector<1x128xf32>, vector<1x128xf32>, vector<1x128xf32>, vector<1x128xf32>, vector<1x128xf32> -> vector<1x2048xf32>
      %c1_25 = arith.constant 1 : index
      %c0_26 = arith.constant 0 : index
      %66 = vector.load %arg10[%c1_25, %c0_26] : memref<2x2048xf32, #tpu.memory_space<vmem>>, vector<1x2048xf32>
      tpu.vector_store %arg10[%c1_25, %c0_26], %65 {strides = array<i32>} : memref<2x2048xf32, #tpu.memory_space<vmem>>, vector<1x2048xf32>,
      %cst_27 = arith.constant 0.000000e+00 : f32
      %67 = vector.broadcast %cst_27 : f32 to vector<2x1024xf32>
      %c0_28 = arith.constant 0 : index
      %c0_29 = arith.constant 0 : index
      %68 = vector.load %arg6[%c0_28, %c0_29] : memref<1x1024xf32, #tpu.memory_space<vmem>>, vector<1x1024xf32>
      %69 = vector.broadcast %68 : vector<1x1024xf32> to vector<2x1024xf32>
      %70 = arith.addf %67, %69 : vector<2x1024xf32>
      %c0_30 = arith.constant 0 : index
      %c0_31 = arith.constant 0 : index
      %71 = vector.load %arg11[%c0_30, %c0_31] : memref<2x1024xf32, #tpu.memory_space<vmem>>, vector<2x1024xf32>
      tpu.vector_store %arg11[%c0_30, %c0_31], %70 {strides = array<i32>} : memref<2x1024xf32, #tpu.memory_space<vmem>>, vector<2x1024xf32>,
    } else {
    }
    %c1024_i32 = arith.constant 1024 : i32
    %3 = arith.muli %arg0, %c1024_i32 : i32
    %4 = tpu.assume_multiple %3, 1024 : i32
    %c0 = arith.constant 0 : index
    %5 = arith.index_cast %4 : i32 to index
    %6 = vector.load %arg10[%c0, %5] : memref<2x2048xf32, #tpu.memory_space<vmem>>, vector<2x1024xf32>
    %7 = arith.truncf %6 : vector<2x1024xf32> to vector<2x1024xbf16>
    %c0_1 = arith.constant 0 : index
    %c0_2 = arith.constant 0 : index
    %8 = vector.load %arg11[%c0_1, %c0_2] : memref<2x1024xf32, #tpu.memory_space<vmem>>, vector<2x1024xf32>
    %c0_3 = arith.constant 0 : index
    %c0_4 = arith.constant 0 : index
    %9 = vector.load %arg5[%c0_3, %c0_4] : memref<1024x1024xbf16, #tpu.memory_space<vmem>>, vector<1024x1024xbf16>
    %cst = arith.constant dense<0.000000e+00> : vector<2x1024xf32>
    %10 = tpu.matmul %7, %9, %cst {dimension_numbers = #tpu.dot_dimension_numbers<[1], [0], [0], [1], [0, 0, 1, 1], [], []>} : vector<2x1024xbf16>, vector<1024x1024xbf16>, vector<2x1024xf32> -> vector<2x1024xf32>
    %11 = arith.addf %8, %10 : vector<2x1024xf32>
    %c0_5 = arith.constant 0 : index
    %c0_6 = arith.constant 0 : index
    %12 = vector.load %arg11[%c0_5, %c0_6] : memref<2x1024xf32, #tpu.memory_space<vmem>>, vector<2x1024xf32>
    tpu.vector_store %arg11[%c0_5, %c0_6], %11 {strides = array<i32>} : memref<2x1024xf32, #tpu.memory_space<vmem>>, vector<2x1024xf32>,
    %c1_i32 = arith.constant 1 : i32
    %13 = arith.cmpi eq, %arg0, %c1_i32 : i32
    %14 = arith.extui %13 : i1 to i32
    %c0_i32_7 = arith.constant 0 : i32
    %15 = arith.cmpi ne, %14, %c0_i32_7 : i32
    scf.if %15 {
      %c0_8 = arith.constant 0 : index
      %c0_9 = arith.constant 0 : index
      %16 = vector.load %arg11[%c0_8, %c0_9] : memref<2x1024xf32, #tpu.memory_space<vmem>>, vector<2x1024xf32>
      %cst_10 = arith.constant 0.000000e+00 : f32
      %17 = vector.broadcast %cst_10 : f32 to vector<2x1024xf32>
      %18 = arith.maximumf %16, %17 : vector<2x1024xf32>
      %19 = arith.truncf %18 : vector<2x1024xf32> to vector<2x1024xbf16>
      %c0_11 = arith.constant 0 : index
      %c0_12 = arith.constant 0 : index
      %20 = vector.load %arg7[%c0_11, %c0_12] : memref<1024x128xbf16, #tpu.memory_space<vmem>>, vector<1024x128xbf16>
      %cst_13 = arith.constant dense<0.000000e+00> : vector<2x128xf32>
      %21 = tpu.matmul %19, %20, %cst_13 {dimension_numbers = #tpu.dot_dimension_numbers<[1], [0], [0], [1], [0, 0, 1, 1], [], []>} : vector<2x1024xbf16>, vector<1024x128xbf16>, vector<2x128xf32> -> vector<2x128xf32>
      %c0_14 = arith.constant 0 : index
      %c0_15 = arith.constant 0 : index
      %22 = vector.load %arg8[%c0_14, %c0_15] : memref<1x128xf32, #tpu.memory_space<vmem>>, vector<1x128xf32>
      %23 = vector.broadcast %22 : vector<1x128xf32> to vector<2x128xf32>
      %24 = arith.addf %21, %23 : vector<2x128xf32>
      %c0_16 = arith.constant 0 : index
      %c0_17 = arith.constant 0 : index
      %25 = vector.load %arg9[%c0_16, %c0_17] : memref<2x128xf32, #tpu.memory_space<vmem>>, vector<2x128xf32>
      tpu.vector_store %arg9[%c0_16, %c0_17], %24 {strides = array<i32>} : memref<2x128xf32, #tpu.memory_space<vmem>>, vector<2x128xf32>,
    } else {
    }
    return
  }
  func.func @transform_0(%arg0: i32) -> (i32, i32, i32) {
    %c0_i32 = arith.constant 0 : i32
    %c0_i32_0 = arith.constant 0 : i32
    %c0_i32_1 = arith.constant 0 : i32
    %c0_i32_2 = arith.constant 0 : i32
    return %c0_i32, %c0_i32_0, %c0_i32_1 : i32, i32, i32
  }
  func.func @transform_1(%arg0: i32) -> (i32, i32) {
    %c0_i32 = arith.constant 0 : i32
    %c0_i32_0 = arith.constant 0 : i32
    %c0_i32_1 = arith.constant 0 : i32
    return %c0_i32, %c0_i32_0 : i32, i32
  }
  func.func @transform_2(%arg0: i32) -> (i32, i32) {
    %c0_i32 = arith.constant 0 : i32
    %c0_i32_0 = arith.constant 0 : i32
    %c0_i32_1 = arith.constant 0 : i32
    return %c0_i32, %c0_i32_0 : i32, i32
  }
  func.func @transform_3(%arg0: i32) -> (i32, i32) {
    %c0_i32 = arith.constant 0 : i32
    %c0_i32_0 = arith.constant 0 : i32
    %c0_i32_1 = arith.constant 0 : i32
    return %c0_i32, %c0_i32_0 : i32, i32
  }
  func.func @transform_4(%arg0: i32) -> (i32, i32) {
    %c0_i32 = arith.constant 0 : i32
    %c0_i32_0 = arith.constant 0 : i32
    return %arg0, %c0_i32 : i32, i32
  }
  func.func @transform_5(%arg0: i32) -> (i32, i32) {
    %c0_i32 = arith.constant 0 : i32
    %c0_i32_0 = arith.constant 0 : i32
    %c0_i32_1 = arith.constant 0 : i32
    return %c0_i32, %c0_i32_0 : i32, i32
  }
  func.func @transform_6(%arg0: i32) -> (i32, i32) {
    %c0_i32 = arith.constant 0 : i32
    %c0_i32_0 = arith.constant 0 : i32
    %c0_i32_1 = arith.constant 0 : i32
    return %c0_i32, %c0_i32_0 : i32, i32
  }
  func.func @transform_7(%arg0: i32) -> (i32, i32) {
    %c0_i32 = arith.constant 0 : i32
    %c0_i32_0 = arith.constant 0 : i32
    %c0_i32_1 = arith.constant 0 : i32
    return %c0_i32, %c0_i32_0 : i32, i32
  }
  func.func @transform_8(%arg0: i32) -> (i32, i32) {
    %c0_i32 = arith.constant 0 : i32
    %c0_i32_0 = arith.constant 0 : i32
    %c0_i32_1 = arith.constant 0 : i32
    return %c0_i32, %c0_i32_0 : i32, i32
  }
}

</mosaic_0001>

<bundles_post_ra>
// kernel: inception_aux_pallas.1
= control target key start
LH: loop header
LB: loop body
LE: loop exit
PB: predicated region body
PF: predicated region fallthrough
CT: control target
= control target key end

     0   :  { %13 = vsyncpa [#allocation5], 0  ;;  %s8093_s0 = inlined_call_operand.vmem [shape: f32[2,196,16], index: 0, kind: input, shape index: {}]   ;;  %s8094_s1 = inlined_call_operand.hbm [shape: f32[16,196], index: 1, kind: input, shape index: {}]   ;;  %s8095_s2 = inlined_call_operand.hbm [shape: f32[16,128], index: 2, kind: input, shape index: {}]   ;;  %s8096_s3 = inlined_call_operand.hbm [shape: f32[1,128], index: 3, kind: input, shape index: {}]   ;;  %s8097_s4 = inlined_call_operand.hbm [shape: bf16[2048,1024], index: 4, kind: input, shape index: {}]   ;;  %s8098_s5 = inlined_call_operand.hbm [shape: f32[1,1024], index: 5, kind: input, shape index: {}]   ;;  %s8099_s6 = inlined_call_operand.hbm [shape: bf16[1024,128], index: 6, kind: input, shape index: {}]   ;;  %s8100_s7 = inlined_call_operand.hbm [shape: f32[1,128], index: 7, kind: input, shape index: {}]   ;;  %s8101_s8 = inlined_call_operand.hbm [shape: f32[2,128], index: 8, kind: output, shape index: {}]  }
   0x1   :  { %14 = vsyncpa [#allocation8], 0 }
   0x2   :  { %15 = vsyncpa [#allocation11], 0 }
   0x3   :  { %17 = vsyncpa [#allocation11 + $0x1], 0 }
   0x4   :  { %18 = vsyncpa [#allocation14], 0 }
   0x5   :  { %19 = vsyncpa [#allocation6], 0  ;;  %s7026_s27 = smov 0   ;;  %s7028_s28 = smov 0  }
   0x6   :  { %s7030_s29 = smov 0   ;;  %s7032_s30 = smov 0  }
   0x7 LB: > { %s6961_s9 = smov [#allocation7]   ;;  %s7047_s11 = sadd.s32 4294967295, %s6959_s30   ;;  %s6959_s30 = sphi %s7032_s30, %s8125_s30   ;;  %s6955_s29 = sphi %s7030_s29, %s8124_s29   ;;  %s6951_s28 = sphi %s7028_s28, %s8123_s28   ;;  %s6947_s27 = sphi %s7026_s27, %s8122_s27  }
   0x8   : > { %s252_s10 = sshll.u32 %s6961_s9, 4  ;;  %p5761_p0 = scmp.ge.s32.totalorder %s6959_s30, 1  ;;  %s253_s10 = int_to_ptr.vmem [resolvable:$true] %s252_s10 }
   0x9   : > { %p8102_p1 = scmp.eq.s32.totalorder %s7047_s11, 0  ;;  %p224_p2 = scmp.lt.s32.totalorder %s6959_s30, 3 }
   0xa   : > { %s6962_s13 = smov [#allocation12]   ;;  %s6963_s16 = smov [#allocation13]  }
   0xb   : > { %p7053_p4 = pnand %p5761_p0, %p224_p2  ;;  %s277_s14 = sshll.u32 %s6962_s13, 4  ;;  %s278_s14 = int_to_ptr.vmem [resolvable:$true] %s277_s14 }
   0xc   : > { %s287_s17 = sshll.u32 %s6963_s16, 4  ;;  %s6708_s19 = scalar_lea.vmem %s253_s10, 256  ;;  %s7065_s17 = int_to_ptr.vmem [resolvable:$true] %s287_s17 }
   0xd   : > { %s8105_s12 = scalar_select %p7053_p4, 1, 0 }
   0xe   : > { %p6542_p5 = pneg %p7053_p4  ;;  %p6709_p8 = scmp.ne.s32.totalorder %s253_s10, %s6708_s19 }
   0xf   : > { %p6716_p11 = scmp.lt.s32.totalorder %s253_s10, %s253_s10  ;;  %p6717_p12 = scmp.lt.s32.totalorder %s6708_s19, %s6708_s19 }
  0x10   : > { %p7061_p6 = pnand %p6542_p5, %p8102_p1 }
  0x11   : > { %p6718_p13 = por %p6717_p12, %p6716_p11 }
  0x12   : > { %p7069_p7 = pneg %p7061_p6 }
  0x14   : > { %p6711_p9 = pnand %p6709_p8, %p7069_p7 }
  0x16   : > { %p6712_p10 = pneg %p6711_p9 }
  0x18   : > { %p6719_p0 = pnand %p6718_p13, %p6712_p10 }
  0x1a   : > { %6722 = shalt.err (!%p6719_p0)
}
  0x1b   : > { %s6964_s20 = smov 128   ;;  %s6965_s21 = smov 8  }
  0x1c   : > { %6548 = dma.hbm_to_vmem [thread:$0]  (!%p7061_p6), %s8095_s2, 256, %s253_s10, [#allocation8], %s6964_s20, %s6964_s20, %s6965_s21  }
  0x1d   : > { %s6734_s24 = scalar_lea.vmem %s278_s14, 128  ;;  %p6742_p9 = scmp.lt.s32.totalorder %s278_s14, %s278_s14 }
  0x1e   : > { %p6735_p2 = scmp.ne.s32.totalorder %s278_s14, %s6734_s24  ;;  %p6743_p3 = scmp.lt.s32.totalorder %s6734_s24, %s6734_s24 }
  0x20   : > { %p6737_p5 = pnand %p6735_p2, %p7069_p7  ;;  %p6744_p1 = por %p6743_p3, %p6742_p9 }
  0x22   : > { %p6738_p8 = pneg %p6737_p5 }
  0x24   : > { %p6745_p11 = pnand %p6744_p1, %p6738_p8 }
  0x26   : > { %6748 = shalt.err (!%p6745_p11)
}
  0x27   : > { %6554 = dma.hbm_to_vmem [thread:$0]  (!%p7061_p6), %s8098_s5, 128, %s278_s14, [#allocation11]  }
  0x28   : > { %s6760_s9 = scalar_lea.vmem %s7065_s17, 8192  ;;  %p6768_p0 = scmp.lt.s32.totalorder %s7065_s17, %s7065_s17 }
  0x29   : > { %p6761_p10 = scmp.ne.s32.totalorder %s7065_s17, %s6760_s9  ;;  %p6769_p3 = scmp.lt.s32.totalorder %s6760_s9, %s6760_s9 }
  0x2b   : > { %p6763_p12 = pnand %p6761_p10, %p7069_p7  ;;  %p6770_p1 = por %p6769_p3, %p6768_p0 }
  0x2d   : > { %p6764_p13 = pneg %p6763_p12 }
  0x2f   : > { %p6771_p2 = pnand %p6770_p1, %p6764_p13 }
  0x31   : > { %6774 = shalt.err (!%p6771_p2)
}
  0x32   : > { %s6966_s10 = smov 64   ;;  %s6967_s13 = smov 4  }
  0x33   : > { %6557 = dma.hbm_to_vmem [thread:$0]  (!%p7061_p6), %s8099_s6, 8192, %s7065_s17, [#allocation14], %s6966_s10, %s6966_s10, %s6967_s13  }
  0x34   : > { %s6968_s14 = smov [#allocation4]  }
  0x35   : > { %s239_s20 = sshll.u32 %s6968_s14, 4  ;;  %s240_s20 = int_to_ptr.vmem [resolvable:$true] %s239_s20 }
  0x36   : > { %s6786_s21 = scalar_lea.vmem %s240_s20, 512  ;;  %p6794_p11 = scmp.lt.s32.totalorder %s240_s20, %s240_s20 }
  0x37   : > { %p6787_p5 = scmp.ne.s32.totalorder %s240_s20, %s6786_s21  ;;  %p6795_p10 = scmp.lt.s32.totalorder %s6786_s21, %s6786_s21 }
  0x39   : > { %p6789_p8 = pnand %p6787_p5, %p7069_p7  ;;  %p6796_p12 = por %p6795_p10, %p6794_p11 }
  0x3b   : > { %p6790_p9 = pneg %p6789_p8 }
  0x3d   : > { %p6797_p13 = pnand %p6796_p12, %p6790_p9 }
  0x3f   : > { %6800 = shalt.err (!%p6797_p13)
}
  0x40   : > { %s6969_s22 = smov 256   ;;  %s6970_s23 = smov 16  }
  0x41   : > { %6545 = dma.hbm_to_vmem [thread:$0]  (!%p7061_p6), %s8094_s1, 512, %s240_s20, [#allocation5], %s6969_s22, %s6969_s22, %s6970_s23  }
  0x42   : > { %s6971_s25 = smov [#allocation9]   ;;  %s6972_s9 = smov [#allocation15]  }
  0x43   : > { %s266_s26 = sshll.u32 %s6971_s25, 4  ;;  %s301_s10 = sshll.u32 %s6972_s9, 4  ;;  %s267_s26 = int_to_ptr.vmem [resolvable:$true] %s266_s26  ;;  %s302_s10 = int_to_ptr.vmem [resolvable:$true] %s301_s10 }
  0x44   : > { %s6812_s13 = scalar_lea.vmem %s267_s26, 16  ;;  %s6819_s16 = scalar_lea.vmem %s267_s26, 32 }
  0x45   : > { %p6813_p0 = scmp.ne.s32.totalorder %s267_s26, %s6812_s13  ;;  %p6820_p2 = scmp.lt.s32.totalorder %s267_s26, %s267_s26 }
  0x46   : > { %p6821_p5 = scmp.lt.s32.totalorder %s6819_s16, %s6812_s13 }
  0x47   : > { %p6815_p3 = pnand %p6813_p0, %p7069_p7 }
  0x48   : > { %p6822_p8 = por %p6821_p5, %p6820_p2 }
  0x49   : > { %p6816_p1 = pneg %p6815_p3 }
  0x4b   : > { %p6823_p9 = pnand %p6822_p8, %p6816_p1 }
  0x4d   : > { %6826 = shalt.err (!%p6823_p9)
}
  0x4e   : > { %6551 = dma.hbm_to_vmem [thread:$0]  (!%p7061_p6), %s8096_s3, 16, %s267_s26, [#allocation8]  }
  0x4f   : > { %s6838_s20 = scalar_lea.vmem %s302_s10, 16  ;;  %s6845_s21 = scalar_lea.vmem %s302_s10, 32 }
  0x50   : > { %p6839_p11 = scmp.ne.s32.totalorder %s302_s10, %s6838_s20  ;;  %p6846_p13 = scmp.lt.s32.totalorder %s302_s10, %s302_s10 }
  0x51   : > { %p6847_p0 = scmp.lt.s32.totalorder %s6845_s21, %s6838_s20 }
  0x52   : > { %p6841_p10 = pnand %p6839_p11, %p7069_p7 }
  0x53   : > { %p6848_p3 = por %p6847_p0, %p6846_p13 }
  0x54   : > { %p6842_p12 = pneg %p6841_p10 }
  0x56   : > { %p6849_p4 = pnand %p6848_p3, %p6842_p12 }
  0x58   : > { %6852 = shalt.err (!%p6849_p4)
}
  0x59   : > { %6560 = dma.hbm_to_vmem [thread:$0]  (!%p7061_p6), %s8100_s7, 16, %s302_s10, [#allocation14]  }
  0x5a   : > { %s7121_s18 = sadd.s32 1, %s6959_s30   ;;  %s116_s15 = sadd.s32 1, %s6955_s29 }
  0x5b   : > { %s113_s24 = ssub.s32 %s6959_s30, %s7121_s18  ;;  %p123_p4 = scmp.ne.s32.totalorder %s6955_s29, %s6951_s28 }
  0x5c   : > { %p114_p7 = scmp.eq.s32.totalorder %s113_s24, 0  ;;  %p124_p1 = scmp.eq.s32.totalorder %s6959_s30, 0 }
  0x5d   : > { %p129_p2 = scmp.ne.s32.totalorder %s6951_s28, %s6947_s27  ;;  %p6571_p5 = scmp.lt.s32.totalorder %s6959_s30, 2 }
  0x5e   : > { %s7133_s17 = scalar_select %p114_p7, %s6955_s29, %s116_s15  }
  0x5f   : > { %p125_p8 = por %p124_p1, %p123_p4  ;;  %p8108_p9 = scmp.eq.s32.totalorder %s7047_s11, 0 }
  0x60   : > { %s312_s26 = sand.u32 1, %s6959_s30   ;;  %s314_s9 = sand.u32 1, %s6955_s29  }
  0x61   : > { %p7137_p11 = por %p8108_p9, %p129_p2  ;;  %s5769_s10 = sshll.u32 %s314_s9, 12 }
  0x62   : > { %s6403_s13 = sshll.u32 %s6959_s30, 16  ;;  %s316_s27 = scalar_lea.vmem [#allocation10], %s5769_s10 }
  0x63   : > { %s8109_s25 = scalar_select %p7137_p11, 1, 0 }
  0x64   : > { %s7147_s14 = scalar_lea.hbm %s8097_s4, %s6403_s13  ;;  %s324_s20 = sshll.u32 %s316_s27, 4  ;;  %s7149_s20 = int_to_ptr.vmem [resolvable:$true] %s324_s20 }
  0x65   : > { %p7151_p6 = pnand %p6571_p5, %p125_p8  ;;  %s7155_s22 = scalar_lea.sflag [#allocation11], %s312_s26 }
  0x66   : > { %s6853_s30 = scalar_lea.hbm %s7147_s14, 65536  ;;  %s6858_s24 = scalar_lea.hbm %s8097_s4, 131072 }
  0x67   : > { %p6854_p10 = scmp.ne.s32.totalorder %s7147_s14, %s6853_s30  ;;  %p6855_p12 = pneg %p7151_p6 }
  0x68   : > { %p6859_p3 = scmp.lt.s32.totalorder %s7147_s14, %s8097_s4  ;;  %p6860_p4 = scmp.lt.s32.totalorder %s6858_s24, %s6853_s30 }
  0x69   : > { %p6856_p13 = pnand %p6855_p12, %p6854_p10 }
  0x6a   : > { %p6861_p7 = por %p6860_p4, %p6859_p3 }
  0x6b   : > { %p6857_p0 = pneg %p6856_p13 }
  0x6d   : > { %p6862_p1 = pnand %p6861_p7, %p6857_p0 }
  0x6f   : > { %6865 = shalt.err (!%p6862_p1)
}
  0x70   : > { %s6866_s26 = scalar_lea.vmem %s7149_s20, 65536  ;;  %s6973_s13 = smov [#allocation10]  }
  0x71   : > { %p6867_p2 = scmp.ne.s32.totalorder %s7149_s20, %s6866_s26  ;;  %s6871_s16 = sshll.u32 %s6973_s13, 4  ;;  %s6872_s16 = int_to_ptr.vmem [resolvable:$false] %s6871_s16 }
  0x72   : > { %s6873_s19 = scalar_lea.vmem %s6872_s16, 131072  ;;  %p6874_p9 = scmp.lt.s32.totalorder %s7149_s20, %s6872_s16 }
  0x73   : > { %p6869_p5 = pnand %p6867_p2, %p6855_p12  ;;  %p6875_p10 = scmp.lt.s32.totalorder %s6873_s19, %s6866_s26 }
  0x75   : > { %p6870_p8 = pneg %p6869_p5  ;;  %p6876_p13 = por %p6875_p10, %p6874_p9 }
  0x77   : > { %p6877_p11 = pnand %p6876_p13, %p6870_p8 }
  0x79   : > { %6880 = shalt.err (!%p6877_p11)
}
  0x7a   : > { %s6974_s27 = smov 512   ;;  %s6975_s30 = smov 32  }
  0x7b   : > { %6564 = dma.hbm_to_vmem [thread:$0]  (!%p7151_p6), %s7147_s14, 65536, %s7149_s20, %s7155_s22, %s6974_s27, %s6974_s27, %s6975_s30  }
  0x7c   : > { %p8111_p12 = scmp.ne.s32.totalorder %s8105_s12, 0 }
  0x7d   : > { %p8112_p0 = scmp.eq.s32.totalorder (!%p8111_p12), %s7047_s11, 0 }
  0x7e   : > { %336 = sbr.rel (%p8111_p12) target bundleno = 1636 (0x664), region = 52 }
  0x83   : > { %6922 = dma.done.wait (%p8112_p0), [#allocation5], 512   ;;  %p8113_p3 = pmov %p8112_p0 }
  0x84   : > { %p8114_p4 = pmov %p8112_p0 }
  0x85   : > { %6924 = vsyncadd (%p8113_p3), [#allocation5], 4294966784 }
  0x86   : > { %6926 = dma.done.wait (%p8114_p4), [#allocation8], 272   ;;  %p8115_p11 = pmov %p8112_p0 }
  0x87   : > { %s350_s21 = sand.u32 1, %s7047_s11   ;;  %s352_s14 = sand.u32 1, %s6951_s28  }
  0x88   : > { %6928 = vsyncadd (%p8115_p11), [#allocation8], 4294967024  ;;  %s5777_s20 = sshll.u32 %s352_s14, 12  ;;  %s351_s12 = scalar_lea.sflag [#allocation11], %s350_s21 }
  0x89   : > { %s7188_s22 = scalar_lea.vmem [#allocation10], %s5777_s20  ;;  %p8116_p6 = scmp.ne.s32.totalorder %s8109_s25, 0 }
  0x8b   : > { %6930 = dma.done.wait (%p8116_p6), %s351_s12, 65536  }
  0x8c   : > { %6932 = vsyncadd (%p8116_p6), %s351_s12, 4294901760  ;;  %p8117_p7 = pmov %p8112_p0 }
  0x8d   : > { %p8118_p1 = pmov %p8112_p0 }
  0x8e   : > { %6934 = dma.done.wait (%p8117_p7), [#allocation11], 128  }
  0x8f   : > { %6936 = vsyncadd (%p8118_p1), [#allocation11], 4294967168  ;;  %p8119_p2 = pmov %p8112_p0 }
  0x90   : > { %p8120_p5 = pmov %p8112_p0 }
  0x91   : > { %6938 = dma.done.wait (%p8119_p2), [#allocation14], 8208  }
  0x92   : > { %6940 = vsyncadd (%p8120_p5), [#allocation14], 4294959088  ;;  %p8121_p8 = scmp.ne.s32.totalorder %s7047_s11, 0 }
  0x94   : > { %399 = sbr.rel (%p8121_p8) target bundleno = 627 (0x273), region = 84 }
  0x99   : > { %v419_v0 = vld [vmem:[%s8093_s0 + $0x78] sm:$0xff]  ;;  %v5800_v1 = vld [vmem:[%s8093_s0 + $0x140] sm:$0xff]  ;;  %v6976_v2 = vmov 0.0   ;;  %v418_v3 = vld [vmem:[%s8093_s0 + $0x70] sm:$0xff]  ;;  %vm436_vm0 = vcmask 1043456   ;;  %vm429_vm1 = vcmask 556032  }
  0x9a   : > { %440 = vmatprep.subr.mxu0 %v6976_v2  ;;  %544 = vmatprep.subr.mxu1 %v6976_v2  ;;  %v5799_v4 = vld [vmem:[%s8093_s0 + $0x138] sm:$0xff]  ;;  %v417_v5 = vld [vmem:[%s8093_s0 + $0x68] sm:$0xff]  ;;  %v5798_v6 = vld [vmem:[%s8093_s0 + $0x130] sm:$0xff]  ;;  %vm628_vm2 = vcmask 130048  }
  0x9b   : > { %441 = vmatpush1.msra.mxu0 %v419_v0  ;;  %545 = vmatpush1.msra.mxu1 %v5800_v1  ;;  %v416_v7 = vld [vmem:[%s8093_s0 + $0x60] sm:$0xff]  ;;  %v5797_v8 = vld [vmem:[%s8093_s0 + $0x128] sm:$0xff]  ;;  %v415_v9 = vld [vmem:[%s8093_s0 + $0x58] sm:$0xff]  ;;  %v753_v1 = vlaneseq }
  0x9c   : > { %442 = vmatprep.subr.mxu0 %v6976_v2  ;;  %546 = vmatprep.subr.mxu1 %v6976_v2  ;;  %v5796_v10 = vld [vmem:[%s8093_s0 + $0x120] sm:$0xff]  ;;  %v414_v11 = vld [vmem:[%s8093_s0 + $0x50] sm:$0xff]  ;;  %v5795_v12 = vld [vmem:[%s8093_s0 + $0x118] sm:$0xff] }
  0x9d   : > { %443 = vmatpush1.msra.mxu0 %v418_v3  ;;  %547 = vmatpush1.msra.mxu1 %v5799_v4  ;;  %v413_v13 = vld [vmem:[%s8093_s0 + $0x48] sm:$0xff]  ;;  %v5794_v14 = vld [vmem:[%s8093_s0 + $0x110] sm:$0xff]  ;;  %v412_v15 = vld [vmem:[%s8093_s0 + $0x40] sm:$0xff] }
  0x9e   : > { %444 = vmatprep.subr.mxu0 %v6976_v2  ;;  %548 = vmatprep.subr.mxu1 %v6976_v2  ;;  %v5793_v16 = vld [vmem:[%s8093_s0 + $0x108] sm:$0xff]  ;;  %v411_v17 = vld [vmem:[%s8093_s0 + $0x38] sm:$0xff]  ;;  %v5792_v18 = vld [vmem:[%s8093_s0 + $0x100] sm:$0xff] }
  0x9f   : > { %445 = vmatpush1.msra.mxu0 %v417_v5  ;;  %549 = vmatpush1.msra.mxu1 %v5798_v6  ;;  %v410_v19 = vld [vmem:[%s8093_s0 + $0x30] sm:$0xff]  ;;  %v5791_v20 = vld [vmem:[%s8093_s0 + $0xf8] sm:$0xff]  ;;  %v409_v21 = vld [vmem:[%s8093_s0 + $0x28] sm:$0xff] }
  0xa0   : > { %446 = vmatprep.subr.mxu0 %v6976_v2  ;;  %550 = vmatprep.subr.mxu1 %v6976_v2  ;;  %v5790_v22 = vld [vmem:[%s8093_s0 + $0xf0] sm:$0xff]  ;;  %v408_v23 = vld [vmem:[%s8093_s0 + $0x20] sm:$0xff]  ;;  %v5789_v24 = vld [vmem:[%s8093_s0 + $0xe8] sm:$0xff] }
  0xa1   : > { %447 = vmatpush1.msra.mxu0 %v416_v7  ;;  %551 = vmatpush1.msra.mxu1 %v5797_v8  ;;  %v407_v25 = vld [vmem:[%s8093_s0 + $0x18] sm:$0xff]  ;;  %v5788_v26 = vld [vmem:[%s8093_s0 + $0xe0] sm:$0xff]  ;;  %v406_v27 = vld [vmem:[%s8093_s0 + $0x10] sm:$0xff] }
  0xa2   : > { %448 = vmatprep.subr.mxu0 %v6976_v2  ;;  %552 = vmatprep.subr.mxu1 %v6976_v2  ;;  %v5787_v28 = vld [vmem:[%s8093_s0 + $0xd8] sm:$0xff]  ;;  %v405_v29 = vld [vmem:[%s8093_s0 + $0x8] sm:$0xff]  ;;  %v5786_v30 = vld [vmem:[%s8093_s0 + $0xd0] sm:$0xff] }
  0xa3   : > { %449 = vmatpush1.msra.mxu0 %v415_v9  ;;  %553 = vmatpush1.msra.mxu1 %v5796_v10  ;;  %v404_v31 = vld [vmem:[%s8093_s0] sm:$0xff]  ;;  %v5785_v32 = vld [vmem:[%s8093_s0 + $0xc8] sm:$0xff]  ;;  %v427_v35 = vld [vmem:[%s8093_s0 + $0xb8] sm:$0xff] }
  0xa4   : > { %450 = vmatprep.subr.mxu0 %v6976_v2  ;;  %554 = vmatprep.subr.mxu1 %v6976_v2  ;;  %v428_v33 = vld [vmem:[%s8093_s0 + $0xc0] sm:$0xf]  ;;  %v5809_v34 = vld [vmem:[%s8093_s0 + $0x188] sm:$0xf]  ;;  %v426_v37 = vld [vmem:[%s8093_s0 + $0xb0] sm:$0xff] }
  0xa5   : > { %451 = vmatpush1.msra.mxu0 %v414_v11  ;;  %555 = vmatpush1.msra.mxu1 %v5795_v12  ;;  %v5808_v36 = vld [vmem:[%s8093_s0 + $0x180] sm:$0xff]  ;;  %v5807_v38 = vld [vmem:[%s8093_s0 + $0x178] sm:$0xff]  ;;  %v425_v39 = vld [vmem:[%s8093_s0 + $0xa8] sm:$0xff] }
  0xa6   : > { %452 = vmatprep.subr.mxu0 %v6976_v2  ;;  %556 = vmatprep.subr.mxu1 %v6976_v2  ;;  %v5806_v40 = vld [vmem:[%s8093_s0 + $0x170] sm:$0xff]  ;;  %v424_v41 = vld [vmem:[%s8093_s0 + $0xa0] sm:$0xff]  ;;  %v5805_v42 = vld [vmem:[%s8093_s0 + $0x168] sm:$0xff] }
  0xa7   : > { %453 = vmatpush1.msra.mxu0 %v413_v13  ;;  %557 = vmatpush1.msra.mxu1 %v5794_v14  ;;  %v423_v43 = vld [vmem:[%s8093_s0 + $0x98] sm:$0xff]  ;;  %v5804_v44 = vld [vmem:[%s8093_s0 + $0x160] sm:$0xff]  ;;  %v422_v45 = vld [vmem:[%s8093_s0 + $0x90] sm:$0xff] }
  0xa8   : > { %454 = vmatprep.subr.mxu0 %v6976_v2  ;;  %558 = vmatprep.subr.mxu1 %v6976_v2  ;;  %v5803_v46 = vld [vmem:[%s8093_s0 + $0x158] sm:$0xff]  ;;  %v421_v47 = vld [vmem:[%s8093_s0 + $0x88] sm:$0xff]  ;;  %v5802_v48 = vld [vmem:[%s8093_s0 + $0x150] sm:$0xff] }
  0xa9   : > { %455 = vmatpush1.msra.mxu0 %v412_v15  ;;  %559 = vmatpush1.msra.mxu1 %v5793_v16  ;;  %v420_v49 = vld [vmem:[%s8093_s0 + $0x80] sm:$0xff]  ;;  %v401_v50 = vld [vmem:[#allocation4 + $0x8] sm:$0xff]  ;;  %v5801_v51 = vld [vmem:[%s8093_s0 + $0x148] sm:$0xff] }
  0xaa   : > { %456 = vmatprep.subr.mxu0 %v6976_v2  ;;  %560 = vmatprep.subr.mxu1 %v6976_v2  ;;  %v400_v52 = vld [vmem:[#allocation4] sm:$0xff]  ;;  %v403_v53 = vld [vmem:[#allocation4 + $0x18] sm:$0xff]  ;;  %v620_v54 = vld [vmem:[#allocation7 + $0x8] sm:$0xff] }
  0xab   : > { %457 = vmatpush1.msra.mxu0 %v411_v17  ;;  %561 = vmatpush1.msra.mxu1 %v5792_v18  ;;  %v402_v55 = vld [vmem:[#allocation4 + $0x10] sm:$0xff]  ;;  %v619_v56 = vld [vmem:[#allocation7] sm:$0xff] }
  0xac   : > { %458 = vmatprep.subr.mxu0 %v6976_v2  ;;  %562 = vmatprep.subr.mxu1 %v6976_v2  ;;  %v969_v7 = vld [vmem:[#allocation12] sm:$0xff] }
  0xad   : > { %459 = vmatpush1.msra.mxu0 %v410_v19  ;;  %563 = vmatpush1.msra.mxu1 %v5791_v20  ;;  %v6977_v20 = vmov 1983009808  }
  0xae   : > { %460 = vmatprep.subr.mxu0 %v6976_v2  ;;  %564 = vmatprep.subr.mxu1 %v6976_v2 }
  0xaf   : > { %461 = vmatpush1.msra.mxu0 %v409_v21  ;;  %565 = vmatpush1.msra.mxu1 %v5790_v22  ;;  %v1030_v21 = vunpack.c.l.s4 %v6977_v20 }
  0xb0   : > { %462 = vmatprep.subr.mxu0 %v6976_v2  ;;  %566 = vmatprep.subr.mxu1 %v6976_v2 }
  0xb1   : > { %463 = vmatpush1.msra.mxu0 %v408_v23  ;;  %567 = vmatpush1.msra.mxu1 %v5789_v24  ;;  %v1031_v24 = vunpack.c.0.s8 %v1030_v21 }
  0xb2   : > { %464 = vmatprep.subr.mxu0 %v6976_v2  ;;  %568 = vmatprep.subr.mxu1 %v6976_v2 }
  0xb3   : > { %465 = vmatpush1.msra.mxu0 %v407_v25  ;;  %569 = vmatpush1.msra.mxu1 %v5788_v26 }
  0xb4   : > { %466 = vmatprep.subr.mxu0 %v6976_v2  ;;  %570 = vmatprep.subr.mxu1 %v6976_v2 }
  0xb5   : > { %467 = vmatpush1.msra.mxu0 %v406_v27  ;;  %571 = vmatpush1.msra.mxu1 %v5787_v28 }
  0xb6   : > { %468 = vmatprep.subr.mxu0 %v6976_v2  ;;  %572 = vmatprep.subr.mxu1 %v6976_v2 }
  0xb7   : > { %469 = vmatpush1.msra.mxu0 %v405_v29  ;;  %573 = vmatpush1.msra.mxu1 %v5786_v30 }
  0xb8   : > { %470 = vmatprep.subr.mxu0 %v6976_v2  ;;  %574 = vmatprep.subr.mxu1 %v6976_v2 }
  0xb9   : > { %471 = vmatpush1.msra.mxu0 %v404_v31  ;;  %575 = vmatpush1.msra.mxu1 %v5785_v32 }
  0xba   : > { %486 = vmatprep.subr.mxu0 %v6976_v2  ;;  %590 = vmatprep.subr.mxu1 %v6976_v2 }
  0xbb   : > { %5782 = vmatpush2.msk.msra.mxu0 %vm436_vm0, %v428_v33  ;;  %5810 = vmatpush2.msk.msra.mxu1 %vm436_vm0, %v5809_v34  ;;  %v6978_v34 = vmov 1966171168  }
  0xbc   : > { %488 = vmatprep.subr.mxu0 %v6976_v2  ;;  %592 = vmatprep.subr.mxu1 %v6976_v2 }
  0xbd   : > { %489 = vmatpush2.msra.mxu0 %v427_v35  ;;  %593 = vmatpush2.msra.mxu1 %v5808_v36  ;;  %v751_v35 = vunpack.c.l.s4 %v6978_v34  ;;  %v5813_v36 = vld [vmem:[#allocation9] ss:$0 sm:$0xff] }
  0xbe   : > { %490 = vmatprep.subr.mxu0 %v6976_v2  ;;  %594 = vmatprep.subr.mxu1 %v6976_v2 }
  0xbf   : > { %491 = vmatpush2.msra.mxu0 %v426_v37  ;;  %595 = vmatpush2.msra.mxu1 %v5807_v38  ;;  %v752_v38 = vunpack.c.0.s8 %v751_v35 }
  0xc0   : > { %492 = vmatprep.subr.mxu0 %v6976_v2  ;;  %596 = vmatprep.subr.mxu1 %v6976_v2 }
  0xc1   : > { %493 = vmatpush2.msra.mxu0 %v425_v39  ;;  %597 = vmatpush2.msra.mxu1 %v5806_v40 }
  0xc2   : > { %494 = vmatprep.subr.mxu0 %v6976_v2  ;;  %598 = vmatprep.subr.mxu1 %v6976_v2 }
  0xc3   : > { %495 = vmatpush2.msra.mxu0 %v424_v41  ;;  %599 = vmatpush2.msra.mxu1 %v5805_v42 }
  0xc4   : > { %496 = vmatprep.subr.mxu0 %v6976_v2  ;;  %600 = vmatprep.subr.mxu1 %v6976_v2 }
  0xc5   : > { %497 = vmatpush2.msra.mxu0 %v423_v43  ;;  %601 = vmatpush2.msra.mxu1 %v5804_v44 }
  0xc6   : > { %498 = vmatprep.subr.mxu0 %v6976_v2  ;;  %602 = vmatprep.subr.mxu1 %v6976_v2 }
  0xc7   : > { %499 = vmatpush2.msra.mxu0 %v422_v45  ;;  %603 = vmatpush2.msra.mxu1 %v5803_v46 }
  0xc8   : > { %500 = vmatprep.subr.mxu0 %v6976_v2  ;;  %604 = vmatprep.subr.mxu1 %v6976_v2 }
  0xc9   : > { %501 = vmatpush2.msra.mxu0 %v421_v47  ;;  %605 = vmatpush2.msra.mxu1 %v5802_v48 }
  0xca   : > { %502 = vmatprep.subr.mxu0 %v6976_v2  ;;  %606 = vmatprep.subr.mxu1 %v6976_v2  ;;  %v754_v2 = vshrl.u32 %v753_v1, 7 }
  0xcb   : > { %503 = vmatpush2.msra.mxu0 %v420_v49  ;;  %5783 = vmatprep.mubr.msk.f32.mxu0 %vm429_vm1, %v401_v50 }
  0xcc   : > { %607 = vmatpush2.msra.mxu1 %v5801_v51  ;;  %5811 = vmatprep.mubr.msk.f32.mxu1 %vm429_vm1, %v401_v50  ;;  %v973_v3 = vsub.s32 0, %v754_v2  ;;  %v977_v4 = vsub.s32 1, %v754_v2  ;;  %v981_v5 = vsub.s32 2, %v754_v2  ;;  %v985_v6 = vsub.s32 3, %v754_v2 }
  0xcd   : > { %505 = vmatmul.mubr.f32.vlgmr.msra.gmra.mxu0 %v400_v52  ;;  %609 = vmatmul.mubr.f32.vlgmr.msra.gmra.mxu1 %v400_v52  ;;  %v989_v8 = vsub.s32 4, %v754_v2  ;;  %v993_v9 = vsub.s32 5, %v754_v2  ;;  %v997_v10 = vsub.s32 6, %v754_v2  ;;  %v1001_v11 = vsub.s32 7, %v754_v2 }
  0xce   : > { %5784 = vmatprep.mubr.msk.f32.mxu0 %vm429_vm1, %v403_v53  ;;  %5812 = vmatprep.mubr.msk.f32.mxu1 %vm429_vm1, %v403_v53  ;;  %v974_v12 = vrot.slane %v969_v7, %v973_v3  ;;  %v978_v13 = vrot.slane %v969_v7, %v977_v4  ;;  %v982_v14 = vrot.slane %v969_v7, %v981_v5 }
  0xcf   : > { %6498 = vmatprep.subr.mxu0 %v620_v54  ;;  %6508 = vmatprep.subr.mxu1 %v620_v54  ;;  %v986_v15 = vrot.slane %v969_v7, %v985_v6  ;;  %v990_v16 = vrot.slane %v969_v7, %v989_v8  ;;  %v994_v17 = vrot.slane %v969_v7, %v993_v9 }
  0xd0   : > { %6499 = vmatpush3.msra.mxu0 %v620_v54  ;;  %6510 = vmatpush3.msra.mxu1 %v620_v54  ;;  %v998_v18 = vrot.slane %v969_v7, %v997_v10  ;;  %v1002_v19 = vrot.slane %v969_v7, %v1001_v11  ;;  %v1027_v22 = vcombine.low %v974_v12, %v978_v13 }
  0xd1   : > { %510 = vmatmul.mubr.f32.gmra.mxu0 %v402_v55  ;;  %614 = vmatmul.mubr.f32.gmra.mxu1 %v402_v55  ;;  %v1028_v23 = vcombine.low %v982_v14, %v986_v15  ;;  %v1044_v25 = vcombine.low %v990_v16, %v994_v17  ;;  %v1034_v27 = vsub.s32 %v1031_v24, %v754_v2 }
  0xd2   : > { %6500 = vmatprep.subr.mxu0 %v619_v56  ;;  %6509 = vmatprep.subr.mxu1 %v619_v56  ;;  %v1045_v26 = vcombine.low %v998_v18, %v1002_v19  ;;  %v7408_v46 = vsub.s32 %v752_v38, %v754_v2 }
  0xd3   : > { %6501 = vmatpush3.msra.mxu0 %v619_v56  ;;  %6511 = vmatpush3.msra.mxu1 %v619_v56  ;;  %v1035_v28 = vrot.slane %v1027_v22, %v1034_v27  ;;  %v1042_v29 = vrot.slane %v1028_v23, %v1034_v27  ;;  %v1052_v30 = vrot.slane %v1044_v25, %v1034_v27 }
  0xd4   : > { %v1059_v31 = vrot.slane %v1045_v26, %v1034_v27 }
  0xd5   : > { %v1043_v32 = vcombine.low %v1035_v28, %v1042_v29 }
  0xd6   : > { %v1060_v33 = vcombine.low %v1052_v30, %v1059_v31 }
  0xd7   : > { %1063 = vst [vmem:[#allocation3] sm:$0xff] %v1043_v32 }
  0xd8   : > { %1064 = vst [vmem:[#allocation3 + $0x8] sm:$0xff] %v1060_v33 }
 0x18d   : > { %v506_v57 = vpop.f32.mrf.mxu0  ;;  %v610_v58 = vpop.f32.mrf.mxu1 }
 0x18e   : > { %6502 = vmatprep.mubr.msk.f32.mxu0 %vm628_vm2, %v506_v57  ;;  %6505 = vmatprep.mubr.msk.f32.mxu1 %vm628_vm2, %v610_v58 }
 0x18f   : > { %v508_v59 = vpop.f32.mrf.mxu0  ;;  %v612_v60 = vpop.f32.mrf.mxu1 }
 0x191   : > { %v511_v61 = vpop.f32.mrf.mxu0  ;;  %v615_v62 = vpop.f32.mrf.mxu1 }
 0x192   : > { %6503 = vmatmul.mubr.msk.f32.vlgmr.msra.gmra.mxu0 %vm628_vm2, %v511_v61  ;;  %6506 = vmatmul.mubr.msk.f32.vlgmr.msra.gmra.mxu1 %vm628_vm2, %v615_v62 }
 0x193   : > { %v513_v63 = vpop.f32.mrf.mxu0  ;;  %v617_v0 = vpop.f32.mrf.mxu1 }
 0x252   : > { %v6504_v37 = vpop.f32.mrf.mxu0  ;;  %v6507_v39 = vpop.f32.mrf.mxu1 }
 0x253   : > { %v713_v40 = vadd.f32 %v6504_v37, %v5813_v36  ;;  %v723_v41 = vadd.f32 %v6507_v39, %v5813_v36 }
 0x254   : > { %v707_v42 = vpop.f32.mrf.mxu0  ;;  %v717_v43 = vpop.f32.mrf.mxu1 }
 0x255   : > { %v727_v44 = vmax.f32 %v713_v40, 0.0  ;;  %v729_v45 = vmax.f32 %v723_v41, 0.0  ;;  %v708_v47 = vadd.f32 %v5813_v36, %v707_v42  ;;  %v718_v48 = vadd.f32 %v5813_v36, %v717_v43 }
 0x257   : > { %v739_v49 = vrot.slane %v727_v44, 1  ;;  %v740_v50 = vrot.slane %v727_v44, 2  ;;  %v741_v51 = vrot.slane %v727_v44, 3  ;;  %v742_v52 = vrot.slane %v727_v44, 4 }
 0x258   : > { %v743_v53 = vrot.slane %v727_v44, 5  ;;  %v744_v54 = vrot.slane %v727_v44, 6  ;;  %v745_v55 = vrot.slane %v727_v44, 7  ;;  %v858_v56 = vrot.slane %v729_v45, 1 }
 0x259   : > { %v795_v57 = vcombine.low %v727_v44, %v739_v49  ;;  %v796_v58 = vcombine.low %v740_v50, %v741_v51  ;;  %v859_v59 = vrot.slane %v729_v45, 2  ;;  %v860_v60 = vrot.slane %v729_v45, 3 }
 0x25a   : > { %v797_v61 = vcombine.low %v742_v52, %v743_v53  ;;  %v798_v62 = vcombine.low %v744_v54, %v745_v55  ;;  %v861_v63 = vrot.slane %v729_v45, 4  ;;  %v862_v0 = vrot.slane %v729_v45, 5 }
 0x25b   : > { %v805_v1 = vrot.slane %v795_v57, %v7408_v46  ;;  %v812_v2 = vrot.slane %v796_v58, %v7408_v46  ;;  %v863_v3 = vrot.slane %v729_v45, 6  ;;  %v864_v4 = vrot.slane %v729_v45, 7 }
 0x25c   : > { %v819_v5 = vrot.slane %v797_v61, %v7408_v46  ;;  %v826_v6 = vrot.slane %v798_v62, %v7408_v46  ;;  %v914_v7 = vcombine.low %v729_v45, %v858_v56  ;;  %v915_v8 = vcombine.low %v859_v59, %v860_v60 }
 0x25d   : > { %v827_v9 = vcombine.low %v805_v1, %v812_v2  ;;  %v916_v10 = vcombine.low %v861_v63, %v862_v0  ;;  %v917_v11 = vcombine.low %v863_v3, %v864_v4  ;;  %v726_v12 = vmax.f32 %v708_v47, 0.0 }
 0x25e   : > { %v828_v13 = vcombine.low %v819_v5, %v826_v6  ;;  %v924_v14 = vrot.slane %v914_v7, %v7408_v46  ;;  %v931_v15 = vrot.slane %v915_v8, %v7408_v46  ;;  %v728_v16 = vmax.f32 %v718_v48, 0.0 }
 0x25f   : > { %v835_v17 = vrot.slane %v827_v9, %v7408_v46  ;;  %v938_v18 = vrot.slane %v916_v10, %v7408_v46  ;;  %v945_v19 = vrot.slane %v917_v11, %v7408_v46  ;;  %v731_v20 = vrot.slane %v726_v12, 1 }
 0x260   : > { %v842_v21 = vrot.slane %v828_v13, %v7408_v46  ;;  %v946_v22 = vcombine.low %v924_v14, %v931_v15  ;;  %v732_v23 = vrot.slane %v726_v12, 2  ;;  %v733_v24 = vrot.slane %v726_v12, 3 }
 0x261   : > { %v947_v25 = vcombine.low %v938_v18, %v945_v19  ;;  %v734_v26 = vrot.slane %v726_v12, 4  ;;  %v735_v27 = vrot.slane %v726_v12, 5  ;;  %v736_v28 = vrot.slane %v726_v12, 6 }
 0x262   : > { %v843_v29 = vcombine.low %v835_v17, %v842_v21  ;;  %v954_v30 = vrot.slane %v946_v22, %v7408_v46  ;;  %v737_v31 = vrot.slane %v726_v12, 7  ;;  %v746_v32 = vcombine.low %v726_v12, %v731_v20 }
 0x263   : > { %v961_v33 = vrot.slane %v947_v25, %v7408_v46  ;;  %v747_v34 = vcombine.low %v732_v23, %v733_v24  ;;  %v748_v35 = vcombine.low %v734_v26, %v735_v27  ;;  %v850_v36 = vrot.slane %v728_v16, 1 }
 0x264   : > { %848 = vst [vmem:[#allocation2 + $0x10] ss:$2 sm:$0xff] %v843_v29  ;;  %v749_v37 = vcombine.low %v736_v28, %v737_v31  ;;  %v756_v38 = vrot.slane %v746_v32, %v7408_v46  ;;  %v851_v39 = vrot.slane %v728_v16, 2  ;;  %v852_v40 = vrot.slane %v728_v16, 3 }
 0x265   : > { %v962_v41 = vcombine.low %v954_v30, %v961_v33  ;;  %v763_v42 = vrot.slane %v747_v34, %v7408_v46  ;;  %v770_v43 = vrot.slane %v748_v35, %v7408_v46  ;;  %v853_v44 = vrot.slane %v728_v16, 4 }
 0x266   : > { %v777_v45 = vrot.slane %v749_v37, %v7408_v46  ;;  %v854_v47 = vrot.slane %v728_v16, 5  ;;  %v855_v48 = vrot.slane %v728_v16, 6  ;;  %v856_v49 = vrot.slane %v728_v16, 7 }
 0x267   : > { %968 = vst [vmem:[#allocation2 + $0x11] ss:$2 sm:$0xff] %v962_v41  ;;  %v778_v50 = vcombine.low %v756_v38, %v763_v42  ;;  %v865_v51 = vcombine.low %v728_v16, %v850_v36  ;;  %v866_v52 = vcombine.low %v851_v39, %v852_v40 }
 0x268   : > { %v779_v53 = vcombine.low %v770_v43, %v777_v45  ;;  %v867_v54 = vcombine.low %v853_v44, %v854_v47  ;;  %v868_v55 = vcombine.low %v855_v48, %v856_v49 }
 0x269   : > { %v786_v56 = vrot.slane %v778_v50, %v7408_v46  ;;  %v875_v57 = vrot.slane %v865_v51, %v7408_v46  ;;  %v882_v58 = vrot.slane %v866_v52, %v7408_v46 }
 0x26a   : > { %v793_v59 = vrot.slane %v779_v53, %v7408_v46  ;;  %v889_v60 = vrot.slane %v867_v54, %v7408_v46  ;;  %v896_v61 = vrot.slane %v868_v55, %v7408_v46 }
 0x26b   : > { %v897_v62 = vcombine.low %v875_v57, %v882_v58 }
 0x26c   : > { %v794_v63 = vcombine.low %v786_v56, %v793_v59  ;;  %v898_v0 = vcombine.low %v889_v60, %v896_v61 }
 0x26d   : > { %v905_v1 = vrot.slane %v897_v62, %v7408_v46 }
 0x26e   : > { %846 = vst [vmem:[#allocation2] ss:$2 sm:$0xff] %v794_v63  ;;  %v912_v2 = vrot.slane %v898_v0, %v7408_v46 }
 0x270   : > { %v913_v3 = vcombine.low %v905_v1, %v912_v2 }
 0x272   : > { %966 = vst [vmem:[#allocation2 + $0x1] ss:$2 sm:$0xff] %v913_v3 }
 0x273 PF: > { %v1182_v4 = vld [vmem:[%s7188_s22 + $0x1c0] sm:$0xff]  ;;  %s5818_s9 = sshll.u32 %s7047_s11, 10  ;;  %v6979_v35 = vmov 1983009808   ;;  %v1078_v37 = vlaneseq  ;;  %p6332_p9 = scmp.ne.s32.totalorder %s7047_s11, 1 }
 0x274   : > { %v1186_v5 = vld [vmem:[%s7188_s22 + $0x1e0] sm:$0xff]  ;;  %v1076_v36 = vunpack.c.l.s4 %v6979_v35  ;;  %s7455_s10 = sshra.s32 %s5818_s9, 7 }
 0x275   : > { %v1310_v6 = vld [vmem:[%s7188_s22 + $0x5c0] sm:$0xff]  ;;  %v5877_v7 = vcombine.high %v1182_v4, %v1186_v5  ;;  %v5876_v8 = vcombine.low %v1182_v4, %v1186_v5  ;;  %v1079_v48 = vshrl.u32 %v1078_v37, 7  ;;  %s5819_s26 = sshll.u32 %s7455_s10, 1 }
 0x276   : > { %v1314_v46 = vld [vmem:[%s7188_s22 + $0x5e0] sm:$0xff]  ;;  %v1077_v47 = vunpack.c.0.s8 %v1076_v36  ;;  %s7468_s13 = scalar_lea.vmem [#allocation2], %s5819_s26 }
 0x277   : > { %v1174_v9 = vld [vmem:[%s7188_s22 + $0x180] sm:$0xff]  ;;  %v6005_v11 = vcombine.high %v1310_v6, %v1314_v46  ;;  %v6004_v12 = vcombine.low %v1310_v6, %v1314_v46  ;;  %4198 = vmatprep.subr.bf16.mxu0 %v5877_v7 }
 0x278   : > { %v1178_v10 = vld [vmem:[%s7188_s22 + $0x1a0] sm:$0xff]  ;;  %4199 = vmatpush1.bf16.msra.mxu0 %v5876_v8  ;;  %v7464_v57 = vsub.s32 %v1077_v47, %v1079_v48 }
 0x279   : > { %v5869_v13 = vcombine.high %v1174_v9, %v1178_v10  ;;  %v1302_v14 = vld [vmem:[%s7188_s22 + $0x580] sm:$0xff]  ;;  %4239 = vmatprep.subr.bf16.mxu1 %v6005_v11  ;;  %v5868_v21 = vcombine.low %v1174_v9, %v1178_v10 }
 0x27a   : > { %v1306_v15 = vld [vmem:[%s7188_s22 + $0x5a0] sm:$0xff]  ;;  %4240 = vmatpush1.bf16.msra.mxu1 %v6004_v12 }
 0x27b   : > { %v1166_v16 = vld [vmem:[%s7188_s22 + $0x140] sm:$0xff]  ;;  %v5997_v17 = vcombine.high %v1302_v14, %v1306_v15  ;;  %4200 = vmatprep.subr.bf16.mxu0 %v5869_v13  ;;  %v5996_v22 = vcombine.low %v1302_v14, %v1306_v15 }
 0x27c   : > { %v1170_v18 = vld [vmem:[%s7188_s22 + $0x160] sm:$0xff]  ;;  %4201 = vmatpush1.bf16.msra.mxu0 %v5868_v21 }
 0x27d   : > { %v1294_v19 = vld [vmem:[%s7188_s22 + $0x540] sm:$0xff]  ;;  %v5861_v23 = vcombine.high %v1166_v16, %v1170_v18  ;;  %4241 = vmatprep.subr.bf16.mxu1 %v5997_v17  ;;  %v5860_v29 = vcombine.low %v1166_v16, %v1170_v18 }
 0x27e   : > { %v1298_v20 = vld [vmem:[%s7188_s22 + $0x560] sm:$0xff]  ;;  %4242 = vmatpush1.bf16.msra.mxu1 %v5996_v22 }
 0x27f   : > { %v5989_v24 = vcombine.high %v1294_v19, %v1298_v20  ;;  %v1158_v25 = vld [vmem:[%s7188_s22 + $0x100] sm:$0xff]  ;;  %4202 = vmatprep.subr.bf16.mxu0 %v5861_v23  ;;  %v5988_v30 = vcombine.low %v1294_v19, %v1298_v20 }
 0x280   : > { %v1162_v26 = vld [vmem:[%s7188_s22 + $0x120] sm:$0xff]  ;;  %4203 = vmatpush1.bf16.msra.mxu0 %v5860_v29 }
 0x281   : > { %v1286_v27 = vld [vmem:[%s7188_s22 + $0x500] sm:$0xff]  ;;  %v5853_v31 = vcombine.high %v1158_v25, %v1162_v26  ;;  %4243 = vmatprep.subr.bf16.mxu1 %v5989_v24  ;;  %v5852_v40 = vcombine.low %v1158_v25, %v1162_v26 }
 0x282   : > { %v1290_v28 = vld [vmem:[%s7188_s22 + $0x520] sm:$0xff]  ;;  %4244 = vmatpush1.bf16.msra.mxu1 %v5988_v30 }
 0x283   : > { %v5981_v32 = vcombine.high %v1286_v27, %v1290_v28  ;;  %v1150_v33 = vld [vmem:[%s7188_s22 + $0xc0] sm:$0xff]  ;;  %4204 = vmatprep.subr.bf16.mxu0 %v5853_v31  ;;  %v5980_v41 = vcombine.low %v1286_v27, %v1290_v28 }
 0x284   : > { %v1154_v34 = vld [vmem:[%s7188_s22 + $0xe0] sm:$0xff]  ;;  %4205 = vmatpush1.bf16.msra.mxu0 %v5852_v40 }
 0x285   : > { %v1278_v38 = vld [vmem:[%s7188_s22 + $0x4c0] sm:$0xff]  ;;  %v5845_v42 = vcombine.high %v1150_v33, %v1154_v34  ;;  %4245 = vmatprep.subr.bf16.mxu1 %v5981_v32  ;;  %v5844_v51 = vcombine.low %v1150_v33, %v1154_v34 }
 0x286   : > { %v1282_v39 = vld [vmem:[%s7188_s22 + $0x4e0] sm:$0xff]  ;;  %4246 = vmatpush1.bf16.msra.mxu1 %v5980_v41 }
 0x287   : > { %v5973_v43 = vcombine.high %v1278_v38, %v1282_v39  ;;  %v1142_v44 = vld [vmem:[%s7188_s22 + $0x80] sm:$0xff]  ;;  %4206 = vmatprep.subr.bf16.mxu0 %v5845_v42  ;;  %v5972_v52 = vcombine.low %v1278_v38, %v1282_v39 }
 0x288   : > { %v1146_v45 = vld [vmem:[%s7188_s22 + $0xa0] sm:$0xff]  ;;  %4207 = vmatpush1.bf16.msra.mxu0 %v5844_v51 }
 0x289   : > { %v1270_v49 = vld [vmem:[%s7188_s22 + $0x480] sm:$0xff]  ;;  %v5837_v53 = vcombine.high %v1142_v44, %v1146_v45  ;;  %4247 = vmatprep.subr.bf16.mxu1 %v5973_v43  ;;  %v5836_v60 = vcombine.low %v1142_v44, %v1146_v45 }
 0x28a   : > { %v1274_v50 = vld [vmem:[%s7188_s22 + $0x4a0] sm:$0xff]  ;;  %4248 = vmatpush1.bf16.msra.mxu1 %v5972_v52 }
 0x28b   : > { %v5965_v54 = vcombine.high %v1270_v49, %v1274_v50  ;;  %v1134_v55 = vld [vmem:[%s7188_s22 + $0x40] sm:$0xff]  ;;  %4208 = vmatprep.subr.bf16.mxu0 %v5837_v53  ;;  %v5964_v61 = vcombine.low %v1270_v49, %v1274_v50 }
 0x28c   : > { %v1138_v56 = vld [vmem:[%s7188_s22 + $0x60] sm:$0xff]  ;;  %4209 = vmatpush1.bf16.msra.mxu0 %v5836_v60 }
 0x28d   : > { %v1262_v58 = vld [vmem:[%s7188_s22 + $0x440] sm:$0xff]  ;;  %v5829_v62 = vcombine.high %v1134_v55, %v1138_v56  ;;  %4249 = vmatprep.subr.bf16.mxu1 %v5965_v54  ;;  %v5828_v7 = vcombine.low %v1134_v55, %v1138_v56 }
 0x28e   : > { %v1266_v59 = vld [vmem:[%s7188_s22 + $0x460] sm:$0xff]  ;;  %4250 = vmatpush1.bf16.msra.mxu1 %v5964_v61 }
 0x28f   : > { %v1070_v63 = vld [vmem:[%s7468_s13] sm:$0xff]  ;;  %v5957_v0 = vcombine.high %v1262_v58, %v1266_v59  ;;  %4210 = vmatprep.subr.bf16.mxu0 %v5829_v62  ;;  %v5956_v9 = vcombine.low %v1262_v58, %v1266_v59 }
 0x290   : > { %v1126_v1 = vld [vmem:[%s7188_s22] sm:$0xff]  ;;  %v7474_v3 = vrot.slane %v1070_v63, %v7464_v57  ;;  %v1074_v4 = vcombine.high %v1070_v63, %v1070_v63  ;;  %4211 = vmatpush1.bf16.msra.mxu0 %v5828_v7 }
 0x291   : > { %v1130_v2 = vld [vmem:[%s7188_s22 + $0x20] sm:$0xff]  ;;  %4251 = vmatprep.subr.bf16.mxu1 %v5957_v0 }
 0x292   : > { %v1254_v5 = vld [vmem:[%s7188_s22 + $0x400] sm:$0xff]  ;;  %v1089_v46 = vcombine.high %v7474_v3, %v7474_v3  ;;  %v7481_v8 = vrot.slane %v1074_v4, %v7464_v57  ;;  %v5821_v10 = vcombine.high %v1126_v1, %v1130_v2  ;;  %v5820_v18 = vcombine.low %v1126_v1, %v1130_v2  ;;  %4252 = vmatpush1.bf16.msra.mxu1 %v5956_v9 }
 0x293   : > { %v1258_v6 = vld [vmem:[%s7188_s22 + $0x420] sm:$0xff] }
 0x294   : > { %v5949_v11 = vcombine.high %v1254_v5, %v1258_v6  ;;  %v1246_v12 = vld [vmem:[%s7188_s22 + $0x3c0] sm:$0xff]  ;;  %v7485_v14 = vpack.c.bf16 %v1089_v46, %v1089_v46  ;;  %v1090_v15 = vcombine.high %v7481_v8, %v7481_v8  ;;  %4212 = vmatprep.subr.bf16.mxu0 %v5821_v10  ;;  %v5948_v20 = vcombine.low %v1254_v5, %v1258_v6 }
 0x295   : > { %v1250_v13 = vld [vmem:[%s7188_s22 + $0x3e0] sm:$0xff]  ;;  %4213 = vmatpush1.bf16.msra.mxu0 %v5820_v18 }
 0x296   : > { %v1374_v16 = vld [vmem:[%s7188_s22 + $0x7c0] sm:$0xff]  ;;  %4230 = vmatprep.mubr.bf16.mxu0 %v7485_v14  ;;  %v7492_v19 = vpack.c.bf16 %v1090_v15, %v1090_v15  ;;  %v5941_v21 = vcombine.high %v1246_v12, %v1250_v13  ;;  %4253 = vmatprep.subr.bf16.mxu1 %v5949_v11  ;;  %v5940_v27 = vcombine.low %v1246_v12, %v1250_v13 }
 0x297   : > { %v1378_v17 = vld [vmem:[%s7188_s22 + $0x7e0] sm:$0xff]  ;;  %4254 = vmatpush1.bf16.msra.mxu1 %v5948_v20 }
 0x298   : > { %v6069_v22 = vcombine.high %v1374_v16, %v1378_v17  ;;  %v1238_v23 = vld [vmem:[%s7188_s22 + $0x380] sm:$0xff]  ;;  %4271 = vmatprep.mubr.bf16.mxu1 %v7492_v19  ;;  %4214 = vmatprep.subr.bf16.mxu0 %v5941_v21  ;;  %v6068_v28 = vcombine.low %v1374_v16, %v1378_v17 }
 0x299   : > { %v1242_v24 = vld [vmem:[%s7188_s22 + $0x3a0] sm:$0xff]  ;;  %4215 = vmatpush2.bf16.msra.mxu0 %v5940_v27 }
 0x29a   : > { %v1366_v25 = vld [vmem:[%s7188_s22 + $0x780] sm:$0xff]  ;;  %v5933_v29 = vcombine.high %v1238_v23, %v1242_v24  ;;  %4255 = vmatprep.subr.bf16.mxu1 %v6069_v22  ;;  %v5932_v35 = vcombine.low %v1238_v23, %v1242_v24 }
 0x29b   : > { %v1370_v26 = vld [vmem:[%s7188_s22 + $0x7a0] sm:$0xff]  ;;  %4256 = vmatpush2.bf16.msra.mxu1 %v6068_v28 }
 0x29c   : > { %v6061_v30 = vcombine.high %v1366_v25, %v1370_v26  ;;  %v1230_v31 = vld [vmem:[%s7188_s22 + $0x340] sm:$0xff]  ;;  %4216 = vmatprep.subr.bf16.mxu0 %v5933_v29  ;;  %v6060_v36 = vcombine.low %v1366_v25, %v1370_v26 }
 0x29d   : > { %v1234_v32 = vld [vmem:[%s7188_s22 + $0x360] sm:$0xff]  ;;  %4217 = vmatpush2.bf16.msra.mxu0 %v5932_v35  ;;  %v7540_v35 = vpack.c.bf16 %v7474_v3, %v7474_v3 }
 0x29e   : > { %v1358_v33 = vld [vmem:[%s7188_s22 + $0x740] sm:$0xff]  ;;  %v5925_v37 = vcombine.high %v1230_v31, %v1234_v32  ;;  %4257 = vmatprep.subr.bf16.mxu1 %v6061_v30  ;;  %v5924_v43 = vcombine.low %v1230_v31, %v1234_v32 }
 0x29f   : > { %v1362_v34 = vld [vmem:[%s7188_s22 + $0x760] sm:$0xff]  ;;  %4258 = vmatpush2.bf16.msra.mxu1 %v6060_v36 }
 0x2a0   : > { %v6053_v38 = vcombine.high %v1358_v33, %v1362_v34  ;;  %v1222_v39 = vld [vmem:[%s7188_s22 + $0x300] sm:$0xff]  ;;  %4218 = vmatprep.subr.bf16.mxu0 %v5925_v37  ;;  %v6052_v44 = vcombine.low %v1358_v33, %v1362_v34 }
 0x2a1   : > { %v1226_v40 = vld [vmem:[%s7188_s22 + $0x320] sm:$0xff]  ;;  %4219 = vmatpush2.bf16.msra.mxu0 %v5924_v43 }
 0x2a2   : > { %v1350_v41 = vld [vmem:[%s7188_s22 + $0x700] sm:$0xff]  ;;  %v5917_v45 = vcombine.high %v1222_v39, %v1226_v40  ;;  %4259 = vmatprep.subr.bf16.mxu1 %v6053_v38  ;;  %v5916_v52 = vcombine.low %v1222_v39, %v1226_v40  ;;  %v7548_v39 = vpack.c.bf16 %v7481_v8, %v7481_v8 }
 0x2a3   : > { %v1354_v42 = vld [vmem:[%s7188_s22 + $0x720] sm:$0xff]  ;;  %4260 = vmatpush2.bf16.msra.mxu1 %v6052_v44 }
 0x2a4   : > { %v6045_v47 = vcombine.high %v1350_v41, %v1354_v42  ;;  %v1214_v48 = vld [vmem:[%s7188_s22 + $0x2c0] sm:$0xff]  ;;  %4220 = vmatprep.subr.bf16.mxu0 %v5917_v45  ;;  %v6044_v53 = vcombine.low %v1350_v41, %v1354_v42 }
 0x2a5   : > { %v1218_v49 = vld [vmem:[%s7188_s22 + $0x2e0] sm:$0xff]  ;;  %4221 = vmatpush2.bf16.msra.mxu0 %v5916_v52 }
 0x2a6   : > { %v1342_v50 = vld [vmem:[%s7188_s22 + $0x6c0] sm:$0xff]  ;;  %v5909_v54 = vcombine.high %v1214_v48, %v1218_v49  ;;  %4261 = vmatprep.subr.bf16.mxu1 %v6045_v47  ;;  %v5908_v61 = vcombine.low %v1214_v48, %v1218_v49 }
 0x2a7   : > { %v1346_v51 = vld [vmem:[%s7188_s22 + $0x6e0] sm:$0xff]  ;;  %4262 = vmatpush2.bf16.msra.mxu1 %v6044_v53 }
 0x2a8   : > { %v6037_v55 = vcombine.high %v1342_v50, %v1346_v51  ;;  %v1206_v56 = vld [vmem:[%s7188_s22 + $0x280] sm:$0xff]  ;;  %4222 = vmatprep.subr.bf16.mxu0 %v5909_v54  ;;  %v6036_v62 = vcombine.low %v1342_v50, %v1346_v51 }
 0x2a9   : > { %v1210_v58 = vld [vmem:[%s7188_s22 + $0x2a0] sm:$0xff]  ;;  %4223 = vmatpush2.bf16.msra.mxu0 %v5908_v61 }
 0x2aa   : > { %v1334_v59 = vld [vmem:[%s7188_s22 + $0x680] sm:$0xff]  ;;  %v5901_v63 = vcombine.high %v1206_v56, %v1210_v58  ;;  %4263 = vmatprep.subr.bf16.mxu1 %v6037_v55  ;;  %v5900_v6 = vcombine.low %v1206_v56, %v1210_v58 }
 0x2ab   : > { %v1338_v60 = vld [vmem:[%s7188_s22 + $0x6a0] sm:$0xff]  ;;  %4264 = vmatpush2.bf16.msra.mxu1 %v6036_v62 }
 0x2ac   : > { %v6029_v0 = vcombine.high %v1334_v59, %v1338_v60  ;;  %v1198_v1 = vld [vmem:[%s7188_s22 + $0x240] sm:$0xff]  ;;  %4224 = vmatprep.subr.bf16.mxu0 %v5901_v63  ;;  %v6028_v46 = vcombine.low %v1334_v59, %v1338_v60 }
 0x2ad   : > { %v1202_v2 = vld [vmem:[%s7188_s22 + $0x260] sm:$0xff]  ;;  %4225 = vmatpush2.bf16.msra.mxu0 %v5900_v6 }
 0x2ae   : > { %v1326_v4 = vld [vmem:[%s7188_s22 + $0x640] sm:$0xff]  ;;  %v5893_v9 = vcombine.high %v1198_v1, %v1202_v2  ;;  %4265 = vmatprep.subr.bf16.mxu1 %v6029_v0  ;;  %v5892_v17 = vcombine.low %v1198_v1, %v1202_v2 }
 0x2af   : > { %v1330_v5 = vld [vmem:[%s7188_s22 + $0x660] sm:$0xff]  ;;  %4266 = vmatpush2.bf16.msra.mxu1 %v6028_v46 }
 0x2b0   : > { %v1071_v7 = vld [vmem:[%s7468_s13 + $0x8] sm:$0xff]  ;;  %v6021_v10 = vcombine.high %v1326_v4, %v1330_v5  ;;  %4226 = vmatprep.subr.bf16.mxu0 %v5893_v9  ;;  %v6020_v18 = vcombine.low %v1326_v4, %v1330_v5 }
 0x2b1   : > { %v1190_v11 = vld [vmem:[%s7188_s22 + $0x200] sm:$0xff]  ;;  %v1091_v16 = vcombine.high %v1071_v7, %v1071_v7  ;;  %v7527_v24 = vrot.slane %v1071_v7, %v7464_v57  ;;  %4227 = vmatpush2.bf16.msra.mxu0 %v5892_v17 }
 0x2b2   : > { %v1194_v12 = vld [vmem:[%s7188_s22 + $0x220] sm:$0xff]  ;;  %4267 = vmatprep.subr.bf16.mxu1 %v6021_v10 }
 0x2b3   : > { %v1318_v13 = vld [vmem:[%s7188_s22 + $0x600] sm:$0xff]  ;;  %v5885_v20 = vcombine.high %v1190_v11, %v1194_v12  ;;  %v7532_v27 = vrot.slane %v1091_v16, %v7464_v57  ;;  %v5884_v28 = vcombine.low %v1190_v11, %v1194_v12  ;;  %4268 = vmatpush2.bf16.msra.mxu1 %v6020_v18  ;;  %v1106_v34 = vcombine.high %v7527_v24, %v7527_v24 }
 0x2b4   : > { %v1322_v15 = vld [vmem:[%s7188_s22 + $0x620] sm:$0xff] }
 0x2b5   : > { %v6013_v21 = vcombine.high %v1318_v13, %v1322_v15  ;;  %v1438_v22 = vld [vmem:[%s7188_s22 + $0x9c0] sm:$0xff]  ;;  %4228 = vmatprep.subr.bf16.mxu0 %v5885_v20  ;;  %v6012_v29 = vcombine.low %v1318_v13, %v1322_v15  ;;  %v1107_v38 = vcombine.high %v7532_v27, %v7532_v27  ;;  %v7552_v45 = vpack.c.bf16 %v1106_v34, %v1106_v34 }
 0x2b6   : > { %v1442_v23 = vld [vmem:[%s7188_s22 + $0x9e0] sm:$0xff]  ;;  %4229 = vmatpush2.bf16.msra.mxu0 %v5884_v28 }
 0x2b7   : > { %v1566_v25 = vld [vmem:[%s7188_s22 + $0xdc0] sm:$0xff]  ;;  %v6133_v30 = vcombine.high %v1438_v22, %v1442_v23  ;;  %4269 = vmatprep.subr.bf16.mxu1 %v6013_v21  ;;  %v6132_v40 = vcombine.low %v1438_v22, %v1442_v23  ;;  %v7557_v48 = vpack.c.bf16 %v1107_v38, %v1107_v38 }
 0x2b8   : > { %v1570_v26 = vld [vmem:[%s7188_s22 + $0xde0] sm:$0xff]  ;;  %4270 = vmatpush2.bf16.msra.mxu1 %v6012_v29 }
 0x2b9   : > { %v6261_v31 = vcombine.high %v1566_v25, %v1570_v26  ;;  %v1430_v32 = vld [vmem:[%s7188_s22 + $0x980] sm:$0xff]  ;;  %4280 = vmatprep.subr.bf16.mxu0 %v6133_v30  ;;  %v6260_v41 = vcombine.low %v1566_v25, %v1570_v26  ;;  %4231 = vmatmul.mubr.bf16.vlgmr.msra.gmra.mxu0 %v7540_v35 }
 0x2ba   : > { %v1434_v33 = vld [vmem:[%s7188_s22 + $0x9a0] sm:$0xff]  ;;  %4281 = vmatpush1.bf16.msra.mxu0 %v6132_v40  ;;  %4312 = vmatprep.mubr.bf16.mxu0 %v7552_v45 }
 0x2bb   : > { %v1558_v36 = vld [vmem:[%s7188_s22 + $0xd80] sm:$0xff]  ;;  %v6125_v42 = vcombine.high %v1430_v32, %v1434_v33  ;;  %4321 = vmatprep.subr.bf16.mxu1 %v6261_v31  ;;  %4272 = vmatmul.mubr.bf16.vlgmr.msra.gmra.mxu1 %v7548_v39  ;;  %v6124_v49 = vcombine.low %v1430_v32, %v1434_v33 }
 0x2bc   : > { %v1562_v37 = vld [vmem:[%s7188_s22 + $0xda0] sm:$0xff]  ;;  %4322 = vmatpush1.bf16.msra.mxu1 %v6260_v41  ;;  %4353 = vmatprep.mubr.bf16.mxu1 %v7557_v48 }
 0x2bd   : > { %v6253_v3 = vcombine.high %v1558_v36, %v1562_v37  ;;  %v1422_v43 = vld [vmem:[%s7188_s22 + $0x940] sm:$0xff]  ;;  %4282 = vmatprep.subr.bf16.mxu0 %v6125_v42  ;;  %v6252_v50 = vcombine.low %v1558_v36, %v1562_v37 }
 0x2be   : > { %v1426_v44 = vld [vmem:[%s7188_s22 + $0x960] sm:$0xff]  ;;  %4283 = vmatpush1.bf16.msra.mxu0 %v6124_v49 }
 0x2bf   : > { %v1550_v47 = vld [vmem:[%s7188_s22 + $0xd40] sm:$0xff]  ;;  %v6117_v51 = vcombine.high %v1422_v43, %v1426_v44  ;;  %4323 = vmatprep.subr.bf16.mxu1 %v6253_v3  ;;  %v6116_v58 = vcombine.low %v1422_v43, %v1426_v44 }
 0x2c0   : > { %v1554_v8 = vld [vmem:[%s7188_s22 + $0xd60] sm:$0xff]  ;;  %4324 = vmatpush1.bf16.msra.mxu1 %v6252_v50 }
 0x2c1   : > { %v6245_v52 = vcombine.high %v1550_v47, %v1554_v8  ;;  %v1414_v53 = vld [vmem:[%s7188_s22 + $0x900] sm:$0xff]  ;;  %4284 = vmatprep.subr.bf16.mxu0 %v6117_v51  ;;  %v6244_v59 = vcombine.low %v1550_v47, %v1554_v8 }
 0x2c2   : > { %v1418_v54 = vld [vmem:[%s7188_s22 + $0x920] sm:$0xff]  ;;  %4285 = vmatpush1.bf16.msra.mxu0 %v6116_v58 }
 0x2c3   : > { %v1542_v55 = vld [vmem:[%s7188_s22 + $0xd00] sm:$0xff]  ;;  %v6109_v60 = vcombine.high %v1414_v53, %v1418_v54  ;;  %4325 = vmatprep.subr.bf16.mxu1 %v6245_v52  ;;  %v6108_v2 = vcombine.low %v1414_v53, %v1418_v54 }
 0x2c4   : > { %v1546_v56 = vld [vmem:[%s7188_s22 + $0xd20] sm:$0xff]  ;;  %4326 = vmatpush1.bf16.msra.mxu1 %v6244_v59 }
 0x2c5   : > { %v6237_v61 = vcombine.high %v1542_v55, %v1546_v56  ;;  %v1406_v62 = vld [vmem:[%s7188_s22 + $0x8c0] sm:$0xff]  ;;  %4286 = vmatprep.subr.bf16.mxu0 %v6109_v60  ;;  %v6236_v4 = vcombine.low %v1542_v55, %v1546_v56 }
 0x2c6   : > { %v1410_v63 = vld [vmem:[%s7188_s22 + $0x8e0] sm:$0xff]  ;;  %4287 = vmatpush1.bf16.msra.mxu0 %v6108_v2 }
 0x2c7   : > { %v1534_v0 = vld [vmem:[%s7188_s22 + $0xcc0] sm:$0xff]  ;;  %v6101_v5 = vcombine.high %v1406_v62, %v1410_v63  ;;  %4327 = vmatprep.subr.bf16.mxu1 %v6237_v61  ;;  %v6100_v11 = vcombine.low %v1406_v62, %v1410_v63 }
 0x2c8   : > { %v1538_v1 = vld [vmem:[%s7188_s22 + $0xce0] sm:$0xff]  ;;  %4328 = vmatpush1.bf16.msra.mxu1 %v6236_v4 }
 0x2c9   : > { %v6229_v6 = vcombine.high %v1534_v0, %v1538_v1  ;;  %v1398_v7 = vld [vmem:[%s7188_s22 + $0x880] sm:$0xff]  ;;  %4288 = vmatprep.subr.bf16.mxu0 %v6101_v5  ;;  %v6228_v12 = vcombine.low %v1534_v0, %v1538_v1 }
 0x2ca   : > { %v1402_v46 = vld [vmem:[%s7188_s22 + $0x8a0] sm:$0xff]  ;;  %4289 = vmatpush1.bf16.msra.mxu0 %v6100_v11 }
 0x2cb   : > { %v1526_v9 = vld [vmem:[%s7188_s22 + $0xc80] sm:$0xff]  ;;  %v6093_v13 = vcombine.high %v1398_v7, %v1402_v46  ;;  %4329 = vmatprep.subr.bf16.mxu1 %v6229_v6  ;;  %v6092_v21 = vcombine.low %v1398_v7, %v1402_v46 }
 0x2cc   : > { %v1530_v10 = vld [vmem:[%s7188_s22 + $0xca0] sm:$0xff]  ;;  %4330 = vmatpush1.bf16.msra.mxu1 %v6228_v12 }
 0x2cd   : > { %v6221_v15 = vcombine.high %v1526_v9, %v1530_v10  ;;  %v1390_v16 = vld [vmem:[%s7188_s22 + $0x840] sm:$0xff]  ;;  %4290 = vmatprep.subr.bf16.mxu0 %v6093_v13  ;;  %v6220_v22 = vcombine.low %v1526_v9, %v1530_v10 }
 0x2ce   : > { %v1394_v17 = vld [vmem:[%s7188_s22 + $0x860] sm:$0xff]  ;;  %4291 = vmatpush1.bf16.msra.mxu0 %v6092_v21 }
 0x2cf   : > { %v1518_v18 = vld [vmem:[%s7188_s22 + $0xc40] sm:$0xff]  ;;  %v6085_v23 = vcombine.high %v1390_v16, %v1394_v17  ;;  %4331 = vmatprep.subr.bf16.mxu1 %v6221_v15  ;;  %v6084_v31 = vcombine.low %v1390_v16, %v1394_v17 }
 0x2d0   : > { %v1522_v20 = vld [vmem:[%s7188_s22 + $0xc60] sm:$0xff]  ;;  %4332 = vmatpush1.bf16.msra.mxu1 %v6220_v22 }
 0x2d1   : > { %v6213_v25 = vcombine.high %v1518_v18, %v1522_v20  ;;  %v1382_v26 = vld [vmem:[%s7188_s22 + $0x800] sm:$0xff]  ;;  %4292 = vmatprep.subr.bf16.mxu0 %v6085_v23  ;;  %v6212_v32 = vcombine.low %v1518_v18, %v1522_v20 }
 0x2d2   : > { %v1386_v28 = vld [vmem:[%s7188_s22 + $0x820] sm:$0xff]  ;;  %4293 = vmatpush1.bf16.msra.mxu0 %v6084_v31 }
 0x2d3   : > { %v1510_v29 = vld [vmem:[%s7188_s22 + $0xc00] sm:$0xff]  ;;  %v6077_v33 = vcombine.high %v1382_v26, %v1386_v28  ;;  %4333 = vmatprep.subr.bf16.mxu1 %v6213_v25  ;;  %v6076_v41 = vcombine.low %v1382_v26, %v1386_v28 }
 0x2d4   : > { %v1514_v30 = vld [vmem:[%s7188_s22 + $0xc20] sm:$0xff]  ;;  %4334 = vmatpush1.bf16.msra.mxu1 %v6212_v32 }
 0x2d5   : > { %v6205_v34 = vcombine.high %v1510_v29, %v1514_v30  ;;  %v1502_v36 = vld [vmem:[%s7188_s22 + $0xbc0] sm:$0xff]  ;;  %4294 = vmatprep.subr.bf16.mxu0 %v6077_v33  ;;  %v6204_v42 = vcombine.low %v1510_v29, %v1514_v30 }
 0x2d6   : > { %v1506_v37 = vld [vmem:[%s7188_s22 + $0xbe0] sm:$0xff]  ;;  %4295 = vmatpush1.bf16.msra.mxu0 %v6076_v41 }
 0x2d7   : > { %v1630_v38 = vld [vmem:[%s7188_s22 + $0xfc0] sm:$0xff]  ;;  %v6197_v3 = vcombine.high %v1502_v36, %v1506_v37  ;;  %4335 = vmatprep.subr.bf16.mxu1 %v6205_v34  ;;  %v6196_v50 = vcombine.low %v1502_v36, %v1506_v37 }
 0x2d8   : > { %v1634_v40 = vld [vmem:[%s7188_s22 + $0xfe0] sm:$0xff]  ;;  %4336 = vmatpush1.bf16.msra.mxu1 %v6204_v42 }
 0x2d9   : > { %v6325_v43 = vcombine.high %v1630_v38, %v1634_v40  ;;  %v1494_v44 = vld [vmem:[%s7188_s22 + $0xb80] sm:$0xff]  ;;  %4296 = vmatprep.subr.bf16.mxu0 %v6197_v3  ;;  %v6324_v51 = vcombine.low %v1630_v38, %v1634_v40 }
 0x2da   : > { %v1498_v47 = vld [vmem:[%s7188_s22 + $0xba0] sm:$0xff]  ;;  %4297 = vmatpush2.bf16.msra.mxu0 %v6196_v50  ;;  %v1315_v50 = vld [vmem:[%s7188_s22 + $0x5e8] sm:$0xff] }
 0x2db   : > { %v1622_v8 = vld [vmem:[%s7188_s22 + $0xf80] sm:$0xff]  ;;  %v6189_v52 = vcombine.high %v1494_v44, %v1498_v47  ;;  %4337 = vmatprep.subr.bf16.mxu1 %v6325_v43  ;;  %v6188_v59 = vcombine.low %v1494_v44, %v1498_v47  ;;  %v1183_v47 = vld [vmem:[%s7188_s22 + $0x1c8] sm:$0xff] }
 0x2dc   : > { %v1626_v49 = vld [vmem:[%s7188_s22 + $0xfa0] sm:$0xff]  ;;  %4338 = vmatpush2.bf16.msra.mxu1 %v6324_v51 }
 0x2dd   : > { %v6317_v53 = vcombine.high %v1622_v8, %v1626_v49  ;;  %v1486_v54 = vld [vmem:[%s7188_s22 + $0xb40] sm:$0xff]  ;;  %4298 = vmatprep.subr.bf16.mxu0 %v6189_v52  ;;  %v6316_v60 = vcombine.low %v1622_v8, %v1626_v49  ;;  %v1187_v8 = vld [vmem:[%s7188_s22 + $0x1e8] sm:$0xff] }
 0x2de   : > { %v1490_v55 = vld [vmem:[%s7188_s22 + $0xb60] sm:$0xff]  ;;  %4299 = vmatpush2.bf16.msra.mxu0 %v6188_v59  ;;  %v1311_v49 = vld [vmem:[%s7188_s22 + $0x5c8] sm:$0xff] }
 0x2df   : > { %v1614_v56 = vld [vmem:[%s7188_s22 + $0xf40] sm:$0xff]  ;;  %v6181_v61 = vcombine.high %v1486_v54, %v1490_v55  ;;  %4339 = vmatprep.subr.bf16.mxu1 %v6317_v53  ;;  %v6180_v4 = vcombine.low %v1486_v54, %v1490_v55  ;;  %v5879_v53 = vcombine.high %v1183_v47, %v1187_v8  ;;  %v6007_v54 = vcombine.high %v1311_v49, %v1315_v50  ;;  %v1175_v55 = vld [vmem:[%s7188_s22 + $0x188] sm:$0xff] }
 0x2e0   : > { %v1618_v58 = vld [vmem:[%s7188_s22 + $0xf60] sm:$0xff]  ;;  %4340 = vmatpush2.bf16.msra.mxu1 %v6316_v60  ;;  %v1303_v59 = vld [vmem:[%s7188_s22 + $0x588] sm:$0xff] }
 0x2e1   : > { %v6309_v62 = vcombine.high %v1614_v56, %v1618_v58  ;;  %v1478_v63 = vld [vmem:[%s7188_s22 + $0xb00] sm:$0xff]  ;;  %4300 = vmatprep.subr.bf16.mxu0 %v6181_v61  ;;  %v6308_v5 = vcombine.low %v1614_v56, %v1618_v58  ;;  %v1179_v56 = vld [vmem:[%s7188_s22 + $0x1a8] sm:$0xff]  ;;  %v7622_v58 = vpack.c.bf16 %v7527_v24, %v7527_v24  ;;  %v7628_v61 = vpack.c.bf16 %v7532_v27, %v7532_v27 }
 0x2e2   : > { %v1482_v0 = vld [vmem:[%s7188_s22 + $0xb20] sm:$0xff]  ;;  %4301 = vmatpush2.bf16.msra.mxu0 %v6180_v4  ;;  %v1307_v60 = vld [vmem:[%s7188_s22 + $0x5a8] sm:$0xff]  ;;  %v5870_v27 = vcombine.low %v1175_v55, %v1179_v56 }
 0x2e3   : > { %v1606_v1 = vld [vmem:[%s7188_s22 + $0xf00] sm:$0xff]  ;;  %v6173_v6 = vcombine.high %v1478_v63, %v1482_v0  ;;  %4341 = vmatprep.subr.bf16.mxu1 %v6309_v62  ;;  %v6172_v12 = vcombine.low %v1478_v63, %v1482_v0  ;;  %v5878_v62 = vcombine.low %v1183_v47, %v1187_v8  ;;  %v6006_v63 = vcombine.low %v1311_v49, %v1315_v50  ;;  %v1171_v24 = vld [vmem:[%s7188_s22 + $0x168] sm:$0xff] }
 0x2e4   : > { %v1610_v2 = vld [vmem:[%s7188_s22 + $0xf20] sm:$0xff]  ;;  %4342 = vmatpush2.bf16.msra.mxu1 %v6308_v5  ;;  %v5871_v0 = vcombine.high %v1175_v55, %v1179_v56  ;;  %v1295_v4 = vld [vmem:[%s7188_s22 + $0x548] sm:$0xff] }
 0x2e5   : > { %v6301_v7 = vcombine.high %v1606_v1, %v1610_v2  ;;  %v1470_v46 = vld [vmem:[%s7188_s22 + $0xac0] sm:$0xff]  ;;  %4302 = vmatprep.subr.bf16.mxu0 %v6173_v6  ;;  %v6300_v13 = vcombine.low %v1606_v1, %v1610_v2  ;;  %v5999_v1 = vcombine.high %v1303_v59, %v1307_v60  ;;  %v1167_v2 = vld [vmem:[%s7188_s22 + $0x148] sm:$0xff]  ;;  %v5998_v6 = vcombine.low %v1303_v59, %v1307_v60 }
 0x2e6   : > { %v1474_v9 = vld [vmem:[%s7188_s22 + $0xae0] sm:$0xff]  ;;  %4303 = vmatpush2.bf16.msra.mxu0 %v6172_v12  ;;  %v1299_v5 = vld [vmem:[%s7188_s22 + $0x568] sm:$0xff] }
 0x2e7   : > { %v1598_v10 = vld [vmem:[%s7188_s22 + $0xec0] sm:$0xff]  ;;  %v6165_v15 = vcombine.high %v1470_v46, %v1474_v9  ;;  %4343 = vmatprep.subr.bf16.mxu1 %v6301_v7  ;;  %v6164_v22 = vcombine.low %v1470_v46, %v1474_v9  ;;  %v5863_v7 = vcombine.high %v1167_v2, %v1171_v24  ;;  %v5991_v46 = vcombine.high %v1295_v4, %v1299_v5  ;;  %v1159_v9 = vld [vmem:[%s7188_s22 + $0x108] sm:$0xff] }
 0x2e8   : > { %v1602_v11 = vld [vmem:[%s7188_s22 + $0xee0] sm:$0xff]  ;;  %4344 = vmatpush2.bf16.msra.mxu1 %v6300_v13  ;;  %v1291_v12 = vld [vmem:[%s7188_s22 + $0x528] sm:$0xff]  ;;  %v5862_v13 = vcombine.low %v1167_v2, %v1171_v24 }
 0x2e9   : > { %v6293_v16 = vcombine.high %v1598_v10, %v1602_v11  ;;  %v1462_v17 = vld [vmem:[%s7188_s22 + $0xa80] sm:$0xff]  ;;  %4304 = vmatprep.subr.bf16.mxu0 %v6165_v15  ;;  %v6292_v23 = vcombine.low %v1598_v10, %v1602_v11  ;;  %v1163_v10 = vld [vmem:[%s7188_s22 + $0x128] sm:$0xff]  ;;  %v5990_v15 = vcombine.low %v1295_v4, %v1299_v5 }
 0x2ea   : > { %v1466_v18 = vld [vmem:[%s7188_s22 + $0xaa0] sm:$0xff]  ;;  %4305 = vmatpush2.bf16.msra.mxu0 %v6164_v22  ;;  %v1287_v11 = vld [vmem:[%s7188_s22 + $0x508] sm:$0xff] }
 0x2eb   : > { %v1590_v20 = vld [vmem:[%s7188_s22 + $0xe80] sm:$0xff]  ;;  %v6157_v25 = vcombine.high %v1462_v17, %v1466_v18  ;;  %4345 = vmatprep.subr.bf16.mxu1 %v6293_v16  ;;  %v6156_v32 = vcombine.low %v1462_v17, %v1466_v18  ;;  %v5855_v16 = vcombine.high %v1159_v9, %v1163_v10  ;;  %v5983_v17 = vcombine.high %v1287_v11, %v1291_v12  ;;  %v1151_v18 = vld [vmem:[%s7188_s22 + $0xc8] sm:$0xff] }
 0x2ec   : > { %v1594_v21 = vld [vmem:[%s7188_s22 + $0xea0] sm:$0xff]  ;;  %4346 = vmatpush2.bf16.msra.mxu1 %v6292_v23  ;;  %v1283_v22 = vld [vmem:[%s7188_s22 + $0x4e8] sm:$0xff]  ;;  %v5854_v23 = vcombine.low %v1159_v9, %v1163_v10 }
 0x2ed   : > { %v6285_v26 = vcombine.high %v1590_v20, %v1594_v21  ;;  %v1454_v28 = vld [vmem:[%s7188_s22 + $0xa40] sm:$0xff]  ;;  %4306 = vmatprep.subr.bf16.mxu0 %v6157_v25  ;;  %v6284_v33 = vcombine.low %v1590_v20, %v1594_v21  ;;  %v1155_v20 = vld [vmem:[%s7188_s22 + $0xe8] sm:$0xff]  ;;  %v5982_v25 = vcombine.low %v1287_v11, %v1291_v12 }
 0x2ee   : > { %v1458_v29 = vld [vmem:[%s7188_s22 + $0xa60] sm:$0xff]  ;;  %4307 = vmatpush2.bf16.msra.mxu0 %v6156_v32  ;;  %v1279_v21 = vld [vmem:[%s7188_s22 + $0x4c8] sm:$0xff] }
 0x2ef   : > { %v1582_v30 = vld [vmem:[%s7188_s22 + $0xe40] sm:$0xff]  ;;  %v6149_v34 = vcombine.high %v1454_v28, %v1458_v29  ;;  %4347 = vmatprep.subr.bf16.mxu1 %v6285_v26  ;;  %v6148_v42 = vcombine.low %v1454_v28, %v1458_v29  ;;  %v5847_v26 = vcombine.high %v1151_v18, %v1155_v20  ;;  %v5975_v28 = vcombine.high %v1279_v21, %v1283_v22  ;;  %v1143_v29 = vld [vmem:[%s7188_s22 + $0x88] sm:$0xff] }
 0x2f0   : > { %v1586_v31 = vld [vmem:[%s7188_s22 + $0xe60] sm:$0xff]  ;;  %4348 = vmatpush2.bf16.msra.mxu1 %v6284_v33  ;;  %v1275_v32 = vld [vmem:[%s7188_s22 + $0x4a8] sm:$0xff]  ;;  %v5846_v33 = vcombine.low %v1151_v18, %v1155_v20 }
 0x2f1   : > { %v6277_v36 = vcombine.high %v1582_v30, %v1586_v31  ;;  %v1446_v37 = vld [vmem:[%s7188_s22 + $0xa00] sm:$0xff]  ;;  %4308 = vmatprep.subr.bf16.mxu0 %v6149_v34  ;;  %v6276_v3 = vcombine.low %v1582_v30, %v1586_v31  ;;  %v1147_v30 = vld [vmem:[%s7188_s22 + $0xa8] sm:$0xff]  ;;  %v5974_v34 = vcombine.low %v1279_v21, %v1283_v22 }
 0x2f2   : > { %v1450_v38 = vld [vmem:[%s7188_s22 + $0xa20] sm:$0xff]  ;;  %4309 = vmatpush2.bf16.msra.mxu0 %v6148_v42  ;;  %v1271_v31 = vld [vmem:[%s7188_s22 + $0x488] sm:$0xff] }
 0x2f3   : > { %v1574_v40 = vld [vmem:[%s7188_s22 + $0xe00] sm:$0xff]  ;;  %v6141_v43 = vcombine.high %v1446_v37, %v1450_v38  ;;  %4349 = vmatprep.subr.bf16.mxu1 %v6277_v36  ;;  %v6140_v51 = vcombine.low %v1446_v37, %v1450_v38  ;;  %v5839_v36 = vcombine.high %v1143_v29, %v1147_v30  ;;  %v5967_v37 = vcombine.high %v1271_v31, %v1275_v32  ;;  %v1135_v38 = vld [vmem:[%s7188_s22 + $0x48] sm:$0xff] }
 0x2f4   : > { %v1578_v41 = vld [vmem:[%s7188_s22 + $0xe20] sm:$0xff]  ;;  %4350 = vmatpush2.bf16.msra.mxu1 %v6276_v3  ;;  %v1267_v42 = vld [vmem:[%s7188_s22 + $0x468] sm:$0xff]  ;;  %v5838_v3 = vcombine.low %v1143_v29, %v1147_v30 }
 0x2f5   : > { %v6269_v44 = vcombine.high %v1574_v40, %v1578_v41  ;;  %4310 = vmatprep.subr.bf16.mxu0 %v6141_v43  ;;  %v6268_v52 = vcombine.low %v1574_v40, %v1578_v41  ;;  %v1139_v40 = vld [vmem:[%s7188_s22 + $0x68] sm:$0xff]  ;;  %v5966_v43 = vcombine.low %v1271_v31, %v1275_v32 }
 0x2f6   : > { %4311 = vmatpush2.bf16.msra.mxu0 %v6140_v51  ;;  %v1263_v41 = vld [vmem:[%s7188_s22 + $0x448] sm:$0xff] }
 0x2f7   : > { %4351 = vmatprep.subr.bf16.mxu1 %v6269_v44  ;;  %4362 = vmatprep.subr.bf16.mxu0 %v5879_v53  ;;  %v5831_v44 = vcombine.high %v1135_v38, %v1139_v40  ;;  %v5959_v47 = vcombine.high %v1263_v41, %v1267_v42  ;;  %v1127_v8 = vld [vmem:[%s7188_s22 + $0x8] sm:$0xff]  ;;  %v5958_v53 = vcombine.low %v1263_v41, %v1267_v42 }
 0x2f8   : > { %4352 = vmatpush2.bf16.msra.mxu1 %v6268_v52  ;;  %v1131_v49 = vld [vmem:[%s7188_s22 + $0x28] sm:$0xff]  ;;  %v5830_v52 = vcombine.low %v1135_v38, %v1139_v40 }
 0x2f9   : > { %4403 = vmatprep.subr.bf16.mxu1 %v6007_v54  ;;  %4313 = vmatmul.mubr.bf16.vlgmr.msra.gmra.mxu0 %v7622_v58  ;;  %v1255_v50 = vld [vmem:[%s7188_s22 + $0x408] sm:$0xff]  ;;  %v5823_v54 = vcombine.high %v1127_v8, %v1131_v49 }
 0x2fa   : > { %4363 = vmatpush1.bf16.msra.mxu0 %v5878_v62  ;;  %4394 = vmatprep.mubr.bf16.mxu0 %v7485_v14  ;;  %v1259_v51 = vld [vmem:[%s7188_s22 + $0x428] sm:$0xff] }
 0x2fb   : > { %4354 = vmatmul.mubr.bf16.vlgmr.msra.gmra.mxu1 %v7628_v61  ;;  %4364 = vmatprep.subr.bf16.mxu0 %v5871_v0  ;;  %v5951_v55 = vcombine.high %v1255_v50, %v1259_v51  ;;  %v1247_v56 = vld [vmem:[%s7188_s22 + $0x3c8] sm:$0xff]  ;;  %v5950_v0 = vcombine.low %v1255_v50, %v1259_v51 }
 0x2fc   : > { %4404 = vmatpush1.bf16.msra.mxu1 %v6006_v63  ;;  %4435 = vmatprep.mubr.bf16.mxu1 %v7492_v19  ;;  %v1251_v59 = vld [vmem:[%s7188_s22 + $0x3e8] sm:$0xff]  ;;  %v5822_v63 = vcombine.low %v1127_v8, %v1131_v49 }
 0x2fd   : > { %4405 = vmatprep.subr.bf16.mxu1 %v5999_v1  ;;  %v1375_v60 = vld [vmem:[%s7188_s22 + $0x7c8] sm:$0xff]  ;;  %v5943_v1 = vcombine.high %v1247_v56, %v1251_v59 }
 0x2fe   : > { %4365 = vmatpush1.bf16.msra.mxu0 %v5870_v27  ;;  %v1379_v62 = vld [vmem:[%s7188_s22 + $0x7e8] sm:$0xff] }
 0x2ff   : > { %4366 = vmatprep.subr.bf16.mxu0 %v5863_v7  ;;  %v6071_v2 = vcombine.high %v1375_v60, %v1379_v62  ;;  %v1239_v24 = vld [vmem:[%s7188_s22 + $0x388] sm:$0xff]  ;;  %v6070_v7 = vcombine.low %v1375_v60, %v1379_v62 }
 0x300   : > { %4406 = vmatpush1.bf16.msra.mxu1 %v5998_v6  ;;  %v1243_v4 = vld [vmem:[%s7188_s22 + $0x3a8] sm:$0xff]  ;;  %v5942_v6 = vcombine.low %v1247_v56, %v1251_v59 }
 0x301   : > { %4407 = vmatprep.subr.bf16.mxu1 %v5991_v46  ;;  %v1367_v5 = vld [vmem:[%s7188_s22 + $0x788] sm:$0xff]  ;;  %v5935_v46 = vcombine.high %v1239_v24, %v1243_v4 }
 0x302   : > { %4367 = vmatpush1.bf16.msra.mxu0 %v5862_v13  ;;  %v1371_v27 = vld [vmem:[%s7188_s22 + $0x7a8] sm:$0xff] }
 0x303   : > { %4368 = vmatprep.subr.bf16.mxu0 %v5855_v16  ;;  %v6063_v9 = vcombine.high %v1367_v5, %v1371_v27  ;;  %v1231_v10 = vld [vmem:[%s7188_s22 + $0x348] sm:$0xff]  ;;  %v6062_v16 = vcombine.low %v1367_v5, %v1371_v27 }
 0x304   : > { %4408 = vmatpush1.bf16.msra.mxu1 %v5990_v15  ;;  %v1235_v11 = vld [vmem:[%s7188_s22 + $0x368] sm:$0xff]  ;;  %v5934_v15 = vcombine.low %v1239_v24, %v1243_v4 }
 0x305   : > { %4409 = vmatprep.subr.bf16.mxu1 %v5983_v17  ;;  %v1359_v12 = vld [vmem:[%s7188_s22 + $0x748] sm:$0xff]  ;;  %v5927_v17 = vcombine.high %v1231_v10, %v1235_v11 }
 0x306   : > { %4369 = vmatpush1.bf16.msra.mxu0 %v5854_v23  ;;  %v1363_v13 = vld [vmem:[%s7188_s22 + $0x768] sm:$0xff] }
 0x307   : > { %4370 = vmatprep.subr.bf16.mxu0 %v5847_v26  ;;  %v6055_v18 = vcombine.high %v1359_v12, %v1363_v13  ;;  %v1223_v20 = vld [vmem:[%s7188_s22 + $0x308] sm:$0xff]  ;;  %v6054_v26 = vcombine.low %v1359_v12, %v1363_v13 }
 0x308   : > { %4410 = vmatpush1.bf16.msra.mxu1 %v5982_v25  ;;  %v1227_v21 = vld [vmem:[%s7188_s22 + $0x328] sm:$0xff]  ;;  %v5926_v25 = vcombine.low %v1231_v10, %v1235_v11 }
 0x309   : > { %4411 = vmatprep.subr.bf16.mxu1 %v5975_v28  ;;  %v1351_v22 = vld [vmem:[%s7188_s22 + $0x708] sm:$0xff]  ;;  %v5919_v28 = vcombine.high %v1223_v20, %v1227_v21 }
 0x30a   : > { %4371 = vmatpush1.bf16.msra.mxu0 %v5846_v33  ;;  %v1355_v23 = vld [vmem:[%s7188_s22 + $0x728] sm:$0xff] }
 0x30b   : > { %4372 = vmatprep.subr.bf16.mxu0 %v5839_v36  ;;  %v6047_v29 = vcombine.high %v1351_v22, %v1355_v23  ;;  %v1215_v30 = vld [vmem:[%s7188_s22 + $0x2c8] sm:$0xff]  ;;  %v6046_v36 = vcombine.low %v1351_v22, %v1355_v23 }
 0x30c   : > { %4412 = vmatpush1.bf16.msra.mxu1 %v5974_v34  ;;  %v1219_v31 = vld [vmem:[%s7188_s22 + $0x2e8] sm:$0xff]  ;;  %v5918_v34 = vcombine.low %v1223_v20, %v1227_v21 }
 0x30d   : > { %4413 = vmatprep.subr.bf16.mxu1 %v5967_v37  ;;  %v1343_v32 = vld [vmem:[%s7188_s22 + $0x6c8] sm:$0xff]  ;;  %v5911_v37 = vcombine.high %v1215_v30, %v1219_v31 }
 0x30e   : > { %4373 = vmatpush1.bf16.msra.mxu0 %v5838_v3  ;;  %v1347_v33 = vld [vmem:[%s7188_s22 + $0x6e8] sm:$0xff] }
 0x30f   : > { %4374 = vmatprep.subr.bf16.mxu0 %v5831_v44  ;;  %v6039_v38 = vcombine.high %v1343_v32, %v1347_v33  ;;  %v1207_v40 = vld [vmem:[%s7188_s22 + $0x288] sm:$0xff]  ;;  %v6038_v44 = vcombine.low %v1343_v32, %v1347_v33 }
 0x310   : > { %4414 = vmatpush1.bf16.msra.mxu1 %v5966_v43  ;;  %v1211_v41 = vld [vmem:[%s7188_s22 + $0x2a8] sm:$0xff]  ;;  %v5910_v43 = vcombine.low %v1215_v30, %v1219_v31 }
 0x311   : > { %4415 = vmatprep.subr.bf16.mxu1 %v5959_v47  ;;  %v1335_v42 = vld [vmem:[%s7188_s22 + $0x688] sm:$0xff]  ;;  %v5903_v47 = vcombine.high %v1207_v40, %v1211_v41 }
 0x312   : > { %4375 = vmatpush1.bf16.msra.mxu0 %v5830_v52  ;;  %v1339_v3 = vld [vmem:[%s7188_s22 + $0x6a8] sm:$0xff] }
 0x313   : > { %4376 = vmatprep.subr.bf16.mxu0 %v5823_v54  ;;  %v6031_v8 = vcombine.high %v1335_v42, %v1339_v3  ;;  %v1199_v49 = vld [vmem:[%s7188_s22 + $0x248] sm:$0xff]  ;;  %v6030_v54 = vcombine.low %v1335_v42, %v1339_v3 }
 0x314   : > { %4416 = vmatpush1.bf16.msra.mxu1 %v5958_v53  ;;  %v1203_v50 = vld [vmem:[%s7188_s22 + $0x268] sm:$0xff]  ;;  %v5902_v53 = vcombine.low %v1207_v40, %v1211_v41 }
 0x315   : > { %4417 = vmatprep.subr.bf16.mxu1 %v5951_v55  ;;  %v1327_v51 = vld [vmem:[%s7188_s22 + $0x648] sm:$0xff]  ;;  %v5895_v55 = vcombine.high %v1199_v49, %v1203_v50 }
 0x316   : > { %4377 = vmatpush1.bf16.msra.mxu0 %v5822_v63  ;;  %v1331_v52 = vld [vmem:[%s7188_s22 + $0x668] sm:$0xff] }
 0x317   : > { %4378 = vmatprep.subr.bf16.mxu0 %v5943_v1  ;;  %v6023_v56 = vcombine.high %v1327_v51, %v1331_v52  ;;  %v1191_v59 = vld [vmem:[%s7188_s22 + $0x208] sm:$0xff]  ;;  %v6022_v1 = vcombine.low %v1327_v51, %v1331_v52 }
 0x318   : > { %4418 = vmatpush1.bf16.msra.mxu1 %v5950_v0  ;;  %v1195_v60 = vld [vmem:[%s7188_s22 + $0x228] sm:$0xff]  ;;  %v5894_v0 = vcombine.low %v1199_v49, %v1203_v50 }
 0x319   : > { %4419 = vmatprep.subr.bf16.mxu1 %v6071_v2  ;;  %v1319_v62 = vld [vmem:[%s7188_s22 + $0x608] sm:$0xff]  ;;  %v5887_v2 = vcombine.high %v1191_v59, %v1195_v60 }
 0x31a   : > { %4379 = vmatpush2.bf16.msra.mxu0 %v5942_v6  ;;  %v1323_v63 = vld [vmem:[%s7188_s22 + $0x628] sm:$0xff] }
 0x31b   : > { %4380 = vmatprep.subr.bf16.mxu0 %v5935_v46  ;;  %v6015_v24 = vcombine.high %v1319_v62, %v1323_v63  ;;  %v1439_v4 = vld [vmem:[%s7188_s22 + $0x9c8] sm:$0xff]  ;;  %v6014_v46 = vcombine.low %v1319_v62, %v1323_v63 }
 0x31c   : > { %4420 = vmatpush2.bf16.msra.mxu1 %v6070_v7  ;;  %v1443_v5 = vld [vmem:[%s7188_s22 + $0x9e8] sm:$0xff]  ;;  %v5886_v7 = vcombine.low %v1191_v59, %v1195_v60 }
 0x31d   : > { %4421 = vmatprep.subr.bf16.mxu1 %v6063_v9  ;;  %v1567_v27 = vld [vmem:[%s7188_s22 + $0xdc8] sm:$0xff]  ;;  %v6135_v9 = vcombine.high %v1439_v4, %v1443_v5 }
 0x31e   : > { %4381 = vmatpush2.bf16.msra.mxu0 %v5934_v15  ;;  %v1571_v6 = vld [vmem:[%s7188_s22 + $0xde8] sm:$0xff] }
 0x31f   : > { %4382 = vmatprep.subr.bf16.mxu0 %v5927_v17  ;;  %v6263_v10 = vcombine.high %v1567_v27, %v1571_v6  ;;  %v1431_v11 = vld [vmem:[%s7188_s22 + $0x988] sm:$0xff]  ;;  %v6262_v17 = vcombine.low %v1567_v27, %v1571_v6 }
 0x320   : > { %4422 = vmatpush2.bf16.msra.mxu1 %v6062_v16  ;;  %v1435_v12 = vld [vmem:[%s7188_s22 + $0x9a8] sm:$0xff]  ;;  %v6134_v16 = vcombine.low %v1439_v4, %v1443_v5 }
 0x321   : > { %4423 = vmatprep.subr.bf16.mxu1 %v6055_v18  ;;  %v1559_v13 = vld [vmem:[%s7188_s22 + $0xd88] sm:$0xff]  ;;  %v6127_v18 = vcombine.high %v1431_v11, %v1435_v12 }
 0x322   : > { %4383 = vmatpush2.bf16.msra.mxu0 %v5926_v25  ;;  %v1563_v15 = vld [vmem:[%s7188_s22 + $0xda8] sm:$0xff] }
 0x323   : > { %4384 = vmatprep.subr.bf16.mxu0 %v5919_v28  ;;  %v6255_v20 = vcombine.high %v1559_v13, %v1563_v15  ;;  %v1423_v21 = vld [vmem:[%s7188_s22 + $0x948] sm:$0xff]  ;;  %v6254_v28 = vcombine.low %v1559_v13, %v1563_v15 }
 0x324   : > { %4424 = vmatpush2.bf16.msra.mxu1 %v6054_v26  ;;  %v1427_v22 = vld [vmem:[%s7188_s22 + $0x968] sm:$0xff]  ;;  %v6126_v26 = vcombine.low %v1431_v11, %v1435_v12 }
 0x325   : > { %4425 = vmatprep.subr.bf16.mxu1 %v6047_v29  ;;  %v1551_v23 = vld [vmem:[%s7188_s22 + $0xd48] sm:$0xff]  ;;  %v6119_v29 = vcombine.high %v1423_v21, %v1427_v22 }
 0x326   : > { %4385 = vmatpush2.bf16.msra.mxu0 %v5918_v34  ;;  %v1555_v25 = vld [vmem:[%s7188_s22 + $0xd68] sm:$0xff] }
 0x327   : > { %4386 = vmatprep.subr.bf16.mxu0 %v5911_v37  ;;  %v6247_v30 = vcombine.high %v1551_v23, %v1555_v25  ;;  %v1415_v31 = vld [vmem:[%s7188_s22 + $0x908] sm:$0xff]  ;;  %v6246_v37 = vcombine.low %v1551_v23, %v1555_v25 }
 0x328   : > { %4426 = vmatpush2.bf16.msra.mxu1 %v6046_v36  ;;  %v1419_v32 = vld [vmem:[%s7188_s22 + $0x928] sm:$0xff]  ;;  %v6118_v36 = vcombine.low %v1423_v21, %v1427_v22 }
 0x329   : > { %4427 = vmatprep.subr.bf16.mxu1 %v6039_v38  ;;  %v1543_v33 = vld [vmem:[%s7188_s22 + $0xd08] sm:$0xff]  ;;  %v6111_v38 = vcombine.high %v1415_v31, %v1419_v32 }
 0x32a   : > { %4387 = vmatpush2.bf16.msra.mxu0 %v5910_v43  ;;  %v1547_v34 = vld [vmem:[%s7188_s22 + $0xd28] sm:$0xff] }
 0x32b   : > { %4388 = vmatprep.subr.bf16.mxu0 %v5903_v47  ;;  %v6239_v40 = vcombine.high %v1543_v33, %v1547_v34  ;;  %v1407_v41 = vld [vmem:[%s7188_s22 + $0x8c8] sm:$0xff]  ;;  %v6238_v47 = vcombine.low %v1543_v33, %v1547_v34 }
 0x32c   : > { %4428 = vmatpush2.bf16.msra.mxu1 %v6038_v44  ;;  %v1411_v42 = vld [vmem:[%s7188_s22 + $0x8e8] sm:$0xff]  ;;  %v6110_v44 = vcombine.low %v1415_v31, %v1419_v32 }
 0x32d   : > { %4429 = vmatprep.subr.bf16.mxu1 %v6031_v8  ;;  %v1535_v3 = vld [vmem:[%s7188_s22 + $0xcc8] sm:$0xff]  ;;  %v6103_v8 = vcombine.high %v1407_v41, %v1411_v42 }
 0x32e   : > { %4389 = vmatpush2.bf16.msra.mxu0 %v5902_v53  ;;  %v1539_v43 = vld [vmem:[%s7188_s22 + $0xce8] sm:$0xff] }
 0x32f   : > { %4390 = vmatprep.subr.bf16.mxu0 %v5895_v55  ;;  %v6231_v49 = vcombine.high %v1535_v3, %v1539_v43  ;;  %v1399_v50 = vld [vmem:[%s7188_s22 + $0x888] sm:$0xff]  ;;  %v6230_v55 = vcombine.low %v1535_v3, %v1539_v43 }
 0x330   : > { %4430 = vmatpush2.bf16.msra.mxu1 %v6030_v54  ;;  %v1403_v51 = vld [vmem:[%s7188_s22 + $0x8a8] sm:$0xff]  ;;  %v6102_v54 = vcombine.low %v1407_v41, %v1411_v42 }
 0x331   : > { %4431 = vmatprep.subr.bf16.mxu1 %v6023_v56  ;;  %v1527_v52 = vld [vmem:[%s7188_s22 + $0xc88] sm:$0xff]  ;;  %v6095_v56 = vcombine.high %v1399_v50, %v1403_v51 }
 0x332   : > { %4391 = vmatpush2.bf16.msra.mxu0 %v5894_v0  ;;  %v1531_v53 = vld [vmem:[%s7188_s22 + $0xca8] sm:$0xff] }
 0x333   : > { %4392 = vmatprep.subr.bf16.mxu0 %v5887_v2  ;;  %v6223_v59 = vcombine.high %v1527_v52, %v1531_v53  ;;  %v1391_v60 = vld [vmem:[%s7188_s22 + $0x848] sm:$0xff]  ;;  %v6222_v2 = vcombine.low %v1527_v52, %v1531_v53 }
 0x334   : > { %4432 = vmatpush2.bf16.msra.mxu1 %v6022_v1  ;;  %v1395_v62 = vld [vmem:[%s7188_s22 + $0x868] sm:$0xff]  ;;  %v6094_v1 = vcombine.low %v1399_v50, %v1403_v51 }
 0x335   : > { %4433 = vmatprep.subr.bf16.mxu1 %v6015_v24  ;;  %v1519_v63 = vld [vmem:[%s7188_s22 + $0xc48] sm:$0xff]  ;;  %v6087_v24 = vcombine.high %v1391_v60, %v1395_v62 }
 0x336   : > { %4393 = vmatpush2.bf16.msra.mxu0 %v5886_v7  ;;  %v1523_v0 = vld [vmem:[%s7188_s22 + $0xc68] sm:$0xff] }
 0x337   : > { %4444 = vmatprep.subr.bf16.mxu0 %v6135_v9  ;;  %v6215_v4 = vcombine.high %v1519_v63, %v1523_v0  ;;  %v1383_v5 = vld [vmem:[%s7188_s22 + $0x808] sm:$0xff]  ;;  %v6214_v9 = vcombine.low %v1519_v63, %v1523_v0 }
 0x338   : > { %4434 = vmatpush2.bf16.msra.mxu1 %v6014_v46  ;;  %v1387_v27 = vld [vmem:[%s7188_s22 + $0x828] sm:$0xff]  ;;  %v6086_v46 = vcombine.low %v1391_v60, %v1395_v62 }
 0x339   : > { %4485 = vmatprep.subr.bf16.mxu1 %v6263_v10  ;;  %4395 = vmatmul.mubr.bf16.vlgmr.msra.gmra.mxu0 %v7540_v35  ;;  %v1511_v6 = vld [vmem:[%s7188_s22 + $0xc08] sm:$0xff]  ;;  %v6079_v10 = vcombine.high %v1383_v5, %v1387_v27 }
 0x33a   : > { %4445 = vmatpush1.bf16.msra.mxu0 %v6134_v16  ;;  %4476 = vmatprep.mubr.bf16.mxu0 %v7552_v45  ;;  %v1515_v7 = vld [vmem:[%s7188_s22 + $0xc28] sm:$0xff] }
 0x33b   : > { %4436 = vmatmul.mubr.bf16.vlgmr.msra.gmra.mxu1 %v7548_v39  ;;  %4446 = vmatprep.subr.bf16.mxu0 %v6127_v18  ;;  %v6207_v11 = vcombine.high %v1511_v6, %v1515_v7  ;;  %v1503_v12 = vld [vmem:[%s7188_s22 + $0xbc8] sm:$0xff]  ;;  %v6206_v18 = vcombine.low %v1511_v6, %v1515_v7 }
 0x33c   : > { %4486 = vmatpush1.bf16.msra.mxu1 %v6262_v17  ;;  %4517 = vmatprep.mubr.bf16.mxu1 %v7557_v48  ;;  %v1507_v13 = vld [vmem:[%s7188_s22 + $0xbe8] sm:$0xff]  ;;  %v6078_v17 = vcombine.low %v1383_v5, %v1387_v27 }
 0x33d   : > { %4487 = vmatprep.subr.bf16.mxu1 %v6255_v20  ;;  %v1631_v15 = vld [vmem:[%s7188_s22 + $0xfc8] sm:$0xff]  ;;  %v6199_v20 = vcombine.high %v1503_v12, %v1507_v13 }
 0x33e   : > { %4447 = vmatpush1.bf16.msra.mxu0 %v6126_v26  ;;  %v1635_v16 = vld [vmem:[%s7188_s22 + $0xfe8] sm:$0xff] }
 0x33f   : > { %4448 = vmatprep.subr.bf16.mxu0 %v6119_v29  ;;  %v6327_v21 = vcombine.high %v1631_v15, %v1635_v16  ;;  %v1495_v22 = vld [vmem:[%s7188_s22 + $0xb88] sm:$0xff]  ;;  %v6326_v29 = vcombine.low %v1631_v15, %v1635_v16 }
 0x340   : > { %4488 = vmatpush1.bf16.msra.mxu1 %v6254_v28  ;;  %v1499_v23 = vld [vmem:[%s7188_s22 + $0xba8] sm:$0xff]  ;;  %v6198_v28 = vcombine.low %v1503_v12, %v1507_v13 }
 0x341   : > { %4489 = vmatprep.subr.bf16.mxu1 %v6247_v30  ;;  %v1623_v25 = vld [vmem:[%s7188_s22 + $0xf88] sm:$0xff]  ;;  %v6191_v30 = vcombine.high %v1495_v22, %v1499_v23 }
 0x342   : > { %4449 = vmatpush1.bf16.msra.mxu0 %v6118_v36  ;;  %v1627_v26 = vld [vmem:[%s7188_s22 + $0xfa8] sm:$0xff] }
 0x343   : > { %4450 = vmatprep.subr.bf16.mxu0 %v6111_v38  ;;  %v6319_v31 = vcombine.high %v1623_v25, %v1627_v26  ;;  %v1487_v32 = vld [vmem:[%s7188_s22 + $0xb48] sm:$0xff]  ;;  %v6318_v38 = vcombine.low %v1623_v25, %v1627_v26  ;;  %v1188_v25 = vld [vmem:[%s7188_s22 + $0x1f0] sm:$0xff] }
 0x344   : > { %4490 = vmatpush1.bf16.msra.mxu1 %v6246_v37  ;;  %v1491_v33 = vld [vmem:[%s7188_s22 + $0xb68] sm:$0xff]  ;;  %v6190_v37 = vcombine.low %v1495_v22, %v1499_v23  ;;  %v1184_v23 = vld [vmem:[%s7188_s22 + $0x1d0] sm:$0xff] }
 0x345   : > { %4491 = vmatprep.subr.bf16.mxu1 %v6239_v40  ;;  %v1615_v34 = vld [vmem:[%s7188_s22 + $0xf48] sm:$0xff]  ;;  %v6183_v40 = vcombine.high %v1487_v32, %v1491_v33  ;;  %v1312_v26 = vld [vmem:[%s7188_s22 + $0x5d0] sm:$0xff] }
 0x346   : > { %4451 = vmatpush1.bf16.msra.mxu0 %v6110_v44  ;;  %v1619_v36 = vld [vmem:[%s7188_s22 + $0xf68] sm:$0xff] }
 0x347   : > { %4452 = vmatprep.subr.bf16.mxu0 %v6103_v8  ;;  %v6311_v41 = vcombine.high %v1615_v34, %v1619_v36  ;;  %v1479_v42 = vld [vmem:[%s7188_s22 + $0xb08] sm:$0xff]  ;;  %v6310_v8 = vcombine.low %v1615_v34, %v1619_v36  ;;  %v1180_v34 = vld [vmem:[%s7188_s22 + $0x1b0] sm:$0xff] }
 0x348   : > { %4492 = vmatpush1.bf16.msra.mxu1 %v6238_v47  ;;  %v1483_v3 = vld [vmem:[%s7188_s22 + $0xb28] sm:$0xff]  ;;  %v6182_v47 = vcombine.low %v1487_v32, %v1491_v33  ;;  %v1176_v33 = vld [vmem:[%s7188_s22 + $0x190] sm:$0xff] }
 0x349   : > { %4493 = vmatprep.subr.bf16.mxu1 %v6231_v49  ;;  %v1607_v43 = vld [vmem:[%s7188_s22 + $0xf08] sm:$0xff]  ;;  %v6175_v49 = vcombine.high %v1479_v42, %v1483_v3  ;;  %v1304_v36 = vld [vmem:[%s7188_s22 + $0x590] sm:$0xff] }
 0x34a   : > { %4453 = vmatpush1.bf16.msra.mxu0 %v6102_v54  ;;  %v1611_v44 = vld [vmem:[%s7188_s22 + $0xf28] sm:$0xff] }
 0x34b   : > { %4454 = vmatprep.subr.bf16.mxu0 %v6095_v56  ;;  %v6303_v50 = vcombine.high %v1607_v43, %v1611_v44  ;;  %v1471_v51 = vld [vmem:[%s7188_s22 + $0xac8] sm:$0xff]  ;;  %v6302_v56 = vcombine.low %v1607_v43, %v1611_v44  ;;  %v1172_v43 = vld [vmem:[%s7188_s22 + $0x170] sm:$0xff] }
 0x34c   : > { %4494 = vmatpush1.bf16.msra.mxu1 %v6230_v55  ;;  %v1475_v52 = vld [vmem:[%s7188_s22 + $0xae8] sm:$0xff]  ;;  %v6174_v55 = vcombine.low %v1479_v42, %v1483_v3  ;;  %v1168_v3 = vld [vmem:[%s7188_s22 + $0x150] sm:$0xff] }
 0x34d   : > { %4495 = vmatprep.subr.bf16.mxu1 %v6223_v59  ;;  %v1599_v53 = vld [vmem:[%s7188_s22 + $0xec8] sm:$0xff]  ;;  %v6167_v59 = vcombine.high %v1471_v51, %v1475_v52 }
 0x34e   : > { %4455 = vmatpush1.bf16.msra.mxu0 %v6094_v1  ;;  %v1603_v54 = vld [vmem:[%s7188_s22 + $0xee8] sm:$0xff] }
 0x34f   : > { %4456 = vmatprep.subr.bf16.mxu0 %v6087_v24  ;;  %v6295_v60 = vcombine.high %v1599_v53, %v1603_v54  ;;  %v1463_v62 = vld [vmem:[%s7188_s22 + $0xa88] sm:$0xff]  ;;  %v6294_v24 = vcombine.low %v1599_v53, %v1603_v54  ;;  %v5865_v54 = vcombine.high %v1168_v3, %v1172_v43 }
 0x350   : > { %4496 = vmatpush1.bf16.msra.mxu1 %v6222_v2  ;;  %v1467_v63 = vld [vmem:[%s7188_s22 + $0xaa8] sm:$0xff]  ;;  %v6166_v2 = vcombine.low %v1471_v51, %v1475_v52 }
 0x351   : > { %4497 = vmatprep.subr.bf16.mxu1 %v6215_v4  ;;  %v1591_v0 = vld [vmem:[%s7188_s22 + $0xe88] sm:$0xff]  ;;  %v6159_v4 = vcombine.high %v1463_v62, %v1467_v63 }
 0x352   : > { %4457 = vmatpush1.bf16.msra.mxu0 %v6086_v46  ;;  %v1595_v1 = vld [vmem:[%s7188_s22 + $0xea8] sm:$0xff] }
 0x353   : > { %4458 = vmatprep.subr.bf16.mxu0 %v6079_v10  ;;  %v6287_v5 = vcombine.high %v1591_v0, %v1595_v1  ;;  %v1455_v27 = vld [vmem:[%s7188_s22 + $0xa48] sm:$0xff]  ;;  %v6286_v10 = vcombine.low %v1591_v0, %v1595_v1  ;;  %v1288_v0 = vld [vmem:[%s7188_s22 + $0x510] sm:$0xff] }
 0x354   : > { %4498 = vmatpush1.bf16.msra.mxu1 %v6214_v9  ;;  %v1459_v6 = vld [vmem:[%s7188_s22 + $0xa68] sm:$0xff]  ;;  %v6158_v9 = vcombine.low %v1463_v62, %v1467_v63  ;;  %v1292_v1 = vld [vmem:[%s7188_s22 + $0x530] sm:$0xff] }
 0x355   : > { %4499 = vmatprep.subr.bf16.mxu1 %v6207_v11  ;;  %v1583_v7 = vld [vmem:[%s7188_s22 + $0xe48] sm:$0xff]  ;;  %v6151_v11 = vcombine.high %v1455_v27, %v1459_v6 }
 0x356   : > { %4459 = vmatpush1.bf16.msra.mxu0 %v6078_v17  ;;  %v1587_v46 = vld [vmem:[%s7188_s22 + $0xe68] sm:$0xff] }
 0x357   : > { %4460 = vmatprep.subr.bf16.mxu0 %v6199_v20  ;;  %v6279_v12 = vcombine.high %v1583_v7, %v1587_v46  ;;  %v1447_v13 = vld [vmem:[%s7188_s22 + $0xa08] sm:$0xff]  ;;  %v6278_v20 = vcombine.low %v1583_v7, %v1587_v46  ;;  %v5985_v7 = vcombine.high %v1288_v0, %v1292_v1  ;;  %v1152_v46 = vld [vmem:[%s7188_s22 + $0xd0] sm:$0xff] }
 0x358   : > { %4500 = vmatpush1.bf16.msra.mxu1 %v6206_v18  ;;  %v1451_v15 = vld [vmem:[%s7188_s22 + $0xa28] sm:$0xff]  ;;  %v6150_v18 = vcombine.low %v1455_v27, %v1459_v6 }
 0x359   : > { %4501 = vmatprep.subr.bf16.mxu1 %v6327_v21  ;;  %v1575_v16 = vld [vmem:[%s7188_s22 + $0xe08] sm:$0xff]  ;;  %v6143_v21 = vcombine.high %v1447_v13, %v1451_v15 }
 0x35a   : > { %4461 = vmatpush2.bf16.msra.mxu0 %v6198_v28  ;;  %v1579_v17 = vld [vmem:[%s7188_s22 + $0xe28] sm:$0xff]  ;;  %v1316_v28 = vld [vmem:[%s7188_s22 + $0x5f0] sm:$0xff] }
 0x35b   : > { %4462 = vmatprep.subr.bf16.mxu0 %v6191_v30  ;;  %v6271_v22 = vcombine.high %v1575_v16, %v1579_v17  ;;  %v6270_v30 = vcombine.low %v1575_v16, %v1579_v17  ;;  %v6009_v32 = vcombine.high %v1312_v26, %v1316_v28  ;;  %v1144_v17 = vld [vmem:[%s7188_s22 + $0x90] sm:$0xff] }
 0x35c   : > { %4502 = vmatpush2.bf16.msra.mxu1 %v6326_v29  ;;  %v6142_v29 = vcombine.low %v1447_v13, %v1451_v15  ;;  %v5984_v13 = vcombine.low %v1288_v0, %v1292_v1 }
 0x35d   : > { %4503 = vmatprep.subr.bf16.mxu1 %v6319_v31  ;;  %v5881_v31 = vcombine.high %v1184_v23, %v1188_v25 }
 0x35e   : > { %4463 = vmatpush2.bf16.msra.mxu0 %v6190_v37  ;;  %v1308_v37 = vld [vmem:[%s7188_s22 + $0x5b0] sm:$0xff] }
 0x35f   : > { %4464 = vmatprep.subr.bf16.mxu0 %v6183_v40  ;;  %v6008_v40 = vcombine.low %v1312_v26, %v1316_v28  ;;  %v6001_v42 = vcombine.high %v1304_v36, %v1308_v37  ;;  %v6000_v53 = vcombine.low %v1304_v36, %v1308_v37  ;;  %v1136_v28 = vld [vmem:[%s7188_s22 + $0x50] sm:$0xff] }
 0x360   : > { %4504 = vmatpush2.bf16.msra.mxu1 %v6318_v38  ;;  %v5880_v38 = vcombine.low %v1184_v23, %v1188_v25  ;;  %v1128_v37 = vld [vmem:[%s7188_s22 + $0x10] sm:$0xff] }
 0x361   : > { %4505 = vmatprep.subr.bf16.mxu1 %v6311_v41  ;;  %v5873_v41 = vcombine.high %v1176_v33, %v1180_v34 }
 0x362   : > { %4465 = vmatpush2.bf16.msra.mxu0 %v6182_v47  ;;  %v1296_v47 = vld [vmem:[%s7188_s22 + $0x550] sm:$0xff] }
 0x363   : > { %4466 = vmatprep.subr.bf16.mxu0 %v6175_v49 }
 0x364   : > { %4506 = vmatpush2.bf16.msra.mxu1 %v6310_v8  ;;  %v1300_v8 = vld [vmem:[%s7188_s22 + $0x570] sm:$0xff] }
 0x365   : > { %4507 = vmatprep.subr.bf16.mxu1 %v6303_v50  ;;  %v5872_v50 = vcombine.low %v1176_v33, %v1180_v34 }
 0x366   : > { %4467 = vmatpush2.bf16.msra.mxu0 %v6174_v55 }
 0x367   : > { %4468 = vmatprep.subr.bf16.mxu0 %v6167_v59  ;;  %v1160_v59 = vld [vmem:[%s7188_s22 + $0x110] sm:$0xff] }
 0x368   : > { %4508 = vmatpush2.bf16.msra.mxu1 %v6302_v56  ;;  %v5993_v56 = vcombine.high %v1296_v47, %v1300_v8 }
 0x369   : > { %4509 = vmatprep.subr.bf16.mxu1 %v6295_v60  ;;  %v1164_v60 = vld [vmem:[%s7188_s22 + $0x130] sm:$0xff] }
 0x36a   : > { %4469 = vmatpush2.bf16.msra.mxu0 %v6166_v2  ;;  %v5857_v27 = vcombine.high %v1160_v59, %v1164_v60 }
 0x36b   : > { %4470 = vmatprep.subr.bf16.mxu0 %v6159_v4 }
 0x36c   : > { %4510 = vmatpush2.bf16.msra.mxu1 %v6294_v24  ;;  %v5864_v24 = vcombine.low %v1168_v3, %v1172_v43 }
 0x36d   : > { %4511 = vmatprep.subr.bf16.mxu1 %v6287_v5  ;;  %v5992_v5 = vcombine.low %v1296_v47, %v1300_v8  ;;  %v1248_v47 = vld [vmem:[%s7188_s22 + $0x3d0] sm:$0xff] }
 0x36e   : > { %4471 = vmatpush2.bf16.msra.mxu0 %v6158_v9  ;;  %v1156_v9 = vld [vmem:[%s7188_s22 + $0xf0] sm:$0xff] }
 0x36f   : > { %4472 = vmatprep.subr.bf16.mxu0 %v6151_v11  ;;  %v1284_v11 = vld [vmem:[%s7188_s22 + $0x4f0] sm:$0xff]  ;;  %v5849_v15 = vcombine.high %v1152_v46, %v1156_v9 }
 0x370   : > { %4512 = vmatpush2.bf16.msra.mxu1 %v6286_v10  ;;  %v1280_v10 = vld [vmem:[%s7188_s22 + $0x4d0] sm:$0xff] }
 0x371   : > { %4513 = vmatprep.subr.bf16.mxu1 %v6279_v12  ;;  %v5856_v12 = vcombine.low %v1160_v59, %v1164_v60  ;;  %v5977_v16 = vcombine.high %v1280_v10, %v1284_v11  ;;  %v5976_v23 = vcombine.low %v1280_v10, %v1284_v11  ;;  %v1252_v8 = vld [vmem:[%s7188_s22 + $0x3f0] sm:$0xff] }
 0x372   : > { %4473 = vmatpush2.bf16.msra.mxu0 %v6150_v18  ;;  %v1148_v18 = vld [vmem:[%s7188_s22 + $0xb0] sm:$0xff]  ;;  %v5944_v0 = vcombine.low %v1248_v47, %v1252_v8 }
 0x373   : > { %4474 = vmatprep.subr.bf16.mxu0 %v6143_v21  ;;  %v1276_v21 = vld [vmem:[%s7188_s22 + $0x4b0] sm:$0xff]  ;;  %v5841_v25 = vcombine.high %v1144_v17, %v1148_v18 }
 0x374   : > { %4514 = vmatpush2.bf16.msra.mxu1 %v6278_v20  ;;  %v1272_v20 = vld [vmem:[%s7188_s22 + $0x490] sm:$0xff] }
 0x375   : > { %4515 = vmatprep.subr.bf16.mxu1 %v6271_v22  ;;  %v5848_v22 = vcombine.low %v1152_v46, %v1156_v9  ;;  %v5969_v26 = vcombine.high %v1272_v20, %v1276_v21  ;;  %v5968_v33 = vcombine.low %v1272_v20, %v1276_v21  ;;  %v1244_v59 = vld [vmem:[%s7188_s22 + $0x3b0] sm:$0xff] }
 0x376   : > { %4475 = vmatpush2.bf16.msra.mxu0 %v6142_v29  ;;  %v1140_v29 = vld [vmem:[%s7188_s22 + $0x70] sm:$0xff] }
 0x377   : > { %4526 = vmatprep.subr.bf16.mxu0 %v5881_v31  ;;  %v1268_v31 = vld [vmem:[%s7188_s22 + $0x470] sm:$0xff]  ;;  %v5833_v34 = vcombine.high %v1136_v28, %v1140_v29 }
 0x378   : > { %4516 = vmatpush2.bf16.msra.mxu1 %v6270_v30  ;;  %v1264_v30 = vld [vmem:[%s7188_s22 + $0x450] sm:$0xff] }
 0x379   : > { %4567 = vmatprep.subr.bf16.mxu1 %v6009_v32  ;;  %v4232_v44 = vpop.f32.mrf.mxu0  ;;  %4477 = vmatmul.mubr.bf16.vlgmr.msra.gmra.mxu0 %v7622_v58  ;;  %v5840_v32 = vcombine.low %v1144_v17, %v1148_v18  ;;  %v5961_v36 = vcombine.high %v1264_v30, %v1268_v31  ;;  %v5960_v3 = vcombine.low %v1264_v30, %v1268_v31  ;;  %v1368_v60 = vld [vmem:[%s7188_s22 + $0x790] sm:$0xff] }
 0x37a   : > { %4527 = vmatpush1.bf16.msra.mxu0 %v5880_v38  ;;  %4558 = vmatprep.mubr.bf16.mxu0 %v7485_v14  ;;  %v1132_v38 = vld [vmem:[%s7188_s22 + $0x30] sm:$0xff] }
 0x37b   : > { %v4273_v49 = vpop.f32.mrf.mxu1  ;;  %4518 = vmatmul.mubr.bf16.vlgmr.msra.gmra.mxu1 %v7628_v61  ;;  %v4234_v52 = vpop.f32.mrf.mxu0  ;;  %4528 = vmatprep.subr.bf16.mxu0 %v5873_v41  ;;  %v1260_v41 = vld [vmem:[%s7188_s22 + $0x430] sm:$0xff]  ;;  %v5825_v43 = vcombine.high %v1128_v37, %v1132_v38 }
 0x37c   : > { %v7772_v51 = vadd.f32 %v4273_v49, %v4232_v44  ;;  %4568 = vmatpush1.bf16.msra.mxu1 %v6008_v40  ;;  %4599 = vmatprep.mubr.bf16.mxu1 %v7492_v19  ;;  %v1256_v40 = vld [vmem:[%s7188_s22 + $0x410] sm:$0xff] }
 0x37d   : > { %v4275_v55 = vpop.f32.mrf.mxu1  ;;  %4569 = vmatprep.subr.bf16.mxu1 %v6001_v42  ;;  %v4236_v63 = vpop.f32.mrf.mxu0  ;;  %v5832_v42 = vcombine.low %v1136_v28, %v1140_v29  ;;  %v5953_v44 = vcombine.high %v1256_v40, %v1260_v41  ;;  %v1376_v49 = vld [vmem:[%s7188_s22 + $0x7d0] sm:$0xff] }
 0x37e   : > { %v7777_v62 = vadd.f32 %v4275_v55, %v4234_v52  ;;  %4529 = vmatpush1.bf16.msra.mxu0 %v5872_v50  ;;  %v1380_v50 = vld [vmem:[%s7188_s22 + $0x7f0] sm:$0xff]  ;;  %v5824_v52 = vcombine.low %v1128_v37, %v1132_v38 }
 0x37f   : > { %v4277_v2 = vpop.f32.mrf.mxu1  ;;  %v4237_v4 = vpop.f32.mrf.mxu0  ;;  %4530 = vmatprep.subr.bf16.mxu0 %v5865_v54  ;;  %v5945_v54 = vcombine.high %v1248_v47, %v1252_v8  ;;  %v6073_v55 = vcombine.high %v1376_v49, %v1380_v50  ;;  %v1372_v63 = vld [vmem:[%s7188_s22 + $0x7b0] sm:$0xff]  ;;  %v6072_v1 = vcombine.low %v1376_v49, %v1380_v50 }
 0x380   : > { %4570 = vmatpush1.bf16.msra.mxu1 %v6000_v53  ;;  %v5952_v53 = vcombine.low %v1256_v40, %v1260_v41  ;;  %v1232_v4 = vld [vmem:[%s7188_s22 + $0x350] sm:$0xff]  ;;  %v6064_v46 = vcombine.low %v1368_v60, %v1372_v63 }
 0x381   : > { %v4278_v6 = vpop.f32.mrf.mxu1  ;;  %4571 = vmatprep.subr.bf16.mxu1 %v5993_v56  ;;  %v1240_v56 = vld [vmem:[%s7188_s22 + $0x390] sm:$0xff] }
 0x382   : > { %4531 = vmatpush1.bf16.msra.mxu0 %v5864_v24  ;;  %v5937_v2 = vcombine.high %v1240_v56, %v1244_v59  ;;  %v6065_v24 = vcombine.high %v1368_v60, %v1372_v63  ;;  %v1364_v6 = vld [vmem:[%s7188_s22 + $0x770] sm:$0xff] }
 0x383   : > { %4532 = vmatprep.subr.bf16.mxu0 %v5857_v27  ;;  %v1360_v27 = vld [vmem:[%s7188_s22 + $0x750] sm:$0xff] }
 0x384   : > { %4572 = vmatpush1.bf16.msra.mxu1 %v5992_v5  ;;  %v1236_v5 = vld [vmem:[%s7188_s22 + $0x370] sm:$0xff]  ;;  %v6057_v10 = vcombine.high %v1360_v27, %v1364_v6  ;;  %v6056_v17 = vcombine.low %v1360_v27, %v1364_v6 }
 0x385   : > { %4573 = vmatprep.subr.bf16.mxu1 %v5985_v7  ;;  %v5936_v7 = vcombine.low %v1240_v56, %v1244_v59  ;;  %v5929_v9 = vcombine.high %v1232_v4, %v1236_v5  ;;  %v1224_v11 = vld [vmem:[%s7188_s22 + $0x310] sm:$0xff] }
 0x386   : > { %4533 = vmatpush1.bf16.msra.mxu0 %v5856_v12  ;;  %v1228_v12 = vld [vmem:[%s7188_s22 + $0x330] sm:$0xff] }
 0x387   : > { %4534 = vmatprep.subr.bf16.mxu0 %v5849_v15  ;;  %v1356_v15 = vld [vmem:[%s7188_s22 + $0x730] sm:$0xff]  ;;  %v5921_v18 = vcombine.high %v1224_v11, %v1228_v12 }
 0x388   : > { %4574 = vmatpush1.bf16.msra.mxu1 %v5984_v13  ;;  %v1352_v13 = vld [vmem:[%s7188_s22 + $0x710] sm:$0xff] }
 0x389   : > { %4575 = vmatprep.subr.bf16.mxu1 %v5977_v16  ;;  %v5928_v16 = vcombine.low %v1232_v4, %v1236_v5  ;;  %v6049_v20 = vcombine.high %v1352_v13, %v1356_v15  ;;  %v1216_v21 = vld [vmem:[%s7188_s22 + $0x2d0] sm:$0xff]  ;;  %v6048_v28 = vcombine.low %v1352_v13, %v1356_v15 }
 0x38a   : > { %4535 = vmatpush1.bf16.msra.mxu0 %v5848_v22  ;;  %v1220_v22 = vld [vmem:[%s7188_s22 + $0x2f0] sm:$0xff] }
 0x38b   : > { %4536 = vmatprep.subr.bf16.mxu0 %v5841_v25  ;;  %v1348_v25 = vld [vmem:[%s7188_s22 + $0x6f0] sm:$0xff]  ;;  %v5913_v29 = vcombine.high %v1216_v21, %v1220_v22 }
 0x38c   : > { %4576 = vmatpush1.bf16.msra.mxu1 %v5976_v23  ;;  %v1344_v23 = vld [vmem:[%s7188_s22 + $0x6d0] sm:$0xff] }
 0x38d   : > { %4577 = vmatprep.subr.bf16.mxu1 %v5969_v26  ;;  %v5920_v26 = vcombine.low %v1224_v11, %v1228_v12  ;;  %v6041_v30 = vcombine.high %v1344_v23, %v1348_v25  ;;  %v1208_v31 = vld [vmem:[%s7188_s22 + $0x290] sm:$0xff]  ;;  %v6040_v37 = vcombine.low %v1344_v23, %v1348_v25 }
 0x38e   : > { %4537 = vmatpush1.bf16.msra.mxu0 %v5840_v32  ;;  %v1212_v32 = vld [vmem:[%s7188_s22 + $0x2b0] sm:$0xff] }
 0x38f   : > { %4538 = vmatprep.subr.bf16.mxu0 %v5833_v34  ;;  %v1340_v34 = vld [vmem:[%s7188_s22 + $0x6b0] sm:$0xff]  ;;  %v5905_v38 = vcombine.high %v1208_v31, %v1212_v32 }
 0x390   : > { %4578 = vmatpush1.bf16.msra.mxu1 %v5968_v33  ;;  %v1336_v33 = vld [vmem:[%s7188_s22 + $0x690] sm:$0xff] }
 0x391   : > { %4579 = vmatprep.subr.bf16.mxu1 %v5961_v36  ;;  %v5912_v36 = vcombine.low %v1216_v21, %v1220_v22  ;;  %v6033_v40 = vcombine.high %v1336_v33, %v1340_v34  ;;  %v1200_v41 = vld [vmem:[%s7188_s22 + $0x250] sm:$0xff]  ;;  %v6032_v47 = vcombine.low %v1336_v33, %v1340_v34 }
 0x392   : > { %4539 = vmatpush1.bf16.msra.mxu0 %v5832_v42  ;;  %v1204_v42 = vld [vmem:[%s7188_s22 + $0x270] sm:$0xff] }
 0x393   : > { %4540 = vmatprep.subr.bf16.mxu0 %v5825_v43  ;;  %v1332_v43 = vld [vmem:[%s7188_s22 + $0x670] sm:$0xff]  ;;  %v5897_v8 = vcombine.high %v1200_v41, %v1204_v42 }
 0x394   : > { %4580 = vmatpush1.bf16.msra.mxu1 %v5960_v3  ;;  %v1328_v3 = vld [vmem:[%s7188_s22 + $0x650] sm:$0xff] }
 0x395   : > { %4581 = vmatprep.subr.bf16.mxu1 %v5953_v44  ;;  %v5904_v44 = vcombine.low %v1208_v31, %v1212_v32  ;;  %v6025_v49 = vcombine.high %v1328_v3, %v1332_v43  ;;  %v1192_v50 = vld [vmem:[%s7188_s22 + $0x210] sm:$0xff]  ;;  %v6024_v56 = vcombine.low %v1328_v3, %v1332_v43 }
 0x396   : > { %4541 = vmatpush1.bf16.msra.mxu0 %v5824_v52  ;;  %v1196_v52 = vld [vmem:[%s7188_s22 + $0x230] sm:$0xff] }
 0x397   : > { %4542 = vmatprep.subr.bf16.mxu0 %v5945_v54  ;;  %v1324_v54 = vld [vmem:[%s7188_s22 + $0x630] sm:$0xff]  ;;  %v5889_v59 = vcombine.high %v1192_v50, %v1196_v52 }
 0x398   : > { %4582 = vmatpush1.bf16.msra.mxu1 %v5952_v53  ;;  %v1320_v53 = vld [vmem:[%s7188_s22 + $0x610] sm:$0xff] }
 0x399   : > { %4583 = vmatprep.subr.bf16.mxu1 %v6073_v55  ;;  %v5896_v55 = vcombine.low %v1200_v41, %v1204_v42  ;;  %v6017_v60 = vcombine.high %v1320_v53, %v1324_v54  ;;  %v1440_v63 = vld [vmem:[%s7188_s22 + $0x9d0] sm:$0xff]  ;;  %v6016_v4 = vcombine.low %v1320_v53, %v1324_v54 }
 0x39a   : > { %4543 = vmatpush2.bf16.msra.mxu0 %v5944_v0  ;;  %v1444_v0 = vld [vmem:[%s7188_s22 + $0x9f0] sm:$0xff] }
 0x39b   : > { %4544 = vmatprep.subr.bf16.mxu0 %v5937_v2  ;;  %v1572_v2 = vld [vmem:[%s7188_s22 + $0xdf0] sm:$0xff]  ;;  %v6137_v5 = vcombine.high %v1440_v63, %v1444_v0 }
 0x39c   : > { %4584 = vmatpush2.bf16.msra.mxu1 %v6072_v1  ;;  %v1568_v1 = vld [vmem:[%s7188_s22 + $0xdd0] sm:$0xff] }
 0x39d   : > { %4585 = vmatprep.subr.bf16.mxu1 %v6065_v24  ;;  %v5888_v24 = vcombine.low %v1192_v50, %v1196_v52  ;;  %v6265_v27 = vcombine.high %v1568_v1, %v1572_v2  ;;  %v1432_v6 = vld [vmem:[%s7188_s22 + $0x990] sm:$0xff]  ;;  %v6264_v11 = vcombine.low %v1568_v1, %v1572_v2 }
 0x39e   : > { %4545 = vmatpush2.bf16.msra.mxu0 %v5936_v7  ;;  %v1436_v7 = vld [vmem:[%s7188_s22 + $0x9b0] sm:$0xff] }
 0x39f   : > { %4546 = vmatprep.subr.bf16.mxu0 %v5929_v9  ;;  %v1564_v9 = vld [vmem:[%s7188_s22 + $0xdb0] sm:$0xff]  ;;  %v6129_v12 = vcombine.high %v1432_v6, %v1436_v7  ;;  %v6128_v23 = vcombine.low %v1432_v6, %v1436_v7 }
 0x3a0   : > { %4586 = vmatpush2.bf16.msra.mxu1 %v6064_v46  ;;  %v1560_v46 = vld [vmem:[%s7188_s22 + $0xd90] sm:$0xff] }
 0x3a1   : > { %4587 = vmatprep.subr.bf16.mxu1 %v6057_v10  ;;  %v6136_v10 = vcombine.low %v1440_v63, %v1444_v0  ;;  %v6257_v13 = vcombine.high %v1560_v46, %v1564_v9  ;;  %v1424_v15 = vld [vmem:[%s7188_s22 + $0x950] sm:$0xff] }
 0x3a2   : > { %4547 = vmatpush2.bf16.msra.mxu0 %v5928_v16  ;;  %v1428_v16 = vld [vmem:[%s7188_s22 + $0x970] sm:$0xff] }
 0x3a3   : > { %4548 = vmatprep.subr.bf16.mxu0 %v5921_v18  ;;  %v1552_v18 = vld [vmem:[%s7188_s22 + $0xd50] sm:$0xff] }
 0x3a4   : > { %4588 = vmatpush2.bf16.msra.mxu1 %v6056_v17  ;;  %v1416_v32 = vld [vmem:[%s7188_s22 + $0x910] sm:$0xff] }
 0x3a5   : > { %4589 = vmatprep.subr.bf16.mxu1 %v6049_v20  ;;  %v1556_v20 = vld [vmem:[%s7188_s22 + $0xd70] sm:$0xff] }
 0x3a6   : > { %4549 = vmatpush2.bf16.msra.mxu0 %v5920_v26  ;;  %v6256_v26 = vcombine.low %v1560_v46, %v1564_v9  ;;  %v1420_v33 = vld [vmem:[%s7188_s22 + $0x930] sm:$0xff]  ;;  %v6248_v42 = vcombine.low %v1552_v18, %v1556_v20 }
 0x3a7   : > { %4550 = vmatprep.subr.bf16.mxu0 %v5913_v29  ;;  %v6113_v3 = vcombine.high %v1416_v32, %v1420_v33  ;;  %v1536_v50 = vld [vmem:[%s7188_s22 + $0xcd0] sm:$0xff]  ;;  %v6112_v53 = vcombine.low %v1416_v32, %v1420_v33 }
 0x3a8   : > { %4590 = vmatpush2.bf16.msra.mxu1 %v6048_v28  ;;  %v6121_v28 = vcombine.high %v1424_v15, %v1428_v16  ;;  %v1540_v52 = vld [vmem:[%s7188_s22 + $0xcf0] sm:$0xff] }
 0x3a9   : > { %4591 = vmatprep.subr.bf16.mxu1 %v6041_v30  ;;  %v1528_v63 = vld [vmem:[%s7188_s22 + $0xc90] sm:$0xff]  ;;  %v6232_v2 = vcombine.low %v1536_v50, %v1540_v52 }
 0x3aa   : > { %4551 = vmatpush2.bf16.msra.mxu0 %v5912_v36  ;;  %v1544_v36 = vld [vmem:[%s7188_s22 + $0xd10] sm:$0xff] }
 0x3ab   : > { %4552 = vmatprep.subr.bf16.mxu0 %v5905_v38  ;;  %v1532_v0 = vld [vmem:[%s7188_s22 + $0xcb0] sm:$0xff] }
 0x3ac   : > { %4592 = vmatpush2.bf16.msra.mxu1 %v6040_v37  ;;  %v1548_v37 = vld [vmem:[%s7188_s22 + $0xd30] sm:$0xff]  ;;  %v6224_v9 = vcombine.low %v1528_v63, %v1532_v0 }
 0x3ad   : > { %4593 = vmatprep.subr.bf16.mxu1 %v6033_v40  ;;  %v6240_v54 = vcombine.low %v1544_v36, %v1548_v37  ;;  %v1520_v6 = vld [vmem:[%s7188_s22 + $0xc50] sm:$0xff] }
 0x3ae   : > { %4553 = vmatpush2.bf16.msra.mxu0 %v5904_v44  ;;  %v1524_v7 = vld [vmem:[%s7188_s22 + $0xc70] sm:$0xff] }
 0x3af   : > { %4554 = vmatprep.subr.bf16.mxu0 %v5897_v8  ;;  %v1408_v8 = vld [vmem:[%s7188_s22 + $0x8d0] sm:$0xff] }
 0x3b0   : > { %4594 = vmatpush2.bf16.msra.mxu1 %v6032_v47  ;;  %v6241_v47 = vcombine.high %v1544_v36, %v1548_v37  ;;  %v1496_v32 = vld [vmem:[%s7188_s22 + $0xb90] sm:$0xff] }
 0x3b1   : > { %4595 = vmatprep.subr.bf16.mxu1 %v6025_v49  ;;  %v1412_v49 = vld [vmem:[%s7188_s22 + $0x8f0] sm:$0xff] }
 0x3b2   : > { %4555 = vmatpush2.bf16.msra.mxu0 %v5896_v55  ;;  %v6105_v55 = vcombine.high %v1408_v8, %v1412_v49  ;;  %v6104_v1 = vcombine.low %v1408_v8, %v1412_v49  ;;  %v1500_v33 = vld [vmem:[%s7188_s22 + $0xbb0] sm:$0xff] }
 0x3b3   : > { %4556 = vmatprep.subr.bf16.mxu0 %v5889_v59  ;;  %v1400_v59 = vld [vmem:[%s7188_s22 + $0x890] sm:$0xff]  ;;  %v6192_v8 = vcombine.low %v1496_v32, %v1500_v33 }
 0x3b4   : > { %4596 = vmatpush2.bf16.msra.mxu1 %v6024_v56  ;;  %v6233_v56 = vcombine.high %v1536_v50, %v1540_v52  ;;  %v1628_v36 = vld [vmem:[%s7188_s22 + $0xfb0] sm:$0xff] }
 0x3b5   : > { %4597 = vmatprep.subr.bf16.mxu1 %v6017_v60  ;;  %v1404_v60 = vld [vmem:[%s7188_s22 + $0x8b0] sm:$0xff] }
 0x3b6   : > { %4557 = vmatpush2.bf16.msra.mxu0 %v5888_v24  ;;  %v6097_v24 = vcombine.high %v1400_v59, %v1404_v60  ;;  %v6096_v46 = vcombine.low %v1400_v59, %v1404_v60 }
 0x3b7   : > { %4608 = vmatprep.subr.bf16.mxu0 %v6137_v5  ;;  %v1392_v5 = vld [vmem:[%s7188_s22 + $0x850] sm:$0xff] }
 0x3b8   : > { %4598 = vmatpush2.bf16.msra.mxu1 %v6016_v4  ;;  %v6225_v4 = vcombine.high %v1528_v63, %v1532_v0 }
 0x3b9   : > { %4649 = vmatprep.subr.bf16.mxu1 %v6265_v27  ;;  %v4314_v17 = vpop.f32.mrf.mxu0  ;;  %4559 = vmatmul.mubr.bf16.vlgmr.msra.gmra.mxu0 %v7540_v35  ;;  %v1396_v27 = vld [vmem:[%s7188_s22 + $0x870] sm:$0xff] }
 0x3ba   : > { %v4315_v21 = vadd.f32 %v4314_v17, %v7772_v51  ;;  %4609 = vmatpush1.bf16.msra.mxu0 %v6136_v10  ;;  %v6249_v51 = vcombine.high %v1552_v18, %v1556_v20  ;;  %4640 = vmatprep.mubr.bf16.mxu0 %v7552_v45  ;;  %v6089_v10 = vcombine.high %v1392_v5, %v1396_v27 }
 0x3bb   : > { %v4355_v22 = vpop.f32.mrf.mxu1  ;;  %4600 = vmatmul.mubr.bf16.vlgmr.msra.gmra.mxu1 %v7548_v39  ;;  %v4316_v25 = vpop.f32.mrf.mxu0  ;;  %4610 = vmatprep.subr.bf16.mxu0 %v6129_v12  ;;  %v1384_v12 = vld [vmem:[%s7188_s22 + $0x810] sm:$0xff]  ;;  %v6088_v17 = vcombine.low %v1392_v5, %v1396_v27  ;;  %v6216_v18 = vcombine.low %v1520_v6, %v1524_v7 }
 0x3bc   : > { %4650 = vmatpush1.bf16.msra.mxu1 %v6264_v11  ;;  %v7845_v29 = vadd.f32 %v4355_v22, %v4315_v21  ;;  %v4317_v30 = vadd.f32 %v4316_v25, %v7777_v62  ;;  %4681 = vmatprep.mubr.bf16.mxu1 %v7557_v48  ;;  %v6120_v62 = vcombine.low %v1424_v15, %v1428_v16  ;;  %v1512_v15 = vld [vmem:[%s7188_s22 + $0xc10] sm:$0xff] }
 0x3bd   : > { %v4357_v31 = vpop.f32.mrf.mxu1  ;;  %4651 = vmatprep.subr.bf16.mxu1 %v6257_v13  ;;  %v4318_v34 = vpop.f32.mrf.mxu0  ;;  %v6217_v11 = vcombine.high %v1520_v6, %v1524_v7  ;;  %v1388_v13 = vld [vmem:[%s7188_s22 + $0x830] sm:$0xff] }
 0x3be   : > { %v7854_v38 = vadd.f32 %v4357_v31, %v4317_v30  ;;  %4611 = vmatpush1.bf16.msra.mxu0 %v6128_v23  ;;  %v1516_v16 = vld [vmem:[%s7188_s22 + $0xc30] sm:$0xff]  ;;  %v6081_v20 = vcombine.high %v1384_v12, %v1388_v13 }
 0x3bf   : > { %v4359_v40 = vpop.f32.mrf.mxu1  ;;  %v4319_v41 = vpop.f32.mrf.mxu0  ;;  %4612 = vmatprep.subr.bf16.mxu0 %v6121_v28  ;;  %v6209_v21 = vcombine.high %v1512_v15, %v1516_v16  ;;  %v1504_v22 = vld [vmem:[%s7188_s22 + $0xbd0] sm:$0xff]  ;;  %v6080_v28 = vcombine.low %v1384_v12, %v1388_v13  ;;  %v6208_v30 = vcombine.low %v1512_v15, %v1516_v16 }
 0x3c0   : > { %4652 = vmatpush1.bf16.msra.mxu1 %v6256_v26  ;;  %v4862_v43 = vcombine.low %v7845_v29, %v7854_v38  ;;  %v1508_v23 = vld [vmem:[%s7188_s22 + $0xbf0] sm:$0xff]  ;;  %v1529_v29 = vld [vmem:[%s7188_s22 + $0xc98] sm:$0xff] }
 0x3c1   : > { %v4360_v44 = vpop.f32.mrf.mxu1  ;;  %4653 = vmatprep.subr.bf16.mxu1 %v6249_v51  ;;  %v1632_v25 = vld [vmem:[%s7188_s22 + $0xfd0] sm:$0xff]  ;;  %v6201_v31 = vcombine.high %v1504_v22, %v1508_v23  ;;  %v6200_v37 = vcombine.low %v1504_v22, %v1508_v23  ;;  %v1533_v38 = vld [vmem:[%s7188_s22 + $0xcb8] sm:$0xff] }
 0x3c2   : > { %4613 = vmatpush1.bf16.msra.mxu0 %v6120_v62  ;;  %v1636_v26 = vld [vmem:[%s7188_s22 + $0xff0] sm:$0xff]  ;;  %v6193_v62 = vcombine.high %v1496_v32, %v1500_v33 }
 0x3c3   : > { %4614 = vmatprep.subr.bf16.mxu0 %v6113_v3  ;;  %v6329_v51 = vcombine.high %v1632_v25, %v1636_v26  ;;  %v1624_v34 = vld [vmem:[%s7188_s22 + $0xf90] sm:$0xff]  ;;  %v6328_v40 = vcombine.low %v1632_v25, %v1636_v26 }
 0x3c4   : > { %4654 = vmatpush1.bf16.msra.mxu1 %v6248_v42  ;;  %v6321_v41 = vcombine.high %v1624_v34, %v1628_v36  ;;  %v1488_v42 = vld [vmem:[%s7188_s22 + $0xb50] sm:$0xff]  ;;  %v6320_v49 = vcombine.low %v1624_v34, %v1628_v36 }
 0x3c5   : > { %4655 = vmatprep.subr.bf16.mxu1 %v6241_v47  ;;  %v1492_v3 = vld [vmem:[%s7188_s22 + $0xb70] sm:$0xff] }
 0x3c6   : > { %4615 = vmatpush1.bf16.msra.mxu0 %v6112_v53  ;;  %v1616_v44 = vld [vmem:[%s7188_s22 + $0xf50] sm:$0xff]  ;;  %v6185_v50 = vcombine.high %v1488_v42, %v1492_v3  ;;  %v6184_v59 = vcombine.low %v1488_v42, %v1492_v3 }
 0x3c7   : > { %4616 = vmatprep.subr.bf16.mxu0 %v6105_v55  ;;  %v1620_v47 = vld [vmem:[%s7188_s22 + $0xf70] sm:$0xff] }
 0x3c8   : > { %4656 = vmatpush1.bf16.msra.mxu1 %v6240_v54  ;;  %v6313_v52 = vcombine.high %v1616_v44, %v1620_v47  ;;  %v1480_v53 = vld [vmem:[%s7188_s22 + $0xb10] sm:$0xff]  ;;  %v6312_v60 = vcombine.low %v1616_v44, %v1620_v47 }
 0x3c9   : > { %4657 = vmatprep.subr.bf16.mxu1 %v6233_v56  ;;  %v1484_v54 = vld [vmem:[%s7188_s22 + $0xb30] sm:$0xff] }
 0x3ca   : > { %4617 = vmatpush1.bf16.msra.mxu0 %v6104_v1  ;;  %v1608_v55 = vld [vmem:[%s7188_s22 + $0xf10] sm:$0xff]  ;;  %v6177_v63 = vcombine.high %v1480_v53, %v1484_v54  ;;  %v6176_v5 = vcombine.low %v1480_v53, %v1484_v54 }
 0x3cb   : > { %4618 = vmatprep.subr.bf16.mxu0 %v6097_v24  ;;  %v1612_v56 = vld [vmem:[%s7188_s22 + $0xf30] sm:$0xff] }
 0x3cc   : > { %4658 = vmatpush1.bf16.msra.mxu1 %v6232_v2  ;;  %v6305_v0 = vcombine.high %v1608_v55, %v1612_v56  ;;  %v1472_v1 = vld [vmem:[%s7188_s22 + $0xad0] sm:$0xff]  ;;  %v6304_v27 = vcombine.low %v1608_v55, %v1612_v56 }
 0x3cd   : > { %4659 = vmatprep.subr.bf16.mxu1 %v6225_v4  ;;  %v1476_v2 = vld [vmem:[%s7188_s22 + $0xaf0] sm:$0xff] }
 0x3ce   : > { %4619 = vmatpush1.bf16.msra.mxu0 %v6096_v46  ;;  %v1600_v24 = vld [vmem:[%s7188_s22 + $0xed0] sm:$0xff]  ;;  %v6169_v6 = vcombine.high %v1472_v1, %v1476_v2  ;;  %v6168_v12 = vcombine.low %v1472_v1, %v1476_v2  ;;  %v1301_v1 = vld [vmem:[%s7188_s22 + $0x578] sm:$0xff] }
 0x3cf   : > { %4620 = vmatprep.subr.bf16.mxu0 %v6089_v10  ;;  %v1604_v4 = vld [vmem:[%s7188_s22 + $0xef0] sm:$0xff] }
 0x3d0   : > { %4660 = vmatpush1.bf16.msra.mxu1 %v6224_v9  ;;  %v6297_v7 = vcombine.high %v1600_v24, %v1604_v4  ;;  %v1464_v46 = vld [vmem:[%s7188_s22 + $0xa90] sm:$0xff]  ;;  %v6296_v13 = vcombine.low %v1600_v24, %v1604_v4 }
 0x3d1   : > { %4661 = vmatprep.subr.bf16.mxu1 %v6217_v11  ;;  %v1468_v9 = vld [vmem:[%s7188_s22 + $0xab0] sm:$0xff] }
 0x3d2   : > { %4621 = vmatpush1.bf16.msra.mxu0 %v6088_v17  ;;  %v1592_v10 = vld [vmem:[%s7188_s22 + $0xe90] sm:$0xff]  ;;  %v6161_v15 = vcombine.high %v1464_v46, %v1468_v9  ;;  %v6160_v22 = vcombine.low %v1464_v46, %v1468_v9  ;;  %v1161_v46 = vld [vmem:[%s7188_s22 + $0x118] sm:$0xff] }
 0x3d3   : > { %4622 = vmatprep.subr.bf16.mxu0 %v6081_v20  ;;  %v1596_v11 = vld [vmem:[%s7188_s22 + $0xeb0] sm:$0xff]  ;;  %v1165_v9 = vld [vmem:[%s7188_s22 + $0x138] sm:$0xff] }
 0x3d4   : > { %4662 = vmatpush1.bf16.msra.mxu1 %v6216_v18  ;;  %v6289_v16 = vcombine.high %v1592_v10, %v1596_v11  ;;  %v1456_v17 = vld [vmem:[%s7188_s22 + $0xa50] sm:$0xff]  ;;  %v6288_v23 = vcombine.low %v1592_v10, %v1596_v11  ;;  %v1289_v11 = vld [vmem:[%s7188_s22 + $0x518] sm:$0xff] }
 0x3d5   : > { %4663 = vmatprep.subr.bf16.mxu1 %v6209_v21  ;;  %v1460_v18 = vld [vmem:[%s7188_s22 + $0xa70] sm:$0xff] }
 0x3d6   : > { %4623 = vmatpush1.bf16.msra.mxu0 %v6080_v28  ;;  %v1584_v20 = vld [vmem:[%s7188_s22 + $0xe50] sm:$0xff]  ;;  %v6153_v25 = vcombine.high %v1456_v17, %v1460_v18  ;;  %v6152_v32 = vcombine.low %v1456_v17, %v1460_v18  ;;  %v5859_v18 = vcombine.high %v1161_v46, %v1165_v9 }
 0x3d7   : > { %4624 = vmatprep.subr.bf16.mxu0 %v6201_v31  ;;  %v1588_v21 = vld [vmem:[%s7188_s22 + $0xe70] sm:$0xff] }
 0x3d8   : > { %4664 = vmatpush1.bf16.msra.mxu1 %v6208_v30  ;;  %v6281_v26 = vcombine.high %v1584_v20, %v1588_v21  ;;  %v1448_v28 = vld [vmem:[%s7188_s22 + $0xa10] sm:$0xff]  ;;  %v6280_v33 = vcombine.low %v1584_v20, %v1588_v21  ;;  %v1153_v21 = vld [vmem:[%s7188_s22 + $0xd8] sm:$0xff] }
 0x3d9   : > { %4665 = vmatprep.subr.bf16.mxu1 %v6329_v51  ;;  %v1452_v30 = vld [vmem:[%s7188_s22 + $0xa30] sm:$0xff] }
 0x3da   : > { %4625 = vmatpush2.bf16.msra.mxu0 %v6200_v37  ;;  %v1576_v31 = vld [vmem:[%s7188_s22 + $0xe10] sm:$0xff]  ;;  %v6145_v34 = vcombine.high %v1448_v28, %v1452_v30  ;;  %v1185_v37 = vld [vmem:[%s7188_s22 + $0x1d8] sm:$0xff]  ;;  %v6144_v42 = vcombine.low %v1448_v28, %v1452_v30 }
 0x3db   : > { %4626 = vmatprep.subr.bf16.mxu0 %v6193_v62  ;;  %v1580_v51 = vld [vmem:[%s7188_s22 + $0xe30] sm:$0xff]  ;;  %v1313_v62 = vld [vmem:[%s7188_s22 + $0x5d8] sm:$0xff] }
 0x3dc   : > { %4666 = vmatpush2.bf16.msra.mxu1 %v6328_v40  ;;  %v6273_v36 = vcombine.high %v1576_v31, %v1580_v51  ;;  %v1189_v40 = vld [vmem:[%s7188_s22 + $0x1f8] sm:$0xff]  ;;  %v6272_v3 = vcombine.low %v1576_v31, %v1580_v51 }
 0x3dd   : > { %4667 = vmatprep.subr.bf16.mxu1 %v6321_v41  ;;  %v1317_v41 = vld [vmem:[%s7188_s22 + $0x5f8] sm:$0xff]  ;;  %v5883_v44 = vcombine.high %v1185_v37, %v1189_v40  ;;  %v5882_v53 = vcombine.low %v1185_v37, %v1189_v40 }
 0x3de   : > { %4627 = vmatpush2.bf16.msra.mxu0 %v6192_v8  ;;  %v6011_v47 = vcombine.high %v1313_v62, %v1317_v41  ;;  %v1177_v8 = vld [vmem:[%s7188_s22 + $0x198] sm:$0xff]  ;;  %v6010_v54 = vcombine.low %v1313_v62, %v1317_v41 }
 0x3df   : > { %4628 = vmatprep.subr.bf16.mxu0 %v6185_v50  ;;  %v1305_v50 = vld [vmem:[%s7188_s22 + $0x598] sm:$0xff] }
 0x3e0   : > { %4668 = vmatpush2.bf16.msra.mxu1 %v6320_v49  ;;  %v1181_v49 = vld [vmem:[%s7188_s22 + $0x1b8] sm:$0xff] }
 0x3e1   : > { %4669 = vmatprep.subr.bf16.mxu1 %v6313_v52  ;;  %v1309_v52 = vld [vmem:[%s7188_s22 + $0x5b8] sm:$0xff]  ;;  %v5875_v55 = vcombine.high %v1177_v8, %v1181_v49  ;;  %v5874_v24 = vcombine.low %v1177_v8, %v1181_v49 }
 0x3e2   : > { %4629 = vmatpush2.bf16.msra.mxu0 %v6184_v59  ;;  %v6003_v56 = vcombine.high %v1305_v50, %v1309_v52  ;;  %v1169_v59 = vld [vmem:[%s7188_s22 + $0x158] sm:$0xff] }
 0x3e3   : > { %4630 = vmatprep.subr.bf16.mxu0 %v6177_v63  ;;  %v1145_v31 = vld [vmem:[%s7188_s22 + $0x98] sm:$0xff] }
 0x3e4   : > { %4670 = vmatpush2.bf16.msra.mxu1 %v6312_v60  ;;  %v1173_v60 = vld [vmem:[%s7188_s22 + $0x178] sm:$0xff] }
 0x3e5   : > { %4671 = vmatprep.subr.bf16.mxu1 %v6305_v0  ;;  %v1297_v0 = vld [vmem:[%s7188_s22 + $0x558] sm:$0xff] }
 0x3e6   : > { %4631 = vmatpush2.bf16.msra.mxu0 %v6176_v5  ;;  %v6002_v5 = vcombine.low %v1305_v50, %v1309_v52  ;;  %v5994_v17 = vcombine.low %v1297_v0, %v1301_v1  ;;  %v1149_v51 = vld [vmem:[%s7188_s22 + $0xb8] sm:$0xff] }
 0x3e7   : > { %4632 = vmatprep.subr.bf16.mxu0 %v6169_v6  ;;  %v5843_v37 = vcombine.high %v1145_v31, %v1149_v51  ;;  %v1137_v62 = vld [vmem:[%s7188_s22 + $0x58] sm:$0xff] }
 0x3e8   : > { %4672 = vmatpush2.bf16.msra.mxu1 %v6304_v27  ;;  %v5867_v27 = vcombine.high %v1169_v59, %v1173_v60  ;;  %v1141_v41 = vld [vmem:[%s7188_s22 + $0x78] sm:$0xff] }
 0x3e9   : > { %4673 = vmatprep.subr.bf16.mxu1 %v6297_v7  ;;  %v5995_v7 = vcombine.high %v1297_v0, %v1301_v1  ;;  %v5835_v8 = vcombine.high %v1137_v62, %v1141_v41  ;;  %v1129_v50 = vld [vmem:[%s7188_s22 + $0x18] sm:$0xff] }
 0x3ea   : > { %4633 = vmatpush2.bf16.msra.mxu0 %v6168_v12  ;;  %v1293_v12 = vld [vmem:[%s7188_s22 + $0x538] sm:$0xff] }
 0x3eb   : > { %4634 = vmatprep.subr.bf16.mxu0 %v6161_v15  ;;  %v5866_v15 = vcombine.low %v1169_v59, %v1173_v60  ;;  %v1133_v52 = vld [vmem:[%s7188_s22 + $0x38] sm:$0xff] }
 0x3ec   : > { %4674 = vmatpush2.bf16.msra.mxu1 %v6296_v13  ;;  %v5827_v59 = vcombine.high %v1129_v50, %v1133_v52  ;;  %v1249_v0 = vld [vmem:[%s7188_s22 + $0x3d8] sm:$0xff] }
 0x3ed   : > { %4675 = vmatprep.subr.bf16.mxu1 %v6289_v16  ;;  %v1253_v1 = vld [vmem:[%s7188_s22 + $0x3f8] sm:$0xff] }
 0x3ee   : > { %4635 = vmatpush2.bf16.msra.mxu0 %v6160_v22  ;;  %v1157_v22 = vld [vmem:[%s7188_s22 + $0xf8] sm:$0xff] }
 0x3ef   : > { %4636 = vmatprep.subr.bf16.mxu0 %v6153_v25  ;;  %v1285_v25 = vld [vmem:[%s7188_s22 + $0x4f8] sm:$0xff]  ;;  %v5851_v28 = vcombine.high %v1153_v21, %v1157_v22 }
 0x3f0   : > { %4676 = vmatpush2.bf16.msra.mxu1 %v6288_v23  ;;  %v1281_v23 = vld [vmem:[%s7188_s22 + $0x4d8] sm:$0xff] }
 0x3f1   : > { %4677 = vmatprep.subr.bf16.mxu1 %v6281_v26  ;;  %v5986_v26 = vcombine.low %v1289_v11, %v1293_v12  ;;  %v5979_v30 = vcombine.high %v1281_v23, %v1285_v25 }
 0x3f2   : > { %4637 = vmatpush2.bf16.msra.mxu0 %v6152_v32  ;;  %v1273_v32 = vld [vmem:[%s7188_s22 + $0x498] sm:$0xff] }
 0x3f3   : > { %4638 = vmatprep.subr.bf16.mxu0 %v6145_v34  ;;  %v5850_v34 = vcombine.low %v1153_v21, %v1157_v22  ;;  %v1361_v21 = vld [vmem:[%s7188_s22 + $0x758] sm:$0xff] }
 0x3f4   : > { %4678 = vmatpush2.bf16.msra.mxu1 %v6280_v33  ;;  %v1277_v33 = vld [vmem:[%s7188_s22 + $0x4b8] sm:$0xff] }
 0x3f5   : > { %4679 = vmatprep.subr.bf16.mxu1 %v6273_v36  ;;  %v5978_v36 = vcombine.low %v1281_v23, %v1285_v25  ;;  %v5971_v40 = vcombine.high %v1273_v32, %v1277_v33  ;;  %v1365_v22 = vld [vmem:[%s7188_s22 + $0x778] sm:$0xff] }
 0x3f6   : > { %4639 = vmatpush2.bf16.msra.mxu0 %v6144_v42  ;;  %v1265_v42 = vld [vmem:[%s7188_s22 + $0x458] sm:$0xff] }
 0x3f7   : > { %4690 = vmatprep.subr.bf16.mxu0 %v5883_v44  ;;  %v5842_v44 = vcombine.low %v1145_v31, %v1149_v51  ;;  %v1353_v31 = vld [vmem:[%s7188_s22 + $0x718] sm:$0xff] }
 0x3f8   : > { %4680 = vmatpush2.bf16.msra.mxu1 %v6272_v3  ;;  %v1269_v3 = vld [vmem:[%s7188_s22 + $0x478] sm:$0xff] }
 0x3f9   : > { %4731 = vmatprep.subr.bf16.mxu1 %v6011_v47  ;;  %v7916_v63 = vpop.f32.mrf.mxu0  ;;  %4641 = vmatmul.mubr.bf16.vlgmr.msra.gmra.mxu0 %v7622_v58  ;;  %v5970_v47 = vcombine.low %v1273_v32, %v1277_v33  ;;  %v5963_v49 = vcombine.high %v1265_v42, %v1269_v3  ;;  %v1357_v51 = vld [vmem:[%s7188_s22 + $0x738] sm:$0xff]  ;;  %v6058_v33 = vcombine.low %v1361_v21, %v1365_v22 }
 0x3fa   : > { %4691 = vmatpush1.bf16.msra.mxu0 %v5882_v53  ;;  %4722 = vmatprep.mubr.bf16.mxu0 %v7485_v14  ;;  %v5987_v14 = vcombine.high %v1289_v11, %v1293_v12  ;;  %v1257_v53 = vld [vmem:[%s7188_s22 + $0x418] sm:$0xff] }
 0x3fb   : > { %v7921_v2 = vpop.f32.mrf.mxu1  ;;  %4682 = vmatmul.mubr.bf16.vlgmr.msra.gmra.mxu1 %v7628_v61  ;;  %v7924_v4 = vpop.f32.mrf.mxu0  ;;  %4692 = vmatprep.subr.bf16.mxu0 %v5875_v55  ;;  %v5834_v55 = vcombine.low %v1137_v62, %v1141_v41  ;;  %v1245_v11 = vld [vmem:[%s7188_s22 + $0x3b8] sm:$0xff] }
 0x3fc   : > { %4732 = vmatpush1.bf16.msra.mxu1 %v6010_v54  ;;  %4763 = vmatprep.mubr.bf16.mxu1 %v7492_v19  ;;  %v5858_v19 = vcombine.low %v1161_v46, %v1165_v9  ;;  %v1261_v54 = vld [vmem:[%s7188_s22 + $0x438] sm:$0xff]  ;;  %v5947_v46 = vcombine.high %v1249_v0, %v1253_v1 }
 0x3fd   : > { %v7926_v6 = vpop.f32.mrf.mxu1  ;;  %4733 = vmatprep.subr.bf16.mxu1 %v6003_v56  ;;  %v4400_v10 = vpop.f32.mrf.mxu0  ;;  %v5962_v56 = vcombine.low %v1265_v42, %v1269_v3  ;;  %v5955_v60 = vcombine.high %v1257_v53, %v1261_v54  ;;  %v1369_v12 = vld [vmem:[%s7188_s22 + $0x798] sm:$0xff]  ;;  %v6050_v3 = vcombine.low %v1353_v31, %v1357_v51 }
 0x3fe   : > { %4693 = vmatpush1.bf16.msra.mxu0 %v5874_v24  ;;  %v1377_v24 = vld [vmem:[%s7188_s22 + $0x7d8] sm:$0xff] }
 0x3ff   : > { %v4441_v13 = vpop.f32.mrf.mxu1  ;;  %v4401_v16 = vpop.f32.mrf.mxu0  ;;  %4694 = vmatprep.subr.bf16.mxu0 %v5867_v27  ;;  %v5826_v27 = vcombine.low %v1129_v50, %v1133_v52  ;;  %v1241_v10 = vld [vmem:[%s7188_s22 + $0x398] sm:$0xff] }
 0x400   : > { %4734 = vmatpush1.bf16.msra.mxu1 %v6002_v5  ;;  %v1381_v5 = vld [vmem:[%s7188_s22 + $0x7f8] sm:$0xff]  ;;  %v5938_v23 = vcombine.low %v1241_v10, %v1245_v11 }
 0x401   : > { %v4442_v20 = vpop.f32.mrf.mxu1  ;;  %4735 = vmatprep.subr.bf16.mxu1 %v5995_v7  ;;  %v5954_v7 = vcombine.low %v1257_v53, %v1261_v54  ;;  %v6075_v9 = vcombine.high %v1377_v24, %v1381_v5  ;;  %v1373_v13 = vld [vmem:[%s7188_s22 + $0x7b8] sm:$0xff]  ;;  %v6074_v16 = vcombine.low %v1377_v24, %v1381_v5 }
 0x402   : > { %4695 = vmatpush1.bf16.msra.mxu0 %v5866_v15  ;;  %v5946_v15 = vcombine.low %v1249_v0, %v1253_v1  ;;  %v1233_v20 = vld [vmem:[%s7188_s22 + $0x358] sm:$0xff]  ;;  %v6066_v25 = vcombine.low %v1369_v12, %v1373_v13 }
 0x403   : > { %4696 = vmatprep.subr.bf16.mxu0 %v5859_v18  ;;  %v6067_v18 = vcombine.high %v1369_v12, %v1373_v13  ;;  %v1345_v62 = vld [vmem:[%s7188_s22 + $0x6d8] sm:$0xff] }
 0x404   : > { %4736 = vmatpush1.bf16.msra.mxu1 %v5994_v17  ;;  %v5939_v17 = vcombine.high %v1241_v10, %v1245_v11  ;;  %v1349_v41 = vld [vmem:[%s7188_s22 + $0x6f8] sm:$0xff] }
 0x405   : > { %4737 = vmatprep.subr.bf16.mxu1 %v5987_v14  ;;  %v1237_v14 = vld [vmem:[%s7188_s22 + $0x378] sm:$0xff]  ;;  %v6042_v54 = vcombine.low %v1345_v62, %v1349_v41 }
 0x406   : > { %4697 = vmatpush1.bf16.msra.mxu0 %v5858_v19  ;;  %v5931_v19 = vcombine.high %v1233_v20, %v1237_v14  ;;  %v5930_v32 = vcombine.low %v1233_v20, %v1237_v14  ;;  %v1337_v50 = vld [vmem:[%s7188_s22 + $0x698] sm:$0xff] }
 0x407   : > { %4698 = vmatprep.subr.bf16.mxu0 %v5851_v28  ;;  %v1225_v28 = vld [vmem:[%s7188_s22 + $0x318] sm:$0xff] }
 0x408   : > { %4738 = vmatpush1.bf16.msra.mxu1 %v5986_v26  ;;  %v6059_v26 = vcombine.high %v1361_v21, %v1365_v22  ;;  %v1341_v52 = vld [vmem:[%s7188_s22 + $0x6b8] sm:$0xff] }
 0x409   : > { %4739 = vmatprep.subr.bf16.mxu1 %v5979_v30  ;;  %v1229_v30 = vld [vmem:[%s7188_s22 + $0x338] sm:$0xff]  ;;  %v6034_v5 = vcombine.low %v1337_v50, %v1341_v52 }
 0x40a   : > { %4699 = vmatpush1.bf16.msra.mxu0 %v5850_v34  ;;  %v5923_v34 = vcombine.high %v1225_v28, %v1229_v30  ;;  %v5922_v42 = vcombine.low %v1225_v28, %v1229_v30  ;;  %v1329_v0 = vld [vmem:[%s7188_s22 + $0x658] sm:$0xff] }
 0x40b   : > { %4700 = vmatprep.subr.bf16.mxu0 %v5843_v37  ;;  %v1217_v37 = vld [vmem:[%s7188_s22 + $0x2d8] sm:$0xff] }
 0x40c   : > { %4740 = vmatpush1.bf16.msra.mxu1 %v5978_v36  ;;  %v6051_v36 = vcombine.high %v1353_v31, %v1357_v51  ;;  %v1333_v1 = vld [vmem:[%s7188_s22 + $0x678] sm:$0xff] }
 0x40d   : > { %4741 = vmatprep.subr.bf16.mxu1 %v5971_v40  ;;  %v1221_v40 = vld [vmem:[%s7188_s22 + $0x2f8] sm:$0xff]  ;;  %v6026_v13 = vcombine.low %v1329_v0, %v1333_v1 }
 0x40e   : > { %4701 = vmatpush1.bf16.msra.mxu0 %v5842_v44  ;;  %v5915_v44 = vcombine.high %v1217_v37, %v1221_v40  ;;  %v5914_v53 = vcombine.low %v1217_v37, %v1221_v40  ;;  %v1321_v10 = vld [vmem:[%s7188_s22 + $0x618] sm:$0xff] }
 0x40f   : > { %4702 = vmatprep.subr.bf16.mxu0 %v5835_v8  ;;  %v1209_v8 = vld [vmem:[%s7188_s22 + $0x298] sm:$0xff] }
 0x410   : > { %4742 = vmatpush1.bf16.msra.mxu1 %v5970_v47  ;;  %v6043_v47 = vcombine.high %v1345_v62, %v1349_v41  ;;  %v1325_v11 = vld [vmem:[%s7188_s22 + $0x638] sm:$0xff] }
 0x411   : > { %4743 = vmatprep.subr.bf16.mxu1 %v5963_v49  ;;  %v1213_v49 = vld [vmem:[%s7188_s22 + $0x2b8] sm:$0xff]  ;;  %v6018_v22 = vcombine.low %v1321_v10, %v1325_v11 }
 0x412   : > { %4703 = vmatpush1.bf16.msra.mxu0 %v5834_v55  ;;  %v5907_v55 = vcombine.high %v1209_v8, %v1213_v49  ;;  %v5906_v24 = vcombine.low %v1209_v8, %v1213_v49  ;;  %v1569_v20 = vld [vmem:[%s7188_s22 + $0xdd8] sm:$0xff] }
 0x413   : > { %4704 = vmatprep.subr.bf16.mxu0 %v5827_v59  ;;  %v1201_v59 = vld [vmem:[%s7188_s22 + $0x258] sm:$0xff] }
 0x414   : > { %4744 = vmatpush1.bf16.msra.mxu1 %v5962_v56  ;;  %v6035_v56 = vcombine.high %v1337_v50, %v1341_v52  ;;  %v1573_v14 = vld [vmem:[%s7188_s22 + $0xdf8] sm:$0xff] }
 0x415   : > { %4745 = vmatprep.subr.bf16.mxu1 %v5955_v60  ;;  %v1205_v60 = vld [vmem:[%s7188_s22 + $0x278] sm:$0xff]  ;;  %v6266_v51 = vcombine.low %v1569_v20, %v1573_v14 }
 0x416   : > { %4705 = vmatpush1.bf16.msra.mxu0 %v5826_v27  ;;  %v5899_v27 = vcombine.high %v1201_v59, %v1205_v60  ;;  %v5898_v12 = vcombine.low %v1201_v59, %v1205_v60  ;;  %v1561_v28 = vld [vmem:[%s7188_s22 + $0xd98] sm:$0xff] }
 0x417   : > { %4706 = vmatprep.subr.bf16.mxu0 %v5947_v46  ;;  %v1193_v46 = vld [vmem:[%s7188_s22 + $0x218] sm:$0xff] }
 0x418   : > { %4746 = vmatpush1.bf16.msra.mxu1 %v5954_v7  ;;  %v6027_v7 = vcombine.high %v1329_v0, %v1333_v1  ;;  %v1565_v30 = vld [vmem:[%s7188_s22 + $0xdb8] sm:$0xff] }
 0x419   : > { %4747 = vmatprep.subr.bf16.mxu1 %v6075_v9  ;;  %v1197_v9 = vld [vmem:[%s7188_s22 + $0x238] sm:$0xff] }
 0x41a   : > { %4707 = vmatpush2.bf16.msra.mxu0 %v5946_v15  ;;  %v5891_v15 = vcombine.high %v1193_v46, %v1197_v9  ;;  %v5890_v21 = vcombine.low %v1193_v46, %v1197_v9  ;;  %v1429_v37 = vld [vmem:[%s7188_s22 + $0x978] sm:$0xff]  ;;  %v4870_v9 = vrot.slane %v4862_v43, %v7464_v57 }
 0x41b   : > { %4708 = vmatprep.subr.bf16.mxu0 %v5939_v17  ;;  %v1441_v17 = vld [vmem:[%s7188_s22 + $0x9d8] sm:$0xff] }
 0x41c   : > { %4748 = vmatpush2.bf16.msra.mxu1 %v6074_v16  ;;  %v6019_v16 = vcombine.high %v1321_v10, %v1325_v11  ;;  %v1553_v62 = vld [vmem:[%s7188_s22 + $0xd58] sm:$0xff] }
 0x41d   : > { %4749 = vmatprep.subr.bf16.mxu1 %v6067_v18  ;;  %v1445_v18 = vld [vmem:[%s7188_s22 + $0x9f8] sm:$0xff] }
 0x41e   : > { %4709 = vmatpush2.bf16.msra.mxu0 %v5938_v23  ;;  %v6139_v23 = vcombine.high %v1441_v17, %v1445_v18  ;;  %v6138_v31 = vcombine.low %v1441_v17, %v1445_v18  ;;  %v1557_v41 = vld [vmem:[%s7188_s22 + $0xd78] sm:$0xff] }
 0x41f   : > { %4710 = vmatprep.subr.bf16.mxu0 %v5931_v19  ;;  %v1433_v19 = vld [vmem:[%s7188_s22 + $0x998] sm:$0xff]  ;;  %v6251_v50 = vcombine.high %v1553_v62, %v1557_v41  ;;  %v6250_v0 = vcombine.low %v1553_v62, %v1557_v41 }
 0x420   : > { %4750 = vmatpush2.bf16.msra.mxu1 %v6066_v25  ;;  %v6267_v25 = vcombine.high %v1569_v20, %v1573_v14  ;;  %v1417_v52 = vld [vmem:[%s7188_s22 + $0x918] sm:$0xff] }
 0x421   : > { %4751 = vmatprep.subr.bf16.mxu1 %v6059_v26  ;;  %v1437_v26 = vld [vmem:[%s7188_s22 + $0x9b8] sm:$0xff] }
 0x422   : > { %4711 = vmatpush2.bf16.msra.mxu0 %v5930_v32  ;;  %v6131_v32 = vcombine.high %v1433_v19, %v1437_v26  ;;  %v1541_v46 = vld [vmem:[%s7188_s22 + $0xcf8] sm:$0xff] }
 0x423   : > { %4712 = vmatprep.subr.bf16.mxu0 %v5923_v34  ;;  %v6259_v34 = vcombine.high %v1561_v28, %v1565_v30  ;;  %v1401_v18 = vld [vmem:[%s7188_s22 + $0x898] sm:$0xff] }
 0x424   : > { %4752 = vmatpush2.bf16.msra.mxu1 %v6058_v33  ;;  %v4438_v33 = vadd.f32 %v7921_v2, %v7916_v63  ;;  %v6130_v63 = vcombine.low %v1433_v19, %v1437_v26  ;;  %v1405_v20 = vld [vmem:[%s7188_s22 + $0x8b8] sm:$0xff] }
 0x425   : > { %4753 = vmatprep.subr.bf16.mxu1 %v6051_v36  ;;  %v1425_v36 = vld [vmem:[%s7188_s22 + $0x958] sm:$0xff] }
 0x426   : > { %4713 = vmatpush2.bf16.msra.mxu0 %v5922_v42  ;;  %v4440_v42 = vadd.f32 %v7926_v6, %v7924_v4  ;;  %v1421_v4 = vld [vmem:[%s7188_s22 + $0x938] sm:$0xff]  ;;  %v6122_v59 = vcombine.low %v1425_v36, %v1429_v37 }
 0x427   : > { %4714 = vmatprep.subr.bf16.mxu0 %v5915_v44  ;;  %v6115_v1 = vcombine.high %v1417_v52, %v1421_v4  ;;  %v6114_v11 = vcombine.low %v1417_v52, %v1421_v4  ;;  %v1397_v19 = vld [vmem:[%s7188_s22 + $0x878] sm:$0xff] }
 0x428   : > { %4754 = vmatpush2.bf16.msra.mxu1 %v6050_v3  ;;  %v1521_v26 = vld [vmem:[%s7188_s22 + $0xc58] sm:$0xff] }
 0x429   : > { %4755 = vmatprep.subr.bf16.mxu1 %v6043_v47  ;;  %v6258_v47 = vcombine.low %v1561_v28, %v1565_v30  ;;  %v1525_v28 = vld [vmem:[%s7188_s22 + $0xc78] sm:$0xff]  ;;  %v6098_v30 = vcombine.low %v1401_v18, %v1405_v20 }
 0x42a   : > { %4715 = vmatpush2.bf16.msra.mxu0 %v5914_v53  ;;  %v1545_v53 = vld [vmem:[%s7188_s22 + $0xd18] sm:$0xff]  ;;  %v6218_v62 = vcombine.low %v1521_v26, %v1525_v28 }
 0x42b   : > { %4716 = vmatprep.subr.bf16.mxu0 %v5907_v55  ;;  %v1501_v52 = vld [vmem:[%s7188_s22 + $0xbb8] sm:$0xff] }
 0x42c   : > { %4756 = vmatpush2.bf16.msra.mxu1 %v6042_v54  ;;  %v1625_v4 = vld [vmem:[%s7188_s22 + $0xf98] sm:$0xff] }
 0x42d   : > { %4757 = vmatprep.subr.bf16.mxu1 %v6035_v56 }
 0x42e   : > { %4717 = vmatpush2.bf16.msra.mxu0 %v5906_v24 }
 0x42f   : > { %4718 = vmatprep.subr.bf16.mxu0 %v5899_v27  ;;  %v1409_v27 = vld [vmem:[%s7188_s22 + $0x8d8] sm:$0xff] }
 0x430   : > { %4758 = vmatpush2.bf16.msra.mxu1 %v6034_v5 }
 0x431   : > { %4759 = vmatprep.subr.bf16.mxu1 %v6027_v7  ;;  %v1537_v7 = vld [vmem:[%s7188_s22 + $0xcd8] sm:$0xff] }
 0x432   : > { %4719 = vmatpush2.bf16.msra.mxu0 %v5898_v12  ;;  %v1124_v12 = vld [vmem:[#allocation3] sm:$0xff]  ;;  %v6235_v17 = vcombine.high %v1537_v7, %v1541_v46 }
 0x433   : > { %4720 = vmatprep.subr.bf16.mxu0 %v5891_v15 }
 0x434   : > { %4760 = vmatpush2.bf16.msra.mxu1 %v6026_v13 }
 0x435   : > { %4761 = vmatprep.subr.bf16.mxu1 %v6019_v16 }
 0x436   : > { %4721 = vmatpush2.bf16.msra.mxu0 %v5890_v21  ;;  %v6234_v21 = vcombine.low %v1537_v7, %v1541_v46  ;;  %v1609_v7 = vld [vmem:[%s7188_s22 + $0xf18] sm:$0xff] }
 0x437   : > { %4772 = vmatprep.subr.bf16.mxu0 %v6139_v23  ;;  %v6227_v23 = vcombine.high %v1529_v29, %v1533_v38  ;;  %v1613_v46 = vld [vmem:[%s7188_s22 + $0xf38] sm:$0xff] }
 0x438   : > { %4762 = vmatpush2.bf16.msra.mxu1 %v6018_v22  ;;  %v6099_v22 = vcombine.high %v1401_v18, %v1405_v20  ;;  %v6306_v20 = vcombine.low %v1609_v7, %v1613_v46 }
 0x439   : > { %4813 = vmatprep.subr.bf16.mxu1 %v6267_v25  ;;  %v4478_v40 = vpop.f32.mrf.mxu0  ;;  %4723 = vmatmul.mubr.bf16.vlgmr.msra.gmra.mxu0 %v7540_v35  ;;  %v6123_v35 = vcombine.high %v1425_v36, %v1429_v37  ;;  %v1393_v25 = vld [vmem:[%s7188_s22 + $0x858] sm:$0xff] }
 0x43a   : > { %v4479_v3 = vadd.f32 %v4478_v40, %v4438_v33  ;;  %4773 = vmatpush1.bf16.msra.mxu0 %v6138_v31  ;;  %4804 = vmatprep.mubr.bf16.mxu0 %v7552_v45  ;;  %v6226_v31 = vcombine.low %v1529_v29, %v1533_v38  ;;  %v1385_v33 = vld [vmem:[%s7188_s22 + $0x818] sm:$0xff]  ;;  %v6090_v40 = vcombine.low %v1393_v25, %v1397_v19 }
 0x43b   : > { %v4519_v44 = vpop.f32.mrf.mxu1  ;;  %4764 = vmatmul.mubr.bf16.vlgmr.msra.gmra.mxu1 %v7548_v39  ;;  %v4480_v2 = vpop.f32.mrf.mxu0  ;;  %4774 = vmatprep.subr.bf16.mxu0 %v6131_v32  ;;  %v1549_v39 = vld [vmem:[%s7188_s22 + $0xd38] sm:$0xff]  ;;  %v6219_v32 = vcombine.high %v1521_v26, %v1525_v28 }
 0x43c   : > { %4814 = vmatpush1.bf16.msra.mxu1 %v6266_v51  ;;  %v4481_v8 = vadd.f32 %v4480_v2, %v4440_v42  ;;  %4845 = vmatprep.mubr.bf16.mxu1 %v7557_v48  ;;  %v4520_v54 = vadd.f32 %v4519_v44, %v4479_v3  ;;  %v6243_v5 = vcombine.high %v1545_v53, %v1549_v39  ;;  %v1413_v48 = vld [vmem:[%s7188_s22 + $0x8f8] sm:$0xff] }
 0x43d   : > { %v4521_v49 = vpop.f32.mrf.mxu1  ;;  %4815 = vmatprep.subr.bf16.mxu1 %v6259_v34  ;;  %v4482_v6 = vpop.f32.mrf.mxu0  ;;  %v6242_v13 = vcombine.low %v1545_v53, %v1549_v39  ;;  %v6107_v15 = vcombine.high %v1409_v27, %v1413_v48  ;;  %v6106_v14 = vcombine.low %v1409_v27, %v1413_v48  ;;  %v6091_v51 = vcombine.high %v1393_v25, %v1397_v19  ;;  %v1389_v34 = vld [vmem:[%s7188_s22 + $0x838] sm:$0xff] }
 0x43e   : > { %v4522_v55 = vadd.f32 %v4521_v49, %v4481_v8  ;;  %4775 = vmatpush1.bf16.msra.mxu0 %v6130_v63  ;;  %v1513_v36 = vld [vmem:[%s7188_s22 + $0xc18] sm:$0xff]  ;;  %v6083_v41 = vcombine.high %v1385_v33, %v1389_v34 }
 0x43f   : > { %v4523_v56 = vpop.f32.mrf.mxu1  ;;  %v4483_v60 = vpop.f32.mrf.mxu0  ;;  %4776 = vmatprep.subr.bf16.mxu0 %v6123_v35  ;;  %v1517_v37 = vld [vmem:[%s7188_s22 + $0xc38] sm:$0xff] }
 0x440   : > { %4816 = vmatpush1.bf16.msra.mxu1 %v6258_v47  ;;  %v4863_v45 = vcombine.low %v4520_v54, %v4522_v55  ;;  %v6211_v42 = vcombine.high %v1513_v36, %v1517_v37  ;;  %v1505_v3 = vld [vmem:[%s7188_s22 + $0xbd8] sm:$0xff]  ;;  %v6082_v47 = vcombine.low %v1385_v33, %v1389_v34  ;;  %v6210_v35 = vcombine.low %v1513_v36, %v1517_v37 }
 0x441   : > { %v4524_v24 = vpop.f32.mrf.mxu1  ;;  %4817 = vmatprep.subr.bf16.mxu1 %v6251_v50  ;;  %v1509_v44 = vld [vmem:[%s7188_s22 + $0xbf8] sm:$0xff] }
 0x442   : > { %v4877_v10 = vrot.slane %v4863_v45, %v7464_v57  ;;  %4777 = vmatpush1.bf16.msra.mxu0 %v6122_v59  ;;  %v1633_v63 = vld [vmem:[%s7188_s22 + $0xfd8] sm:$0xff]  ;;  %v6203_v8 = vcombine.high %v1505_v3, %v1509_v44  ;;  %v6202_v53 = vcombine.low %v1505_v3, %v1509_v44 }
 0x443   : > { %4778 = vmatprep.subr.bf16.mxu0 %v6115_v1  ;;  %v1637_v2 = vld [vmem:[%s7188_s22 + $0xff8] sm:$0xff] }
 0x444   : > { %4818 = vmatpush1.bf16.msra.mxu1 %v6250_v0  ;;  %v4878_v16 = vcombine.low %v4870_v9, %v4877_v10  ;;  %v6331_v49 = vcombine.high %v1633_v63, %v1637_v2  ;;  %v1497_v50 = vld [vmem:[%s7188_s22 + $0xb98] sm:$0xff]  ;;  %v6330_v39 = vcombine.low %v1633_v63, %v1637_v2 }
 0x445   : > { %4819 = vmatprep.subr.bf16.mxu1 %v6243_v5  ;;  %v1629_v6 = vld [vmem:[%s7188_s22 + $0xfb8] sm:$0xff]  ;;  %v6195_v54 = vcombine.high %v1497_v50, %v1501_v52  ;;  %v6194_v1 = vcombine.low %v1497_v50, %v1501_v52 }
 0x446   : > { %v4898_v43 = vadd.f32 %v4878_v16, %v1124_v12  ;;  %4779 = vmatpush1.bf16.msra.mxu0 %v6114_v11  ;;  %v6323_v55 = vcombine.high %v1625_v4, %v1629_v6  ;;  %v1489_v56 = vld [vmem:[%s7188_s22 + $0xb58] sm:$0xff]  ;;  %v6322_v45 = vcombine.low %v1625_v4, %v1629_v6  ;;  %v6307_v12 = vcombine.high %v1609_v7, %v1613_v46 }
 0x447   : > { %4780 = vmatprep.subr.bf16.mxu0 %v6107_v15  ;;  %v1493_v59 = vld [vmem:[%s7188_s22 + $0xb78] sm:$0xff] }
 0x448   : > { %4820 = vmatpush1.bf16.msra.mxu1 %v6242_v13  ;;  %4900 = vst [vmem:[#allocation3] sm:$0xff] %v4898_v43  ;;  %v1617_v60 = vld [vmem:[%s7188_s22 + $0xf58] sm:$0xff]  ;;  %v6187_v24 = vcombine.high %v1489_v56, %v1493_v59  ;;  %v6186_v9 = vcombine.low %v1489_v56, %v1493_v59 }
 0x449   : > { %4821 = vmatprep.subr.bf16.mxu1 %v6235_v17  ;;  %v1621_v0 = vld [vmem:[%s7188_s22 + $0xf78] sm:$0xff] }
 0x44a   : > { %4781 = vmatpush1.bf16.msra.mxu0 %v6106_v14  ;;  %v6315_v5 = vcombine.high %v1617_v60, %v1621_v0  ;;  %v1481_v27 = vld [vmem:[%s7188_s22 + $0xb18] sm:$0xff]  ;;  %v6314_v10 = vcombine.low %v1617_v60, %v1621_v0 }
 0x44b   : > { %4782 = vmatprep.subr.bf16.mxu0 %v6099_v22  ;;  %v1485_v48 = vld [vmem:[%s7188_s22 + $0xb38] sm:$0xff] }
 0x44c   : > { %4822 = vmatpush1.bf16.msra.mxu1 %v6234_v21  ;;  %v6179_v11 = vcombine.high %v1481_v27, %v1485_v48  ;;  %v1473_v13 = vld [vmem:[%s7188_s22 + $0xad8] sm:$0xff]  ;;  %v6178_v18 = vcombine.low %v1481_v27, %v1485_v48 }
 0x44d   : > { %4823 = vmatprep.subr.bf16.mxu1 %v6227_v23  ;;  %v1477_v15 = vld [vmem:[%s7188_s22 + $0xaf8] sm:$0xff] }
 0x44e   : > { %4783 = vmatpush1.bf16.msra.mxu0 %v6098_v30  ;;  %v1601_v16 = vld [vmem:[%s7188_s22 + $0xed8] sm:$0xff]  ;;  %v6171_v29 = vcombine.high %v1473_v13, %v1477_v15  ;;  %v6170_v23 = vcombine.low %v1473_v13, %v1477_v15 }
 0x44f   : > { %4784 = vmatprep.subr.bf16.mxu0 %v6091_v51  ;;  %v1605_v17 = vld [vmem:[%s7188_s22 + $0xef8] sm:$0xff] }
 0x450   : > { %4824 = vmatpush1.bf16.msra.mxu1 %v6226_v31  ;;  %v6299_v38 = vcombine.high %v1601_v16, %v1605_v17  ;;  %v1465_v43 = vld [vmem:[%s7188_s22 + $0xa98] sm:$0xff]  ;;  %v6298_v25 = vcombine.low %v1601_v16, %v1605_v17 }
 0x451   : > { %4825 = vmatprep.subr.bf16.mxu1 %v6219_v32  ;;  %v1469_v14 = vld [vmem:[%s7188_s22 + $0xab8] sm:$0xff] }
 0x452   : > { %4785 = vmatpush1.bf16.msra.mxu0 %v6090_v40  ;;  %v1593_v21 = vld [vmem:[%s7188_s22 + $0xe98] sm:$0xff]  ;;  %v6163_v19 = vcombine.high %v1465_v43, %v1469_v14  ;;  %v6162_v32 = vcombine.low %v1465_v43, %v1469_v14 }
 0x453   : > { %4786 = vmatprep.subr.bf16.mxu0 %v6083_v41  ;;  %v1597_v22 = vld [vmem:[%s7188_s22 + $0xeb8] sm:$0xff] }
 0x454   : > { %4826 = vmatpush1.bf16.msra.mxu1 %v6218_v62  ;;  %v6291_v26 = vcombine.high %v1593_v21, %v1597_v22  ;;  %v1457_v28 = vld [vmem:[%s7188_s22 + $0xa58] sm:$0xff]  ;;  %v6290_v33 = vcombine.low %v1593_v21, %v1597_v22 }
 0x455   : > { %4827 = vmatprep.subr.bf16.mxu1 %v6211_v42  ;;  %v1461_v30 = vld [vmem:[%s7188_s22 + $0xa78] sm:$0xff] }
 0x456   : > { %4787 = vmatpush1.bf16.msra.mxu0 %v6082_v47  ;;  %v1585_v31 = vld [vmem:[%s7188_s22 + $0xe58] sm:$0xff]  ;;  %v6155_v34 = vcombine.high %v1457_v28, %v1461_v30  ;;  %v6154_v42 = vcombine.low %v1457_v28, %v1461_v30 }
 0x457   : > { %4788 = vmatprep.subr.bf16.mxu0 %v6203_v8  ;;  %v1589_v51 = vld [vmem:[%s7188_s22 + $0xe78] sm:$0xff] }
 0x458   : > { %4828 = vmatpush1.bf16.msra.mxu1 %v6210_v35  ;;  %v6283_v36 = vcombine.high %v1585_v31, %v1589_v51  ;;  %v1449_v37 = vld [vmem:[%s7188_s22 + $0xa18] sm:$0xff]  ;;  %v6282_v3 = vcombine.low %v1585_v31, %v1589_v51  ;;  %v1125_v51 = vld [vmem:[#allocation3 + $0x8] sm:$0xff] }
 0x459   : > { %4829 = vmatprep.subr.bf16.mxu1 %v6331_v49  ;;  %v1453_v40 = vld [vmem:[%s7188_s22 + $0xa38] sm:$0xff] }
 0x45a   : > { %4789 = vmatpush2.bf16.msra.mxu0 %v6202_v53  ;;  %v1577_v62 = vld [vmem:[%s7188_s22 + $0xe18] sm:$0xff]  ;;  %v6147_v44 = vcombine.high %v1449_v37, %v1453_v40  ;;  %v6146_v2 = vcombine.low %v1449_v37, %v1453_v40 }
 0x45b   : > { %4790 = vmatprep.subr.bf16.mxu0 %v6195_v54  ;;  %v1581_v41 = vld [vmem:[%s7188_s22 + $0xe38] sm:$0xff] }
 0x45c   : > { %4830 = vmatpush2.bf16.msra.mxu1 %v6330_v39  ;;  %v6275_v63 = vcombine.high %v1577_v62, %v1581_v41  ;;  %v6274_v47 = vcombine.low %v1577_v62, %v1581_v41 }
 0x45d   : > { %4831 = vmatprep.subr.bf16.mxu1 %v6323_v55 }
 0x45e   : > { %4791 = vmatpush2.bf16.msra.mxu0 %v6194_v1 }
 0x45f   : > { %4792 = vmatprep.subr.bf16.mxu0 %v6187_v24 }
 0x460   : > { %4832 = vmatpush2.bf16.msra.mxu1 %v6322_v45 }
 0x461   : > { %4833 = vmatprep.subr.bf16.mxu1 %v6315_v5 }
 0x462   : > { %4793 = vmatpush2.bf16.msra.mxu0 %v6186_v9 }
 0x463   : > { %4794 = vmatprep.subr.bf16.mxu0 %v6179_v11 }
 0x464   : > { %4834 = vmatpush2.bf16.msra.mxu1 %v6314_v10 }
 0x465   : > { %4835 = vmatprep.subr.bf16.mxu1 %v6307_v12 }
 0x466   : > { %4795 = vmatpush2.bf16.msra.mxu0 %v6178_v18 }
 0x467   : > { %4796 = vmatprep.subr.bf16.mxu0 %v6171_v29 }
 0x468   : > { %4836 = vmatpush2.bf16.msra.mxu1 %v6306_v20 }
 0x469   : > { %4837 = vmatprep.subr.bf16.mxu1 %v6299_v38 }
 0x46a   : > { %4797 = vmatpush2.bf16.msra.mxu0 %v6170_v23 }
 0x46b   : > { %4798 = vmatprep.subr.bf16.mxu0 %v6163_v19 }
 0x46c   : > { %4838 = vmatpush2.bf16.msra.mxu1 %v6298_v25 }
 0x46d   : > { %4839 = vmatprep.subr.bf16.mxu1 %v6291_v26 }
 0x46e   : > { %4799 = vmatpush2.bf16.msra.mxu0 %v6162_v32 }
 0x46f   : > { %4800 = vmatprep.subr.bf16.mxu0 %v6155_v34 }
 0x470   : > { %4840 = vmatpush2.bf16.msra.mxu1 %v6290_v33 }
 0x471   : > { %4841 = vmatprep.subr.bf16.mxu1 %v6283_v36 }
 0x472   : > { %4801 = vmatpush2.bf16.msra.mxu0 %v6154_v42 }
 0x473   : > { %4802 = vmatprep.subr.bf16.mxu0 %v6147_v44 }
 0x474   : > { %4842 = vmatpush2.bf16.msra.mxu1 %v6282_v3 }
 0x475   : > { %4843 = vmatprep.subr.bf16.mxu1 %v6275_v63 }
 0x476   : > { %4803 = vmatpush2.bf16.msra.mxu0 %v6146_v2 }
 0x478   : > { %4844 = vmatpush2.bf16.msra.mxu1 %v6274_v47 }
 0x479   : > { %v4560_v35 = vpop.f32.mrf.mxu0  ;;  %4805 = vmatmul.mubr.bf16.vlgmr.msra.gmra.mxu0 %v7622_v58 }
 0x47b   : > { %v4601_v8 = vpop.f32.mrf.mxu1  ;;  %4846 = vmatmul.mubr.bf16.vlgmr.msra.gmra.mxu1 %v7628_v61  ;;  %v4562_v50 = vpop.f32.mrf.mxu0 }
 0x47c   : > { %v4602_v49 = vadd.f32 %v4601_v8, %v4560_v35 }
 0x47d   : > { %v4603_v52 = vpop.f32.mrf.mxu1  ;;  %v4564_v6 = vpop.f32.mrf.mxu0 }
 0x47e   : > { %v4604_v4 = vadd.f32 %v4603_v52, %v4562_v50 }
 0x47f   : > { %v4605_v53 = vpop.f32.mrf.mxu1  ;;  %v4565_v39 = vpop.f32.mrf.mxu0 }
 0x481   : > { %v4606_v54 = vpop.f32.mrf.mxu1 }
 0x4b9   : > { %v4642_v55 = vpop.f32.mrf.mxu0 }
 0x4ba   : > { %v4643_v56 = vadd.f32 %v4642_v55, %v4602_v49 }
 0x4bb   : > { %v4683_v59 = vpop.f32.mrf.mxu1  ;;  %v4644_v60 = vpop.f32.mrf.mxu0 }
 0x4bc   : > { %v4684_v0 = vadd.f32 %v4683_v59, %v4643_v56  ;;  %v4645_v1 = vadd.f32 %v4644_v60, %v4604_v4 }
 0x4bd   : > { %v4685_v45 = vpop.f32.mrf.mxu1  ;;  %v4646_v24 = vpop.f32.mrf.mxu0 }
 0x4be   : > { %v4686_v58 = vadd.f32 %v4685_v45, %v4645_v1 }
 0x4bf   : > { %v4687_v5 = vpop.f32.mrf.mxu1  ;;  %v4647_v27 = vpop.f32.mrf.mxu0 }
 0x4c0   : > { %v4879_v61 = vcombine.low %v4684_v0, %v4686_v58 }
 0x4c1   : > { %v4688_v48 = vpop.f32.mrf.mxu1 }
 0x4c2   : > { %v4887_v30 = vrot.slane %v4879_v61, %v7464_v57 }
 0x4f9   : > { %v4724_v7 = vpop.f32.mrf.mxu0 }
 0x4fb   : > { %v4765_v46 = vpop.f32.mrf.mxu1  ;;  %v4726_v9 = vpop.f32.mrf.mxu0 }
 0x4fc   : > { %v4766_v16 = vadd.f32 %v4765_v46, %v4724_v7 }
 0x4fd   : > { %v4767_v10 = vpop.f32.mrf.mxu1  ;;  %v4728_v11 = vpop.f32.mrf.mxu0 }
 0x4fe   : > { %v4768_v18 = vadd.f32 %v4767_v10, %v4726_v9 }
 0x4ff   : > { %v4769_v12 = vpop.f32.mrf.mxu1  ;;  %v4729_v13 = vpop.f32.mrf.mxu0 }
 0x501   : > { %v4770_v15 = vpop.f32.mrf.mxu1 }
 0x539   : > { %v4806_v17 = vpop.f32.mrf.mxu0 }
 0x53a   : > { %v4807_v20 = vadd.f32 %v4806_v17, %v4766_v16 }
 0x53b   : > { %v4847_v29 = vpop.f32.mrf.mxu1  ;;  %v4808_v38 = vpop.f32.mrf.mxu0 }
 0x53c   : > { %v4809_v43 = vadd.f32 %v4808_v38, %v4768_v18  ;;  %v4848_v22 = vadd.f32 %v4847_v29, %v4807_v20 }
 0x53d   : > { %v4849_v14 = vpop.f32.mrf.mxu1  ;;  %v4810_v21 = vpop.f32.mrf.mxu0 }
 0x53e   : > { %v4850_v23 = vadd.f32 %v4849_v14, %v4809_v43 }
 0x53f   : > { %v4851_v25 = vpop.f32.mrf.mxu1  ;;  %v4811_v19 = vpop.f32.mrf.mxu0 }
 0x540   : > { %v4880_v26 = vcombine.low %v4848_v22, %v4850_v23 }
 0x541   : > { %v4852_v28 = vpop.f32.mrf.mxu1 }
 0x542   : > { %v4894_v31 = vrot.slane %v4880_v26, %v7464_v57 }
 0x544   : > { %v4895_v32 = vcombine.low %v4887_v30, %v4894_v31  ;;  %4905 = sbr.rel (%p6332_p9) target bundleno = 1621 (0x655), region = 88 }
 0x546   : > { %v4899_v33 = vadd.f32 %v4895_v32, %v1125_v51 }
 0x548   : > { %4901 = vst [vmem:[#allocation3 + $0x8] sm:$0xff] %v4899_v33 }
 0x549   : > { %v6633_v34 = vld [vmem:[#allocation13 + $0x78] sm:$0xff]   ;;  %v6637_v62 = vld [vmem:[#allocation13 + $0x70] sm:$0xff]   ;;  %v6641_v44 = vld [vmem:[#allocation13 + $0x68] sm:$0xff]  }
 0x54a   : > { %v6634_v36 = vld [vmem:[#allocation13 + $0xf8] sm:$0xff]   ;;  %6410 = vmatprep.subr.bf16.mxu0 %v6633_v34  ;;  %v6638_v41 = vld [vmem:[#allocation13 + $0xf0] sm:$0xff]   ;;  %v6642_v63 = vld [vmem:[#allocation13 + $0xe8] sm:$0xff]  }
 0x54b   : > { %v6635_v37 = vld [vmem:[#allocation13 + $0x38] sm:$0xff]   ;;  %6432 = vmatprep.subr.bf16.mxu1 %v6634_v36  ;;  %v6639_v42 = vld [vmem:[#allocation13 + $0x30] sm:$0xff]   ;;  %v6643_v2 = vld [vmem:[#allocation13 + $0x28] sm:$0xff]  }
 0x54c   : > { %v6636_v40 = vld [vmem:[#allocation13 + $0xb8] sm:$0xff]   ;;  %6411 = vmatpush3.bf16.msra.mxu0 %v6635_v37  ;;  %v6640_v3 = vld [vmem:[#allocation13 + $0xb0] sm:$0xff]   ;;  %v6644_v47 = vld [vmem:[#allocation13 + $0xa8] sm:$0xff]  }
 0x54d   : > { %6433 = vmatpush3.bf16.msra.mxu1 %v6636_v40  ;;  %6412 = vmatprep.subr.bf16.mxu0 %v6637_v62  ;;  %v6645_v35 = vld [vmem:[#allocation13 + $0x60] sm:$0xff]   ;;  %v6649_v52 = vld [vmem:[#allocation13 + $0x58] sm:$0xff]   ;;  %v6653_v39 = vld [vmem:[#allocation13 + $0x50] sm:$0xff]  }
 0x54e   : > { %6434 = vmatprep.subr.bf16.mxu1 %v6638_v41  ;;  %v6646_v8 = vld [vmem:[#allocation13 + $0xe0] sm:$0xff]   ;;  %v6650_v4 = vld [vmem:[#allocation13 + $0xd8] sm:$0xff]   ;;  %v6654_v54 = vld [vmem:[#allocation13 + $0xd0] sm:$0xff]  }
 0x54f   : > { %v6647_v49 = vld [vmem:[#allocation13 + $0x20] sm:$0xff]   ;;  %v6651_v6 = vld [vmem:[#allocation13 + $0x18] sm:$0xff]   ;;  %v6655_v55 = vld [vmem:[#allocation13 + $0x10] sm:$0xff]  }
 0x550   : > { %6413 = vmatpush3.bf16.msra.mxu0 %v6639_v42  ;;  %v6648_v50 = vld [vmem:[#allocation13 + $0xa0] sm:$0xff]   ;;  %v6652_v53 = vld [vmem:[#allocation13 + $0x98] sm:$0xff]   ;;  %v6656_v56 = vld [vmem:[#allocation13 + $0x90] sm:$0xff]  }
 0x551   : > { %6435 = vmatpush3.bf16.msra.mxu1 %v6640_v3  ;;  %6414 = vmatprep.subr.bf16.mxu0 %v6641_v44  ;;  %v6657_v59 = vld [vmem:[#allocation13 + $0x48] sm:$0xff]   ;;  %v6661_v45 = vld [vmem:[#allocation13 + $0x40] sm:$0xff]   ;;  %v4906_v27 = vld [vmem:[#allocation3] sm:$0xff] }
 0x552   : > { %6436 = vmatprep.subr.bf16.mxu1 %v6642_v63  ;;  %v6658_v60 = vld [vmem:[#allocation13 + $0xc8] sm:$0xff]   ;;  %v6662_v24 = vld [vmem:[#allocation13 + $0xc0] sm:$0xff]   ;;  %v4908_v61 = vmax.f32 %v4906_v27, 0.0  ;;  %v6665_v48 = vld [vmem:[#allocation13 + $0x178] sm:$0xff]  }
 0x553   : > { %v6659_v0 = vld [vmem:[#allocation13 + $0x8] sm:$0xff]   ;;  %v6663_v58 = vld [vmem:[#allocation13] sm:$0xff]   ;;  %v6666_v7 = vld [vmem:[#allocation13 + $0x1f8] sm:$0xff]  }
 0x554   : > { %6415 = vmatpush3.bf16.msra.mxu0 %v6643_v2  ;;  %v6660_v1 = vld [vmem:[#allocation13 + $0x88] sm:$0xff]   ;;  %v6664_v5 = vld [vmem:[#allocation13 + $0x80] sm:$0xff]   ;;  %v4919_v46 = vrot.slane %v4908_v61, %v7464_v57  ;;  %v4912_v9 = vcombine.high %v4908_v61, %v4908_v61  ;;  %v6667_v16 = vld [vmem:[#allocation13 + $0x138] sm:$0xff]  }
 0x555   : > { %6437 = vmatpush3.bf16.msra.mxu1 %v6644_v47  ;;  %6416 = vmatprep.subr.bf16.mxu0 %v6645_v35  ;;  %v6669_v18 = vld [vmem:[#allocation13 + $0x170] sm:$0xff]   ;;  %v6668_v29 = vld [vmem:[#allocation13 + $0x1b8] sm:$0xff]   ;;  %v6673_v14 = vld [vmem:[#allocation13 + $0x168] sm:$0xff]  }
 0x556   : > { %6438 = vmatprep.subr.bf16.mxu1 %v6646_v8  ;;  %v4927_v10 = vcombine.high %v4919_v46, %v4919_v46  ;;  %v4926_v11 = vrot.slane %v4912_v9, %v7464_v57  ;;  %v4954_v12 = vpack.c.bf16 %v4919_v46, %v4919_v46  ;;  %v6670_v38 = vld [vmem:[#allocation13 + $0x1f0] sm:$0xff]   ;;  %v6674_v22 = vld [vmem:[#allocation13 + $0x1e8] sm:$0xff]   ;;  %v6677_v25 = vld [vmem:[#allocation13 + $0x160] sm:$0xff]  }
 0x557   : > { %v6671_v43 = vld [vmem:[#allocation13 + $0x130] sm:$0xff]   ;;  %v6675_v23 = vld [vmem:[#allocation13 + $0x128] sm:$0xff]   ;;  %v6678_v26 = vld [vmem:[#allocation13 + $0x1e0] sm:$0xff]  }
 0x558   : > { %6417 = vmatpush3.bf16.msra.mxu0 %v6647_v49  ;;  %v4955_v13 = vpack.c.bf16 %v4927_v10, %v4927_v10  ;;  %v4928_v15 = vcombine.high %v4926_v11, %v4926_v11  ;;  %v4956_v17 = vpack.c.bf16 %v4926_v11, %v4926_v11  ;;  %v6672_v21 = vld [vmem:[#allocation13 + $0x1b0] sm:$0xff]   ;;  %v6676_v19 = vld [vmem:[#allocation13 + $0x1a8] sm:$0xff]   ;;  %v6679_v28 = vld [vmem:[#allocation13 + $0x120] sm:$0xff]  }
 0x559   : > { %6439 = vmatpush3.bf16.msra.mxu1 %v6648_v50  ;;  %6418 = vmatprep.subr.bf16.mxu0 %v6649_v52  ;;  %v6681_v30 = vld [vmem:[#allocation13 + $0x158] sm:$0xff]   ;;  %v6680_v31 = vld [vmem:[#allocation13 + $0x1a0] sm:$0xff]   ;;  %v6685_v33 = vld [vmem:[#allocation13 + $0x150] sm:$0xff]  }
 0x55a   : > { %6440 = vmatprep.subr.bf16.mxu1 %v6650_v4  ;;  %5513 = vmatprep.mubr.bf16.mxu0 %v4955_v13  ;;  %v4957_v20 = vpack.c.bf16 %v4928_v15, %v4928_v15  ;;  %v6682_v51 = vld [vmem:[#allocation13 + $0x1d8] sm:$0xff]   ;;  %v6686_v36 = vld [vmem:[#allocation13 + $0x1d0] sm:$0xff]   ;;  %v6689_v40 = vld [vmem:[#allocation13 + $0x148] sm:$0xff]  }
 0x55b   : > { %v6683_v32 = vld [vmem:[#allocation13 + $0x118] sm:$0xff]   ;;  %v6687_v37 = vld [vmem:[#allocation13 + $0x110] sm:$0xff]   ;;  %v6690_v41 = vld [vmem:[#allocation13 + $0x1c8] sm:$0xff]  }
 0x55c   : > { %6419 = vmatpush3.bf16.msra.mxu0 %v6651_v6  ;;  %5553 = vmatprep.mubr.bf16.mxu1 %v4957_v20  ;;  %v6684_v34 = vld [vmem:[#allocation13 + $0x198] sm:$0xff]   ;;  %v6688_v62 = vld [vmem:[#allocation13 + $0x190] sm:$0xff]   ;;  %v6691_v42 = vld [vmem:[#allocation13 + $0x108] sm:$0xff]  }
 0x55d   : > { %6441 = vmatpush3.bf16.msra.mxu1 %v6652_v53  ;;  %6420 = vmatprep.subr.bf16.mxu0 %v6653_v39  ;;  %v6693_v3 = vld [vmem:[#allocation13 + $0x140] sm:$0xff]   ;;  %v6692_v63 = vld [vmem:[#allocation13 + $0x188] sm:$0xff]  }
 0x55e   : > { %6442 = vmatprep.subr.bf16.mxu1 %v6654_v54  ;;  %v4907_v44 = vld [vmem:[#allocation3 + $0x8] sm:$0xff] }
 0x55f   : > { %v4909_v2 = vmax.f32 %v4907_v44, 0.0  ;;  %v6694_v47 = vld [vmem:[#allocation13 + $0x1c0] sm:$0xff]  }
 0x560   : > { %6421 = vmatpush3.bf16.msra.mxu0 %v6655_v55  ;;  %v6695_v35 = vld [vmem:[#allocation13 + $0x100] sm:$0xff]  }
 0x561   : > { %6443 = vmatpush3.bf16.msra.mxu1 %v6656_v56  ;;  %6422 = vmatprep.subr.bf16.mxu0 %v6657_v59  ;;  %v4936_v8 = vrot.slane %v4909_v2, %v7464_v57  ;;  %v4929_v49 = vcombine.high %v4909_v2, %v4909_v2  ;;  %v6696_v50 = vld [vmem:[#allocation13 + $0x180] sm:$0xff]  }
 0x562   : > { %6444 = vmatprep.subr.bf16.mxu1 %v6658_v60 }
 0x563   : > { %v4944_v52 = vcombine.high %v4936_v8, %v4936_v8  ;;  %v4943_v4 = vrot.slane %v4929_v49, %v7464_v57  ;;  %v4958_v6 = vpack.c.bf16 %v4936_v8, %v4936_v8 }
 0x564   : > { %6423 = vmatpush3.bf16.msra.mxu0 %v6659_v0 }
 0x565   : > { %6445 = vmatpush3.bf16.msra.mxu1 %v6660_v1  ;;  %6424 = vmatprep.subr.bf16.mxu0 %v6661_v45  ;;  %v4959_v53 = vpack.c.bf16 %v4944_v52, %v4944_v52  ;;  %v4945_v39 = vcombine.high %v4943_v4, %v4943_v4  ;;  %v4960_v54 = vpack.c.bf16 %v4943_v4, %v4943_v4 }
 0x566   : > { %6446 = vmatprep.subr.bf16.mxu1 %v6662_v24 }
 0x567   : > { %v4961_v55 = vpack.c.bf16 %v4945_v39, %v4945_v39 }
 0x568   : > { %6425 = vmatpush3.bf16.msra.mxu0 %v6663_v58 }
 0x569   : > { %6447 = vmatpush3.bf16.msra.mxu1 %v6664_v5  ;;  %6454 = vmatprep.subr.bf16.mxu0 %v6665_v48  ;;  %v6333_v5 = vld [vmem:[#allocation15] ss:$0 sm:$0xff] }
 0x56a   : > { %6476 = vmatprep.subr.bf16.mxu1 %v6666_v7 }
 0x56b   : > { %5514 = vmatmul.mubr.bf16.vlgmr.msra.gmra.mxu0 %v4954_v12 }
 0x56c   : > { %6455 = vmatpush3.bf16.msra.mxu0 %v6667_v16  ;;  %5554 = vmatmul.mubr.bf16.vlgmr.msra.gmra.mxu1 %v4956_v17 }
 0x56d   : > { %6456 = vmatprep.subr.bf16.mxu0 %v6669_v18  ;;  %6477 = vmatpush3.bf16.msra.mxu1 %v6668_v29 }
 0x56e   : > { %6478 = vmatprep.subr.bf16.mxu1 %v6670_v38  ;;  %5593 = vmatprep.mubr.bf16.mxu0 %v4959_v53 }
 0x56f   : > { %5633 = vmatprep.mubr.bf16.mxu1 %v4961_v55 }
 0x570   : > { %6457 = vmatpush3.bf16.msra.mxu0 %v6671_v43 }
 0x571   : > { %6458 = vmatprep.subr.bf16.mxu0 %v6673_v14  ;;  %6479 = vmatpush3.bf16.msra.mxu1 %v6672_v21 }
 0x572   : > { %6480 = vmatprep.subr.bf16.mxu1 %v6674_v22 }
 0x574   : > { %6459 = vmatpush3.bf16.msra.mxu0 %v6675_v23 }
 0x575   : > { %6460 = vmatprep.subr.bf16.mxu0 %v6677_v25  ;;  %6481 = vmatpush3.bf16.msra.mxu1 %v6676_v19 }
 0x576   : > { %6482 = vmatprep.subr.bf16.mxu1 %v6678_v26 }
 0x578   : > { %6461 = vmatpush3.bf16.msra.mxu0 %v6679_v28 }
 0x579   : > { %6462 = vmatprep.subr.bf16.mxu0 %v6681_v30  ;;  %6483 = vmatpush3.bf16.msra.mxu1 %v6680_v31 }
 0x57a   : > { %6484 = vmatprep.subr.bf16.mxu1 %v6682_v51 }
 0x57c   : > { %6463 = vmatpush3.bf16.msra.mxu0 %v6683_v32 }
 0x57d   : > { %6464 = vmatprep.subr.bf16.mxu0 %v6685_v33  ;;  %6485 = vmatpush3.bf16.msra.mxu1 %v6684_v34 }
 0x57e   : > { %6486 = vmatprep.subr.bf16.mxu1 %v6686_v36 }
 0x580   : > { %6465 = vmatpush3.bf16.msra.mxu0 %v6687_v37 }
 0x581   : > { %6466 = vmatprep.subr.bf16.mxu0 %v6689_v40  ;;  %6487 = vmatpush3.bf16.msra.mxu1 %v6688_v62 }
 0x582   : > { %6488 = vmatprep.subr.bf16.mxu1 %v6690_v41 }
 0x584   : > { %6467 = vmatpush3.bf16.msra.mxu0 %v6691_v42 }
 0x585   : > { %6468 = vmatprep.subr.bf16.mxu0 %v6693_v3  ;;  %6489 = vmatpush3.bf16.msra.mxu1 %v6692_v63 }
 0x586   : > { %6490 = vmatprep.subr.bf16.mxu1 %v6694_v47 }
 0x588   : > { %6469 = vmatpush3.bf16.msra.mxu0 %v6695_v35 }
 0x589   : > { %6491 = vmatpush3.bf16.msra.mxu1 %v6696_v50 }
 0x58b   : > { %5594 = vmatmul.mubr.bf16.vlgmr.msra.gmra.mxu0 %v4958_v6 }
 0x58c   : > { %5634 = vmatmul.mubr.bf16.vlgmr.msra.gmra.mxu1 %v4960_v54 }
 0x62b   : > { %v6426_v56 = vpop.f32.mrf.mxu0 }
 0x62c   : > { %v6448_v59 = vpop.f32.mrf.mxu1 }
 0x62d   : > { %v6427_v60 = vpop.f32.mrf.mxu0 }
 0x62e   : > { %v6449_v0 = vpop.f32.mrf.mxu1  ;;  %v6428_v58 = vadd.f32 %v6427_v60, %v6426_v56 }
 0x62f   : > { %v6429_v1 = vpop.f32.mrf.mxu0  ;;  %v6450_v61 = vadd.f32 %v6449_v0, %v6448_v59 }
 0x630   : > { %v6451_v45 = vpop.f32.mrf.mxu1  ;;  %v5516_v27 = vadd.f32 %v6428_v58, %v6333_v5 }
 0x631   : > { %v6430_v24 = vpop.f32.mrf.mxu0 }
 0x632   : > { %v6452_v57 = vpop.f32.mrf.mxu1  ;;  %v5556_v9 = vadd.f32 %v6450_v61, %v5516_v27 }
 0x64b   : > { %v6470_v48 = vpop.f32.mrf.mxu0 }
 0x64c   : > { %v6492_v7 = vpop.f32.mrf.mxu1 }
 0x64d   : > { %v6471_v46 = vpop.f32.mrf.mxu0 }
 0x64e   : > { %v6472_v10 = vadd.f32 %v6471_v46, %v6470_v48  ;;  %v6493_v11 = vpop.f32.mrf.mxu1 }
 0x64f   : > { %v6473_v12 = vpop.f32.mrf.mxu0  ;;  %v6494_v15 = vadd.f32 %v6493_v11, %v6492_v7 }
 0x650   : > { %v5596_v13 = vadd.f32 %v6472_v10, %v5556_v9  ;;  %v6495_v16 = vpop.f32.mrf.mxu1 }
 0x651   : > { %v6474_v17 = vpop.f32.mrf.mxu0 }
 0x652   : > { %v5636_v18 = vadd.f32 %v6494_v15, %v5596_v13  ;;  %v6496_v20 = vpop.f32.mrf.mxu1 }
 0x654   : > { %5641 = vst [vmem:[#allocation16] sm:$0x3] %v5636_v18 }
 0x655 PF: > { %p6578_p10 = scmp.eq.s32.totalorder %s7047_s11, 1  ;;  %s6980_s22 = smov [#allocation16]  }
 0x656   : > { %s5649_s16 = sshll.u32 %s6980_s22, 4  ;;  %s5650_s16 = int_to_ptr.vmem [resolvable:$true] %s5649_s16 }
 0x657   : > { %s6881_s19 = scalar_lea.vmem %s5650_s16, 32  ;;  %p6888_p3 = scmp.lt.s32.totalorder %s5650_s16, %s5650_s16 }
 0x658   : > { %p6882_p13 = scmp.ne.s32.totalorder %s5650_s16, %s6881_s19  ;;  %p6889_p4 = scmp.lt.s32.totalorder %s6881_s19, %s6881_s19 }
 0x65a   : > { %p6883_p12 = pnand %p6882_p13, %p6578_p10  ;;  %p6890_p11 = por %p6889_p4, %p6888_p3 }
 0x65c   : > { %p6884_p0 = pneg %p6883_p12 }
 0x65e   : > { %p6891_p6 = pnand %p6890_p11, %p6884_p0 }
 0x660   : > { %6894 = shalt.err (!%p6891_p6)
}
 0x661   : > { %6539 = dma.vmem_to_hbm [thread:$0]  (%p6578_p10), %s5650_s16, 32, %s8101_s8, [#allocation6]  }
 0x662   : > { %6942 = dma.done.wait (%p6578_p10), [#allocation6], 32  }
 0x663   : > { %6944 = vsyncadd (%p6578_p10), [#allocation6], 4294967264 }
 0x664 PF: > { %p22_p7 = scmp.ge.s32.totalorder %s7121_s18, 4   ;;  %s8122_s27 = smov %s6951_s28 }
 0x665   : > { %s8123_s28 = smov %s6955_s29  ;;  %s8124_s29 = smov %s7133_s17 }
 0x666   : > { %s8125_s30 = smov %s7121_s18  ;;  %24 = sbr.rel (!%p22_p7) target bundleno = 7 (0x7), region = 127 }
 0x66b   :  { %5662 = vsyncpa [#allocation5], 1 }
 0x66c   :  { %5664 = vsyncpa [#allocation5 + $0x1], 1 }
 0x66d   :  { %5665 = vsyncpa [#allocation8], 1 }
 0x66e   :  { %5666 = vsyncpa [#allocation11], 1 }
 0x66f   :  { %5668 = vsyncpa [#allocation11 + $0x1], 1 }
 0x670   :  { %5669 = vsyncpa [#allocation14], 1 }
 0x671   :  { %5670 = vsyncpa [#allocation6], 1 }
 0x672   :  { %5672 = vsyncpa [#allocation6 + $0x1], 1 }

</bundles_post_ra>
